<compile_context>
chip_gen: v7x
topology: tpu7x:2x2x1
jax: 0.10.0
libtpu: 0.0.40
codegen_flags: <defaults>
</compile_context>

<pallas_src>
import math

import jax
import jax.numpy as jnp
from jax.experimental import pallas as pl
from jax.experimental.pallas import tpu as pltpu

BATCH = 2
Z_DIM = 32            # latent dim (synthetic small config; real model uses 512)
W_DIM = 32
IMG_CH = 3
CH = 16               # channel count at every synthesis resolution
FINAL_RES = 16
NUM_CONVS = 5         # b4_conv1, b8_conv0, b8_conv1, b16_conv0, b16_conv1
NUM_RGBS = 3          # b4_rgb, b8_rgb, b16_rgb
NUM_STYLES = NUM_CONVS + NUM_RGBS          # 8 -> packed affine is (32, 128)
LRELU_GAIN = math.sqrt(2.0)

CONV_RES = (4, 8, 8, 16, 16)               # resolution of each conv
RGB_RES = (4, 8, 16)                       # resolution of each toRGB

# style slot order inside the packed (B, 8*CH) style matrix:
#   slots 0..4  = conv styles (conv order above)   -> contiguous for fused demod
#   slots 5..7  = toRGB styles (rgb order above)


# --------------------------------------------------------------------------
# The single fused Pallas kernel
# --------------------------------------------------------------------------
def stylegan2_kernel(z_ref, mw_ref, mb_ref, aw_ref, ab_ref, wsq_ref, const_ref,
                     cw0_ref, cw1_ref, cw2_ref, cw3_ref, cw4_ref,
                     nb0_ref, nb1_ref, nb2_ref, nb3_ref, nb4_ref,
                     rw0_ref, rw1_ref, rw2_ref, rb0_ref, rb1_ref, rb2_ref,
                     lua8_ref, lua16_ref, lui8_ref, lui16_ref,
                     ru8_ref, ru16_ref, img_ref):
    B = BATCH

    def lrelu(v):
        # gain folded into both branches of the select
        return jnp.where(v >= 0.0, v * LRELU_GAIN, v * (0.2 * LRELU_GAIN))

    # ---- mapping network: pixel-norm + 2x (FC + lrelu) ----------------------
    x = z_ref[...]                                            # (B, Z_DIM)
    x = x * jax.lax.rsqrt(jnp.mean(x * x, axis=1, keepdims=True) + 1e-8)
    for i in range(2):
        x = lrelu(jnp.dot(x, mw_ref[i],
                          preferred_element_type=jnp.float32) + mb_ref[i])
    wlat = x                                                  # (B, W_DIM)

    # ---- all 8 style affines in ONE matmul; all 5 demods in ONE matmul ------
    styles = jnp.dot(wlat, aw_ref[...],
                     preferred_element_type=jnp.float32) + ab_ref[...]   # (B,128)
    conv_s2 = styles[:, :NUM_CONVS * CH] ** 2                            # (B, 80)
    demods = jax.lax.rsqrt(
        jnp.dot(conv_s2, wsq_ref[...], preferred_element_type=jnp.float32)
        + 1e-8)                                                          # (B, 80)

    # ---- layout helpers ------------------------------------------------------
    def expand_mod(vec, W, H):
        # per-sample channel vector (B, C) -> (B*H, W*C), spatial-major lanes
        lane = jnp.concatenate([vec] * W, axis=1)             # (B, W*C)
        return jnp.concatenate(
            [jnp.broadcast_to(lane[i:i + 1, :], (H, lane.shape[1]))
             for i in range(B)], axis=0)                      # (B*H, W*C)

    def shift_rows(v, dy, H):
        # out[b*H+h, :] = v[b*H+h+dy, :], zero outside the sample's H rows.
        # dy tap = sublane roll (XLU) + iota edge mask (H is a power of two).
        if dy == 0:
            return v
        R = v.shape[0]
        rolled = pltpu.roll(v, (-dy) % R, 0)
        h = jax.lax.broadcasted_iota(jnp.int32, v.shape, 0) & (H - 1)
        keep = (h < H - dy) if dy > 0 else (h >= -dy)
        return jnp.where(keep, rolled, jnp.zeros_like(rolled))

    def modconv(act, li, W, cw_ref, nb_ref):
        # Modulated 3x3 conv in (B*H, W*C) layout: modulate input by style,
        # 3 block-banded matmuls (one per ky tap, dx baked into the band),
        # demodulate output, add const-noise + bias, leaky-ReLU.
        H = act.shape[0] // B
        s = styles[:, li * CH:(li + 1) * CH]                  # (B, C)
        d = demods[:, li * CH:(li + 1) * CH]                  # (B, C)
        xm = act * expand_mod(s, W, H)                        # modulate (f32)
        y = jnp.dot(xm.astype(jnp.bfloat16), cw_ref[1],       # ky = 1 (dy = 0)
                    preferred_element_type=jnp.float32)
        for ky in (0, 2):                                     # dy = -1, +1
            xk = shift_rows(xm, ky - 1, H).astype(jnp.bfloat16)
            y = y + jnp.dot(xk, cw_ref[ky],
                            preferred_element_type=jnp.float32)
        y = y * expand_mod(d, W, H) + nb_ref[...]             # demod + noise+bias
        return lrelu(y)

    def torgb(act, li, W, rw_ref, rb_ref):
        # 1x1 modulated conv (no demodulation) in the same layout; the weight
        # is a precomputed block-diagonal (W*C, W*3) bf16 matrix.
        H = act.shape[0] // B
        s = styles[:, (NUM_CONVS + li) * CH:(NUM_CONVS + li + 1) * CH]
        xm = (act * expand_mod(s, W, H)).astype(jnp.bfloat16)
        return jnp.dot(xm, rw_ref[...],
                       preferred_element_type=jnp.float32) + rb_ref[...]

    def upsample(x, lane_ref, row_ref):
        # nearest-neighbour 2x: one lane-duplication matmul + one row-dup matmul
        t = jnp.dot(x, lane_ref[...], preferred_element_type=jnp.float32)
        return jnp.dot(row_ref[...], t, preferred_element_type=jnp.float32)

    # ---- synthesis: 4x4 -> 8x8 -> 16x16, entirely in VMEM -------------------
    act = const_ref[...]                                      # (B*4, 4*16)
    act = modconv(act, 0, 4, cw0_ref, nb0_ref)
    img = torgb(act, 0, 4, rw0_ref, rb0_ref)                  # (B*4, 4*3)

    act = upsample(act, lua8_ref, ru8_ref)                    # (B*8, 8*16)
    img = upsample(img, lui8_ref, ru8_ref)                    # (B*8, 8*3)
    act = modconv(act, 1, 8, cw1_ref, nb1_ref)
    act = modconv(act, 2, 8, cw2_ref, nb2_ref)
    img = img + torgb(act, 1, 8, rw1_ref, rb1_ref)

    act = upsample(act, lua16_ref, ru16_ref)                  # (B*16, 16*16)
    img = upsample(img, lui16_ref, ru16_ref)                  # (B*16, 16*3)
    act = modconv(act, 3, 16, cw3_ref, nb3_ref)
    act = modconv(act, 4, 16, cw4_ref, nb4_ref)
    img = img + torgb(act, 2, 16, rw2_ref, rb2_ref)

    img_ref[...] = img.astype(img_ref.dtype)                  # (B*16, 48)


# --------------------------------------------------------------------------
# Parameters (deterministic, synthetic — no checkpoint loading)
# --------------------------------------------------------------------------
def _band_weights(w9, W):
    """w9: (3,3,Cin,Cout) -> (3, W*Cin, W*Cout) block-banded per-ky matrices.

    M[ky][win*Cin+ci, wout*Cout+co] = w9[ky, kx, ci, co] with win = wout+kx-1;
    x zero-padding falls out of the band structure automatically.
    """
    idx = jnp.arange(W)
    mats = []
    for ky in range(3):
        m = jnp.zeros((W * CH, W * CH), jnp.float32)
        for kx in range(3):
            shift = (idx[:, None] == (idx[None, :] + kx - 1)).astype(jnp.float32)
            m = m + jnp.kron(shift, w9[ky, kx])
        mats.append(m)
    return jnp.stack(mats)


def _dup_cols(W, blk):
    """(W*blk, 2W*blk) nearest-neighbour lane upsample in blk-sized blocks."""
    sel = (jnp.arange(W)[:, None] ==
           (jnp.arange(2 * W)[None, :] // 2)).astype(jnp.float32)       # (W, 2W)
    return jnp.kron(sel, jnp.eye(blk, dtype=jnp.float32))


def _dup_rows(H):
    """(B*2H, B*H) nearest-neighbour row duplication (per batch block)."""
    sel = ((jnp.arange(2 * H)[:, None] // 2) ==
           jnp.arange(H)[None, :]).astype(jnp.float32)                  # (2H, H)
    return jnp.kron(jnp.eye(BATCH, dtype=jnp.float32), sel)


def init_params(key):
    keys = iter(jax.random.split(key, 64))

    def nrm(shape, scale=1.0):
        return jax.random.normal(next(keys), shape, jnp.float32) * scale

    p = {}
    # mapping network: 2 FC layers W_DIM -> W_DIM
    p["map_w"] = jnp.stack([nrm((W_DIM, W_DIM), 1.0 / math.sqrt(W_DIM))
                            for _ in range(2)])                  # (2, 32, 32)
    p["map_b"] = jnp.zeros((2, 1, W_DIM), jnp.float32)

    # packed style affines: cols 0..79 conv styles, 80..127 toRGB styles
    p["aff_w"] = jnp.concatenate(
        [nrm((W_DIM, CH), 1.0 / math.sqrt(W_DIM)) for _ in range(NUM_STYLES)],
        axis=1)                                                  # (32, 128)
    p["aff_b"] = jnp.ones((1, NUM_STYLES * CH), jnp.float32)

    # learned constant input at res 4, pre-laid-out (H, W*C) and batch-tiled
    const = nrm((4, 4, CH))
    p["const"] = jnp.tile(const.reshape(4, 4 * CH), (BATCH, 1))  # (B*4, 64)

    # modulated convs: banded weights (bf16), fused-demod wsq, noise+bias slabs
    cw, nb, wsq = [], [], []
    for res in CONV_RES:
        w9 = nrm((3, 3, CH, CH), 1.0 / math.sqrt(9 * CH))
        cw.append(_band_weights(w9, res).astype(jnp.bfloat16))   # (3, r*C, r*C)
        wsq.append(jnp.sum(w9 * w9, axis=(0, 1)))                # (C, C)
        noise = nrm((res, res)) * 0.1      # const noise, pre-scaled by strength
        bias = jnp.zeros((CH,), jnp.float32)
        slab = jnp.repeat(noise, CH, axis=1) + jnp.tile(bias, (res,))[None, :]
        nb.append(jnp.tile(slab, (BATCH, 1)))                    # (B*r, r*C)
    p["cw"], p["nb"] = cw, nb

    # block-diagonal wsq for the single fused demodulation matmul (f32)
    wsq_bd = jnp.zeros((NUM_CONVS * CH, NUM_CONVS * CH), jnp.float32)
    for li, m in enumerate(wsq):
        wsq_bd = wsq_bd.at[li * CH:(li + 1) * CH, li * CH:(li + 1) * CH].set(m)
    p["wsq_bd"] = wsq_bd                                         # (80, 80)

    # toRGB: block-diagonal (W*C, W*3) bf16 weights + tiled biases
    rw, rb = [], []
    for res in RGB_RES:
        w1 = nrm((CH, IMG_CH), 1.0 / math.sqrt(CH))
        rw.append(jnp.kron(jnp.eye(res, dtype=jnp.float32),
                           w1).astype(jnp.bfloat16))             # (r*C, r*3)
        rb.append(jnp.zeros((1, res * IMG_CH), jnp.float32))
    p["rw"], p["rb"] = rw, rb

    # nearest-neighbour 2x upsample matrices (shared row-dup for act & img)
    p["lua8"], p["lua16"] = _dup_cols(4, CH), _dup_cols(8, CH)        # act lanes
    p["lui8"], p["lui16"] = _dup_cols(4, IMG_CH), _dup_cols(8, IMG_CH)  # img lanes
    p["ru8"], p["ru16"] = _dup_rows(4), _dup_rows(8)                  # rows
    return p


# --------------------------------------------------------------------------
# Forward pass:  z -> mapping -> w -> synthesis -> images [B, 3, H, W]
# --------------------------------------------------------------------------
def stylegan2_forward(z, p):
    args = [z, p["map_w"], p["map_b"], p["aff_w"], p["aff_b"], p["wsq_bd"],
            p["const"]]
    args += list(p["cw"]) + list(p["nb"]) + list(p["rw"]) + list(p["rb"])
    args += [p["lua8"], p["lua16"], p["lui8"], p["lui16"], p["ru8"], p["ru16"]]

    vmem = pl.BlockSpec(memory_space=pltpu.MemorySpace.VMEM)
    out = pl.pallas_call(
        stylegan2_kernel,
        out_shape=jax.ShapeDtypeStruct(
            (BATCH * FINAL_RES, FINAL_RES * IMG_CH), jnp.float32),
        in_specs=[vmem] * len(args),
        out_specs=vmem,
    )(*args)

    # (B*H, W*3) -> (B, H, W, 3) -> NCHW (PyTorch convention); tiny 3 KiB op.
    img = out.reshape(BATCH, FINAL_RES, FINAL_RES, IMG_CH)
    return jnp.transpose(img, (0, 3, 1, 2))


if __name__ == "__main__":
    key = jax.random.PRNGKey(0)
    params = init_params(key)
    z = jax.random.normal(jax.random.fold_in(key, 1234), (BATCH, Z_DIM),
                          jnp.float32)

    images = jax.jit(stylegan2_forward)(z, params)
    images = jax.block_until_ready(images)

    assert images.shape == (BATCH, IMG_CH, FINAL_RES, FINAL_RES), images.shape
    assert images.dtype == jnp.float32
    assert bool(jnp.all(jnp.isfinite(images)))
    print("KERNEL_OK")
</pallas_src>

<mosaic_0001>
module attributes {stable_mosaic.version = 11 : i64} {
  func.func @stylegan2_kernel(%arg0: memref<2x32xf32, #tpu.memory_space<vmem>>, %arg1: memref<2x32x32xf32, #tpu.memory_space<vmem>>, %arg2: memref<2x1x32xf32, #tpu.memory_space<vmem>>, %arg3: memref<32x128xf32, #tpu.memory_space<vmem>>, %arg4: memref<1x128xf32, #tpu.memory_space<vmem>>, %arg5: memref<80x80xf32, #tpu.memory_space<vmem>>, %arg6: memref<8x64xf32, #tpu.memory_space<vmem>>, %arg7: memref<3x64x64xbf16, #tpu.memory_space<vmem>>, %arg8: memref<3x128x128xbf16, #tpu.memory_space<vmem>>, %arg9: memref<3x128x128xbf16, #tpu.memory_space<vmem>>, %arg10: memref<3x256x256xbf16, #tpu.memory_space<vmem>>, %arg11: memref<3x256x256xbf16, #tpu.memory_space<vmem>>, %arg12: memref<8x64xf32, #tpu.memory_space<vmem>>, %arg13: memref<16x128xf32, #tpu.memory_space<vmem>>, %arg14: memref<16x128xf32, #tpu.memory_space<vmem>>, %arg15: memref<32x256xf32, #tpu.memory_space<vmem>>, %arg16: memref<32x256xf32, #tpu.memory_space<vmem>>, %arg17: memref<64x12xbf16, #tpu.memory_space<vmem>>, %arg18: memref<128x24xbf16, #tpu.memory_space<vmem>>, %arg19: memref<256x48xbf16, #tpu.memory_space<vmem>>, %arg20: memref<1x12xf32, #tpu.memory_space<vmem>>, %arg21: memref<1x24xf32, #tpu.memory_space<vmem>>, %arg22: memref<1x48xf32, #tpu.memory_space<vmem>>, %arg23: memref<64x128xf32, #tpu.memory_space<vmem>>, %arg24: memref<128x256xf32, #tpu.memory_space<vmem>>, %arg25: memref<12x24xf32, #tpu.memory_space<vmem>>, %arg26: memref<24x48xf32, #tpu.memory_space<vmem>>, %arg27: memref<16x8xf32, #tpu.memory_space<vmem>>, %arg28: memref<32x16xf32, #tpu.memory_space<vmem>>, %arg29: memref<32x48xf32, #tpu.memory_space<vmem>>) attributes {dimension_semantics = [], scalar_prefetch = 0 : i64, scratch_operands = 0 : i64, tpu.core_type = #tpu.core_type<tc>} {
    %c0 = arith.constant 0 : index
    %c0_0 = arith.constant 0 : index
    %0 = vector.load %arg0[%c0, %c0_0] : memref<2x32xf32, #tpu.memory_space<vmem>>, vector<2x32xf32>
    %1 = arith.mulf %0, %0 : vector<2x32xf32>
    %cst = arith.constant dense<0.000000e+00> : vector<2xf32>
    %2 = vector.multi_reduction <add>, %1, %cst [1] : vector<2x32xf32> to vector<2xf32>
    %3 = vector.shape_cast %2 : vector<2xf32> to vector<2x1xf32>
    %cst_1 = arith.constant 3.200000e+01 : f32
    %4 = vector.broadcast %cst_1 : f32 to vector<2x1xf32>
    %5 = arith.divf %3, %4 : vector<2x1xf32>
    %cst_2 = arith.constant 9.99999993E-9 : f32
    %6 = vector.broadcast %cst_2 : f32 to vector<2x1xf32>
    %7 = arith.addf %5, %6 : vector<2x1xf32>
    %8 = math.rsqrt %7 : vector<2x1xf32>
    %9 = vector.broadcast %8 : vector<2x1xf32> to vector<2x32xf32>
    %10 = arith.mulf %0, %9 : vector<2x32xf32>
    %c0_3 = arith.constant 0 : index
    %c0_4 = arith.constant 0 : index
    %c0_5 = arith.constant 0 : index
    %11 = vector.load %arg1[%c0_3, %c0_4, %c0_5] : memref<2x32x32xf32, #tpu.memory_space<vmem>>, vector<1x32x32xf32>
    %12 = vector.shape_cast %11 : vector<1x32x32xf32> to vector<32x32xf32>
    %cst_6 = arith.constant dense<0.000000e+00> : vector<2x32xf32>
    %13 = tpu.matmul %10, %12, %cst_6 {dimension_numbers = #tpu.dot_dimension_numbers<[1], [0], [0], [1], [0, 0, 1, 1], [], []>} : vector<2x32xf32>, vector<32x32xf32>, vector<2x32xf32> -> vector<2x32xf32>
    %c0_7 = arith.constant 0 : index
    %c0_8 = arith.constant 0 : index
    %c0_9 = arith.constant 0 : index
    %14 = vector.load %arg2[%c0_7, %c0_8, %c0_9] : memref<2x1x32xf32, #tpu.memory_space<vmem>>, vector<1x1x32xf32>
    %15 = vector.shape_cast %14 : vector<1x1x32xf32> to vector<1x32xf32>
    %16 = vector.broadcast %15 : vector<1x32xf32> to vector<2x32xf32>
    %17 = arith.addf %13, %16 : vector<2x32xf32>
    %cst_10 = arith.constant 0.000000e+00 : f32
    %18 = vector.broadcast %cst_10 : f32 to vector<2x32xf32>
    %19 = arith.cmpf oge, %17, %18 : vector<2x32xf32>
    %cst_11 = arith.constant 1.41421354 : f32
    %20 = vector.broadcast %cst_11 : f32 to vector<2x32xf32>
    %21 = arith.mulf %17, %20 : vector<2x32xf32>
    %cst_12 = arith.constant 0.282842726 : f32
    %22 = vector.broadcast %cst_12 : f32 to vector<2x32xf32>
    %23 = arith.mulf %17, %22 : vector<2x32xf32>
    %24 = arith.select %19, %21, %23 : vector<2x32xi1>, vector<2x32xf32>
    %c1 = arith.constant 1 : index
    %c0_13 = arith.constant 0 : index
    %c0_14 = arith.constant 0 : index
    %25 = vector.load %arg1[%c1, %c0_13, %c0_14] : memref<2x32x32xf32, #tpu.memory_space<vmem>>, vector<1x32x32xf32>
    %26 = vector.shape_cast %25 : vector<1x32x32xf32> to vector<32x32xf32>
    %cst_15 = arith.constant dense<0.000000e+00> : vector<2x32xf32>
    %27 = tpu.matmul %24, %26, %cst_15 {dimension_numbers = #tpu.dot_dimension_numbers<[1], [0], [0], [1], [0, 0, 1, 1], [], []>} : vector<2x32xf32>, vector<32x32xf32>, vector<2x32xf32> -> vector<2x32xf32>
    %c1_16 = arith.constant 1 : index
    %c0_17 = arith.constant 0 : index
    %c0_18 = arith.constant 0 : index
    %28 = vector.load %arg2[%c1_16, %c0_17, %c0_18] : memref<2x1x32xf32, #tpu.memory_space<vmem>>, vector<1x1x32xf32>
    %29 = vector.shape_cast %28 : vector<1x1x32xf32> to vector<1x32xf32>
    %30 = vector.broadcast %29 : vector<1x32xf32> to vector<2x32xf32>
    %31 = arith.addf %27, %30 : vector<2x32xf32>
    %cst_19 = arith.constant 0.000000e+00 : f32
    %32 = vector.broadcast %cst_19 : f32 to vector<2x32xf32>
    %33 = arith.cmpf oge, %31, %32 : vector<2x32xf32>
    %cst_20 = arith.constant 1.41421354 : f32
    %34 = vector.broadcast %cst_20 : f32 to vector<2x32xf32>
    %35 = arith.mulf %31, %34 : vector<2x32xf32>
    %cst_21 = arith.constant 0.282842726 : f32
    %36 = vector.broadcast %cst_21 : f32 to vector<2x32xf32>
    %37 = arith.mulf %31, %36 : vector<2x32xf32>
    %38 = arith.select %33, %35, %37 : vector<2x32xi1>, vector<2x32xf32>
    %c0_22 = arith.constant 0 : index
    %c0_23 = arith.constant 0 : index
    %39 = vector.load %arg3[%c0_22, %c0_23] : memref<32x128xf32, #tpu.memory_space<vmem>>, vector<32x128xf32>
    %cst_24 = arith.constant dense<0.000000e+00> : vector<2x128xf32>
    %40 = tpu.matmul %38, %39, %cst_24 {dimension_numbers = #tpu.dot_dimension_numbers<[1], [0], [0], [1], [0, 0, 1, 1], [], []>} : vector<2x32xf32>, vector<32x128xf32>, vector<2x128xf32> -> vector<2x128xf32>
    %c0_25 = arith.constant 0 : index
    %c0_26 = arith.constant 0 : index
    %41 = vector.load %arg4[%c0_25, %c0_26] : memref<1x128xf32, #tpu.memory_space<vmem>>, vector<1x128xf32>
    %42 = vector.broadcast %41 : vector<1x128xf32> to vector<2x128xf32>
    %43 = arith.addf %40, %42 : vector<2x128xf32>
    %44 = vector.extract_strided_slice %43 {offsets = [0, 0], sizes = [2, 80], strides = [1, 1]} : vector<2x128xf32> to vector<2x80xf32>
    %45 = arith.mulf %44, %44 : vector<2x80xf32>
    %c0_27 = arith.constant 0 : index
    %c0_28 = arith.constant 0 : index
    %46 = vector.load %arg5[%c0_27, %c0_28] : memref<80x80xf32, #tpu.memory_space<vmem>>, vector<80x80xf32>
    %cst_29 = arith.constant dense<0.000000e+00> : vector<2x80xf32>
    %47 = tpu.matmul %45, %46, %cst_29 {dimension_numbers = #tpu.dot_dimension_numbers<[1], [0], [0], [1], [0, 0, 1, 1], [], []>} : vector<2x80xf32>, vector<80x80xf32>, vector<2x80xf32> -> vector<2x80xf32>
    %cst_30 = arith.constant 9.99999993E-9 : f32
    %48 = vector.broadcast %cst_30 : f32 to vector<2x80xf32>
    %49 = arith.addf %47, %48 : vector<2x80xf32>
    %50 = math.rsqrt %49 : vector<2x80xf32>
    %c0_31 = arith.constant 0 : index
    %c0_32 = arith.constant 0 : index
    %51 = vector.load %arg6[%c0_31, %c0_32] : memref<8x64xf32, #tpu.memory_space<vmem>>, vector<8x64xf32>
    %52 = vector.extract_strided_slice %43 {offsets = [0, 0], sizes = [2, 16], strides = [1, 1]} : vector<2x128xf32> to vector<2x16xf32>
    %53 = vector.extract_strided_slice %50 {offsets = [0, 0], sizes = [2, 16], strides = [1, 1]} : vector<2x80xf32> to vector<2x16xf32>
    %54 = tpu.concatenate %52, %52, %52, %52 in 1 : vector<2x16xf32>, vector<2x16xf32>, vector<2x16xf32>, vector<2x16xf32> -> vector<2x64xf32>
    %55 = vector.extract_strided_slice %54 {offsets = [0, 0], sizes = [1, 64], strides = [1, 1]} : vector<2x64xf32> to vector<1x64xf32>
    %56 = vector.shape_cast %55 : vector<1x64xf32> to vector<1x64xf32>
    %57 = vector.broadcast %56 : vector<1x64xf32> to vector<4x64xf32>
    %58 = vector.extract_strided_slice %54 {offsets = [1, 0], sizes = [1, 64], strides = [1, 1]} : vector<2x64xf32> to vector<1x64xf32>
    %59 = vector.shape_cast %58 : vector<1x64xf32> to vector<1x64xf32>
    %60 = vector.broadcast %59 : vector<1x64xf32> to vector<4x64xf32>
    %61 = tpu.concatenate %57, %60 in 0 : vector<4x64xf32>, vector<4x64xf32> -> vector<8x64xf32>
    %62 = arith.mulf %51, %61 : vector<8x64xf32>
    %63 = arith.truncf %62 : vector<8x64xf32> to vector<8x64xbf16>
    %c1_33 = arith.constant 1 : index
    %c0_34 = arith.constant 0 : index
    %c0_35 = arith.constant 0 : index
    %64 = vector.load %arg7[%c1_33, %c0_34, %c0_35] : memref<3x64x64xbf16, #tpu.memory_space<vmem>>, vector<1x64x64xbf16>
    %65 = vector.shape_cast %64 : vector<1x64x64xbf16> to vector<64x64xbf16>
    %cst_36 = arith.constant dense<0.000000e+00> : vector<8x64xf32>
    %66 = tpu.matmul %63, %65, %cst_36 {dimension_numbers = #tpu.dot_dimension_numbers<[1], [0], [0], [1], [0, 0, 1, 1], [], []>} : vector<8x64xbf16>, vector<64x64xbf16>, vector<8x64xf32> -> vector<8x64xf32>
    %c1_i32 = arith.constant 1 : i32
    %67 = tpu.dynamic_rotate %62 by %c1_i32 dim 0 : vector<8x64xf32>, i32 -> vector<8x64xf32>
    %68 = tpu.iota {dimensions = array<i32: 0>} : vector<8x64xi32>
    %c3_i32 = arith.constant 3 : i32
    %69 = vector.broadcast %c3_i32 : i32 to vector<8x64xi32>
    %70 = arith.andi %68, %69 : vector<8x64xi32>
    %c1_i32_37 = arith.constant 1 : i32
    %71 = vector.broadcast %c1_i32_37 : i32 to vector<8x64xi32>
    %72 = arith.cmpi sge, %70, %71 : vector<8x64xi32>
    %cst_38 = arith.constant 0.000000e+00 : f32
    %73 = vector.broadcast %cst_38 : f32 to vector<8x64xf32>
    %74 = arith.select %72, %67, %73 : vector<8x64xi1>, vector<8x64xf32>
    %75 = arith.truncf %74 : vector<8x64xf32> to vector<8x64xbf16>
    %c0_39 = arith.constant 0 : index
    %c0_40 = arith.constant 0 : index
    %c0_41 = arith.constant 0 : index
    %76 = vector.load %arg7[%c0_39, %c0_40, %c0_41] : memref<3x64x64xbf16, #tpu.memory_space<vmem>>, vector<1x64x64xbf16>
    %77 = vector.shape_cast %76 : vector<1x64x64xbf16> to vector<64x64xbf16>
    %cst_42 = arith.constant dense<0.000000e+00> : vector<8x64xf32>
    %78 = tpu.matmul %75, %77, %cst_42 {dimension_numbers = #tpu.dot_dimension_numbers<[1], [0], [0], [1], [0, 0, 1, 1], [], []>} : vector<8x64xbf16>, vector<64x64xbf16>, vector<8x64xf32> -> vector<8x64xf32>
    %79 = arith.addf %66, %78 : vector<8x64xf32>
    %c7_i32 = arith.constant 7 : i32
    %80 = tpu.dynamic_rotate %62 by %c7_i32 dim 0 : vector<8x64xf32>, i32 -> vector<8x64xf32>
    %81 = tpu.iota {dimensions = array<i32: 0>} : vector<8x64xi32>
    %c3_i32_43 = arith.constant 3 : i32
    %82 = vector.broadcast %c3_i32_43 : i32 to vector<8x64xi32>
    %83 = arith.andi %81, %82 : vector<8x64xi32>
    %c3_i32_44 = arith.constant 3 : i32
    %84 = vector.broadcast %c3_i32_44 : i32 to vector<8x64xi32>
    %85 = arith.cmpi slt, %83, %84 : vector<8x64xi32>
    %cst_45 = arith.constant 0.000000e+00 : f32
    %86 = vector.broadcast %cst_45 : f32 to vector<8x64xf32>
    %87 = arith.select %85, %80, %86 : vector<8x64xi1>, vector<8x64xf32>
    %88 = arith.truncf %87 : vector<8x64xf32> to vector<8x64xbf16>
    %c2 = arith.constant 2 : index
    %c0_46 = arith.constant 0 : index
    %c0_47 = arith.constant 0 : index
    %89 = vector.load %arg7[%c2, %c0_46, %c0_47] : memref<3x64x64xbf16, #tpu.memory_space<vmem>>, vector<1x64x64xbf16>
    %90 = vector.shape_cast %89 : vector<1x64x64xbf16> to vector<64x64xbf16>
    %cst_48 = arith.constant dense<0.000000e+00> : vector<8x64xf32>
    %91 = tpu.matmul %88, %90, %cst_48 {dimension_numbers = #tpu.dot_dimension_numbers<[1], [0], [0], [1], [0, 0, 1, 1], [], []>} : vector<8x64xbf16>, vector<64x64xbf16>, vector<8x64xf32> -> vector<8x64xf32>
    %92 = arith.addf %79, %91 : vector<8x64xf32>
    %93 = tpu.concatenate %53, %53, %53, %53 in 1 : vector<2x16xf32>, vector<2x16xf32>, vector<2x16xf32>, vector<2x16xf32> -> vector<2x64xf32>
    %94 = vector.extract_strided_slice %93 {offsets = [0, 0], sizes = [1, 64], strides = [1, 1]} : vector<2x64xf32> to vector<1x64xf32>
    %95 = vector.shape_cast %94 : vector<1x64xf32> to vector<1x64xf32>
    %96 = vector.broadcast %95 : vector<1x64xf32> to vector<4x64xf32>
    %97 = vector.extract_strided_slice %93 {offsets = [1, 0], sizes = [1, 64], strides = [1, 1]} : vector<2x64xf32> to vector<1x64xf32>
    %98 = vector.shape_cast %97 : vector<1x64xf32> to vector<1x64xf32>
    %99 = vector.broadcast %98 : vector<1x64xf32> to vector<4x64xf32>
    %100 = tpu.concatenate %96, %99 in 0 : vector<4x64xf32>, vector<4x64xf32> -> vector<8x64xf32>
    %101 = arith.mulf %92, %100 : vector<8x64xf32>
    %c0_49 = arith.constant 0 : index
    %c0_50 = arith.constant 0 : index
    %102 = vector.load %arg12[%c0_49, %c0_50] : memref<8x64xf32, #tpu.memory_space<vmem>>, vector<8x64xf32>
    %103 = arith.addf %101, %102 : vector<8x64xf32>
    %cst_51 = arith.constant 0.000000e+00 : f32
    %104 = vector.broadcast %cst_51 : f32 to vector<8x64xf32>
    %105 = arith.cmpf oge, %103, %104 : vector<8x64xf32>
    %cst_52 = arith.constant 1.41421354 : f32
    %106 = vector.broadcast %cst_52 : f32 to vector<8x64xf32>
    %107 = arith.mulf %103, %106 : vector<8x64xf32>
    %cst_53 = arith.constant 0.282842726 : f32
    %108 = vector.broadcast %cst_53 : f32 to vector<8x64xf32>
    %109 = arith.mulf %103, %108 : vector<8x64xf32>
    %110 = arith.select %105, %107, %109 : vector<8x64xi1>, vector<8x64xf32>
    %111 = vector.extract_strided_slice %43 {offsets = [0, 80], sizes = [2, 16], strides = [1, 1]} : vector<2x128xf32> to vector<2x16xf32>
    %112 = tpu.concatenate %111, %111, %111, %111 in 1 : vector<2x16xf32>, vector<2x16xf32>, vector<2x16xf32>, vector<2x16xf32> -> vector<2x64xf32>
    %113 = vector.extract_strided_slice %112 {offsets = [0, 0], sizes = [1, 64], strides = [1, 1]} : vector<2x64xf32> to vector<1x64xf32>
    %114 = vector.shape_cast %113 : vector<1x64xf32> to vector<1x64xf32>
    %115 = vector.broadcast %114 : vector<1x64xf32> to vector<4x64xf32>
    %116 = vector.extract_strided_slice %112 {offsets = [1, 0], sizes = [1, 64], strides = [1, 1]} : vector<2x64xf32> to vector<1x64xf32>
    %117 = vector.shape_cast %116 : vector<1x64xf32> to vector<1x64xf32>
    %118 = vector.broadcast %117 : vector<1x64xf32> to vector<4x64xf32>
    %119 = tpu.concatenate %115, %118 in 0 : vector<4x64xf32>, vector<4x64xf32> -> vector<8x64xf32>
    %120 = arith.mulf %110, %119 : vector<8x64xf32>
    %121 = arith.truncf %120 : vector<8x64xf32> to vector<8x64xbf16>
    %c0_54 = arith.constant 0 : index
    %c0_55 = arith.constant 0 : index
    %122 = vector.load %arg17[%c0_54, %c0_55] : memref<64x12xbf16, #tpu.memory_space<vmem>>, vector<64x12xbf16>
    %cst_56 = arith.constant dense<0.000000e+00> : vector<8x12xf32>
    %123 = tpu.matmul %121, %122, %cst_56 {dimension_numbers = #tpu.dot_dimension_numbers<[1], [0], [0], [1], [0, 0, 1, 1], [], []>} : vector<8x64xbf16>, vector<64x12xbf16>, vector<8x12xf32> -> vector<8x12xf32>
    %c0_57 = arith.constant 0 : index
    %c0_58 = arith.constant 0 : index
    %124 = vector.load %arg20[%c0_57, %c0_58] : memref<1x12xf32, #tpu.memory_space<vmem>>, vector<1x12xf32>
    %125 = vector.broadcast %124 : vector<1x12xf32> to vector<8x12xf32>
    %126 = arith.addf %123, %125 : vector<8x12xf32>
    %c0_59 = arith.constant 0 : index
    %c0_60 = arith.constant 0 : index
    %127 = vector.load %arg23[%c0_59, %c0_60] : memref<64x128xf32, #tpu.memory_space<vmem>>, vector<64x128xf32>
    %cst_61 = arith.constant dense<0.000000e+00> : vector<8x128xf32>
    %128 = tpu.matmul %110, %127, %cst_61 {dimension_numbers = #tpu.dot_dimension_numbers<[1], [0], [0], [1], [0, 0, 1, 1], [], []>} : vector<8x64xf32>, vector<64x128xf32>, vector<8x128xf32> -> vector<8x128xf32>
    %c0_62 = arith.constant 0 : index
    %c0_63 = arith.constant 0 : index
    %129 = vector.load %arg27[%c0_62, %c0_63] : memref<16x8xf32, #tpu.memory_space<vmem>>, vector<16x8xf32>
    %cst_64 = arith.constant dense<0.000000e+00> : vector<16x128xf32>
    %130 = tpu.matmul %129, %128, %cst_64 {dimension_numbers = #tpu.dot_dimension_numbers<[1], [0], [0], [1], [0, 0, 1, 1], [], []>} : vector<16x8xf32>, vector<8x128xf32>, vector<16x128xf32> -> vector<16x128xf32>
    %c0_65 = arith.constant 0 : index
    %c0_66 = arith.constant 0 : index
    %131 = vector.load %arg25[%c0_65, %c0_66] : memref<12x24xf32, #tpu.memory_space<vmem>>, vector<12x24xf32>
    %cst_67 = arith.constant dense<0.000000e+00> : vector<8x24xf32>
    %132 = tpu.matmul %126, %131, %cst_67 {dimension_numbers = #tpu.dot_dimension_numbers<[1], [0], [0], [1], [0, 0, 1, 1], [], []>} : vector<8x12xf32>, vector<12x24xf32>, vector<8x24xf32> -> vector<8x24xf32>
    %c0_68 = arith.constant 0 : index
    %c0_69 = arith.constant 0 : index
    %133 = vector.load %arg27[%c0_68, %c0_69] : memref<16x8xf32, #tpu.memory_space<vmem>>, vector<16x8xf32>
    %cst_70 = arith.constant dense<0.000000e+00> : vector<16x24xf32>
    %134 = tpu.matmul %133, %132, %cst_70 {dimension_numbers = #tpu.dot_dimension_numbers<[1], [0], [0], [1], [0, 0, 1, 1], [], []>} : vector<16x8xf32>, vector<8x24xf32>, vector<16x24xf32> -> vector<16x24xf32>
    %135 = vector.extract_strided_slice %43 {offsets = [0, 16], sizes = [2, 16], strides = [1, 1]} : vector<2x128xf32> to vector<2x16xf32>
    %136 = vector.extract_strided_slice %50 {offsets = [0, 16], sizes = [2, 16], strides = [1, 1]} : vector<2x80xf32> to vector<2x16xf32>
    %137 = tpu.concatenate %135, %135, %135, %135, %135, %135, %135, %135 in 1 : vector<2x16xf32>, vector<2x16xf32>, vector<2x16xf32>, vector<2x16xf32>, vector<2x16xf32>, vector<2x16xf32>, vector<2x16xf32>, vector<2x16xf32> -> vector<2x128xf32>
    %138 = vector.extract_strided_slice %137 {offsets = [0, 0], sizes = [1, 128], strides = [1, 1]} : vector<2x128xf32> to vector<1x128xf32>
    %139 = vector.shape_cast %138 : vector<1x128xf32> to vector<1x128xf32>
    %140 = vector.broadcast %139 : vector<1x128xf32> to vector<8x128xf32>
    %141 = vector.extract_strided_slice %137 {offsets = [1, 0], sizes = [1, 128], strides = [1, 1]} : vector<2x128xf32> to vector<1x128xf32>
    %142 = vector.shape_cast %141 : vector<1x128xf32> to vector<1x128xf32>
    %143 = vector.broadcast %142 : vector<1x128xf32> to vector<8x128xf32>
    %144 = tpu.concatenate %140, %143 in 0 : vector<8x128xf32>, vector<8x128xf32> -> vector<16x128xf32>
    %145 = arith.mulf %130, %144 : vector<16x128xf32>
    %146 = arith.truncf %145 : vector<16x128xf32> to vector<16x128xbf16>
    %c1_71 = arith.constant 1 : index
    %c0_72 = arith.constant 0 : index
    %c0_73 = arith.constant 0 : index
    %147 = vector.load %arg8[%c1_71, %c0_72, %c0_73] : memref<3x128x128xbf16, #tpu.memory_space<vmem>>, vector<1x128x128xbf16>
    %148 = vector.shape_cast %147 : vector<1x128x128xbf16> to vector<128x128xbf16>
    %cst_74 = arith.constant dense<0.000000e+00> : vector<16x128xf32>
    %149 = tpu.matmul %146, %148, %cst_74 {dimension_numbers = #tpu.dot_dimension_numbers<[1], [0], [0], [1], [0, 0, 1, 1], [], []>} : vector<16x128xbf16>, vector<128x128xbf16>, vector<16x128xf32> -> vector<16x128xf32>
    %c1_i32_75 = arith.constant 1 : i32
    %150 = tpu.dynamic_rotate %145 by %c1_i32_75 dim 0 : vector<16x128xf32>, i32 -> vector<16x128xf32>
    %151 = tpu.iota {dimensions = array<i32: 0>} : vector<16x128xi32>
    %c7_i32_76 = arith.constant 7 : i32
    %152 = vector.broadcast %c7_i32_76 : i32 to vector<16x128xi32>
    %153 = arith.andi %151, %152 : vector<16x128xi32>
    %c1_i32_77 = arith.constant 1 : i32
    %154 = vector.broadcast %c1_i32_77 : i32 to vector<16x128xi32>
    %155 = arith.cmpi sge, %153, %154 : vector<16x128xi32>
    %cst_78 = arith.constant 0.000000e+00 : f32
    %156 = vector.broadcast %cst_78 : f32 to vector<16x128xf32>
    %157 = arith.select %155, %150, %156 : vector<16x128xi1>, vector<16x128xf32>
    %158 = arith.truncf %157 : vector<16x128xf32> to vector<16x128xbf16>
    %c0_79 = arith.constant 0 : index
    %c0_80 = arith.constant 0 : index
    %c0_81 = arith.constant 0 : index
    %159 = vector.load %arg8[%c0_79, %c0_80, %c0_81] : memref<3x128x128xbf16, #tpu.memory_space<vmem>>, vector<1x128x128xbf16>
    %160 = vector.shape_cast %159 : vector<1x128x128xbf16> to vector<128x128xbf16>
    %cst_82 = arith.constant dense<0.000000e+00> : vector<16x128xf32>
    %161 = tpu.matmul %158, %160, %cst_82 {dimension_numbers = #tpu.dot_dimension_numbers<[1], [0], [0], [1], [0, 0, 1, 1], [], []>} : vector<16x128xbf16>, vector<128x128xbf16>, vector<16x128xf32> -> vector<16x128xf32>
    %162 = arith.addf %149, %161 : vector<16x128xf32>
    %c15_i32 = arith.constant 15 : i32
    %163 = tpu.dynamic_rotate %145 by %c15_i32 dim 0 : vector<16x128xf32>, i32 -> vector<16x128xf32>
    %164 = tpu.iota {dimensions = array<i32: 0>} : vector<16x128xi32>
    %c7_i32_83 = arith.constant 7 : i32
    %165 = vector.broadcast %c7_i32_83 : i32 to vector<16x128xi32>
    %166 = arith.andi %164, %165 : vector<16x128xi32>
    %c7_i32_84 = arith.constant 7 : i32
    %167 = vector.broadcast %c7_i32_84 : i32 to vector<16x128xi32>
    %168 = arith.cmpi slt, %166, %167 : vector<16x128xi32>
    %cst_85 = arith.constant 0.000000e+00 : f32
    %169 = vector.broadcast %cst_85 : f32 to vector<16x128xf32>
    %170 = arith.select %168, %163, %169 : vector<16x128xi1>, vector<16x128xf32>
    %171 = arith.truncf %170 : vector<16x128xf32> to vector<16x128xbf16>
    %c2_86 = arith.constant 2 : index
    %c0_87 = arith.constant 0 : index
    %c0_88 = arith.constant 0 : index
    %172 = vector.load %arg8[%c2_86, %c0_87, %c0_88] : memref<3x128x128xbf16, #tpu.memory_space<vmem>>, vector<1x128x128xbf16>
    %173 = vector.shape_cast %172 : vector<1x128x128xbf16> to vector<128x128xbf16>
    %cst_89 = arith.constant dense<0.000000e+00> : vector<16x128xf32>
    %174 = tpu.matmul %171, %173, %cst_89 {dimension_numbers = #tpu.dot_dimension_numbers<[1], [0], [0], [1], [0, 0, 1, 1], [], []>} : vector<16x128xbf16>, vector<128x128xbf16>, vector<16x128xf32> -> vector<16x128xf32>
    %175 = arith.addf %162, %174 : vector<16x128xf32>
    %176 = tpu.concatenate %136, %136, %136, %136, %136, %136, %136, %136 in 1 : vector<2x16xf32>, vector<2x16xf32>, vector<2x16xf32>, vector<2x16xf32>, vector<2x16xf32>, vector<2x16xf32>, vector<2x16xf32>, vector<2x16xf32> -> vector<2x128xf32>
    %177 = vector.extract_strided_slice %176 {offsets = [0, 0], sizes = [1, 128], strides = [1, 1]} : vector<2x128xf32> to vector<1x128xf32>
    %178 = vector.shape_cast %177 : vector<1x128xf32> to vector<1x128xf32>
    %179 = vector.broadcast %178 : vector<1x128xf32> to vector<8x128xf32>
    %180 = vector.extract_strided_slice %176 {offsets = [1, 0], sizes = [1, 128], strides = [1, 1]} : vector<2x128xf32> to vector<1x128xf32>
    %181 = vector.shape_cast %180 : vector<1x128xf32> to vector<1x128xf32>
    %182 = vector.broadcast %181 : vector<1x128xf32> to vector<8x128xf32>
    %183 = tpu.concatenate %179, %182 in 0 : vector<8x128xf32>, vector<8x128xf32> -> vector<16x128xf32>
    %184 = arith.mulf %175, %183 : vector<16x128xf32>
    %c0_90 = arith.constant 0 : index
    %c0_91 = arith.constant 0 : index
    %185 = vector.load %arg13[%c0_90, %c0_91] : memref<16x128xf32, #tpu.memory_space<vmem>>, vector<16x128xf32>
    %186 = arith.addf %184, %185 : vector<16x128xf32>
    %cst_92 = arith.constant 0.000000e+00 : f32
    %187 = vector.broadcast %cst_92 : f32 to vector<16x128xf32>
    %188 = arith.cmpf oge, %186, %187 : vector<16x128xf32>
    %cst_93 = arith.constant 1.41421354 : f32
    %189 = vector.broadcast %cst_93 : f32 to vector<16x128xf32>
    %190 = arith.mulf %186, %189 : vector<16x128xf32>
    %cst_94 = arith.constant 0.282842726 : f32
    %191 = vector.broadcast %cst_94 : f32 to vector<16x128xf32>
    %192 = arith.mulf %186, %191 : vector<16x128xf32>
    %193 = arith.select %188, %190, %192 : vector<16x128xi1>, vector<16x128xf32>
    %194 = vector.extract_strided_slice %43 {offsets = [0, 32], sizes = [2, 16], strides = [1, 1]} : vector<2x128xf32> to vector<2x16xf32>
    %195 = vector.extract_strided_slice %50 {offsets = [0, 32], sizes = [2, 16], strides = [1, 1]} : vector<2x80xf32> to vector<2x16xf32>
    %196 = tpu.concatenate %194, %194, %194, %194, %194, %194, %194, %194 in 1 : vector<2x16xf32>, vector<2x16xf32>, vector<2x16xf32>, vector<2x16xf32>, vector<2x16xf32>, vector<2x16xf32>, vector<2x16xf32>, vector<2x16xf32> -> vector<2x128xf32>
    %197 = vector.extract_strided_slice %196 {offsets = [0, 0], sizes = [1, 128], strides = [1, 1]} : vector<2x128xf32> to vector<1x128xf32>
    %198 = vector.shape_cast %197 : vector<1x128xf32> to vector<1x128xf32>
    %199 = vector.broadcast %198 : vector<1x128xf32> to vector<8x128xf32>
    %200 = vector.extract_strided_slice %196 {offsets = [1, 0], sizes = [1, 128], strides = [1, 1]} : vector<2x128xf32> to vector<1x128xf32>
    %201 = vector.shape_cast %200 : vector<1x128xf32> to vector<1x128xf32>
    %202 = vector.broadcast %201 : vector<1x128xf32> to vector<8x128xf32>
    %203 = tpu.concatenate %199, %202 in 0 : vector<8x128xf32>, vector<8x128xf32> -> vector<16x128xf32>
    %204 = arith.mulf %193, %203 : vector<16x128xf32>
    %205 = arith.truncf %204 : vector<16x128xf32> to vector<16x128xbf16>
    %c1_95 = arith.constant 1 : index
    %c0_96 = arith.constant 0 : index
    %c0_97 = arith.constant 0 : index
    %206 = vector.load %arg9[%c1_95, %c0_96, %c0_97] : memref<3x128x128xbf16, #tpu.memory_space<vmem>>, vector<1x128x128xbf16>
    %207 = vector.shape_cast %206 : vector<1x128x128xbf16> to vector<128x128xbf16>
    %cst_98 = arith.constant dense<0.000000e+00> : vector<16x128xf32>
    %208 = tpu.matmul %205, %207, %cst_98 {dimension_numbers = #tpu.dot_dimension_numbers<[1], [0], [0], [1], [0, 0, 1, 1], [], []>} : vector<16x128xbf16>, vector<128x128xbf16>, vector<16x128xf32> -> vector<16x128xf32>
    %c1_i32_99 = arith.constant 1 : i32
    %209 = tpu.dynamic_rotate %204 by %c1_i32_99 dim 0 : vector<16x128xf32>, i32 -> vector<16x128xf32>
    %210 = tpu.iota {dimensions = array<i32: 0>} : vector<16x128xi32>
    %c7_i32_100 = arith.constant 7 : i32
    %211 = vector.broadcast %c7_i32_100 : i32 to vector<16x128xi32>
    %212 = arith.andi %210, %211 : vector<16x128xi32>
    %c1_i32_101 = arith.constant 1 : i32
    %213 = vector.broadcast %c1_i32_101 : i32 to vector<16x128xi32>
    %214 = arith.cmpi sge, %212, %213 : vector<16x128xi32>
    %cst_102 = arith.constant 0.000000e+00 : f32
    %215 = vector.broadcast %cst_102 : f32 to vector<16x128xf32>
    %216 = arith.select %214, %209, %215 : vector<16x128xi1>, vector<16x128xf32>
    %217 = arith.truncf %216 : vector<16x128xf32> to vector<16x128xbf16>
    %c0_103 = arith.constant 0 : index
    %c0_104 = arith.constant 0 : index
    %c0_105 = arith.constant 0 : index
    %218 = vector.load %arg9[%c0_103, %c0_104, %c0_105] : memref<3x128x128xbf16, #tpu.memory_space<vmem>>, vector<1x128x128xbf16>
    %219 = vector.shape_cast %218 : vector<1x128x128xbf16> to vector<128x128xbf16>
    %cst_106 = arith.constant dense<0.000000e+00> : vector<16x128xf32>
    %220 = tpu.matmul %217, %219, %cst_106 {dimension_numbers = #tpu.dot_dimension_numbers<[1], [0], [0], [1], [0, 0, 1, 1], [], []>} : vector<16x128xbf16>, vector<128x128xbf16>, vector<16x128xf32> -> vector<16x128xf32>
    %221 = arith.addf %208, %220 : vector<16x128xf32>
    %c15_i32_107 = arith.constant 15 : i32
    %222 = tpu.dynamic_rotate %204 by %c15_i32_107 dim 0 : vector<16x128xf32>, i32 -> vector<16x128xf32>
    %223 = tpu.iota {dimensions = array<i32: 0>} : vector<16x128xi32>
    %c7_i32_108 = arith.constant 7 : i32
    %224 = vector.broadcast %c7_i32_108 : i32 to vector<16x128xi32>
    %225 = arith.andi %223, %224 : vector<16x128xi32>
    %c7_i32_109 = arith.constant 7 : i32
    %226 = vector.broadcast %c7_i32_109 : i32 to vector<16x128xi32>
    %227 = arith.cmpi slt, %225, %226 : vector<16x128xi32>
    %cst_110 = arith.constant 0.000000e+00 : f32
    %228 = vector.broadcast %cst_110 : f32 to vector<16x128xf32>
    %229 = arith.select %227, %222, %228 : vector<16x128xi1>, vector<16x128xf32>
    %230 = arith.truncf %229 : vector<16x128xf32> to vector<16x128xbf16>
    %c2_111 = arith.constant 2 : index
    %c0_112 = arith.constant 0 : index
    %c0_113 = arith.constant 0 : index
    %231 = vector.load %arg9[%c2_111, %c0_112, %c0_113] : memref<3x128x128xbf16, #tpu.memory_space<vmem>>, vector<1x128x128xbf16>
    %232 = vector.shape_cast %231 : vector<1x128x128xbf16> to vector<128x128xbf16>
    %cst_114 = arith.constant dense<0.000000e+00> : vector<16x128xf32>
    %233 = tpu.matmul %230, %232, %cst_114 {dimension_numbers = #tpu.dot_dimension_numbers<[1], [0], [0], [1], [0, 0, 1, 1], [], []>} : vector<16x128xbf16>, vector<128x128xbf16>, vector<16x128xf32> -> vector<16x128xf32>
    %234 = arith.addf %221, %233 : vector<16x128xf32>
    %235 = tpu.concatenate %195, %195, %195, %195, %195, %195, %195, %195 in 1 : vector<2x16xf32>, vector<2x16xf32>, vector<2x16xf32>, vector<2x16xf32>, vector<2x16xf32>, vector<2x16xf32>, vector<2x16xf32>, vector<2x16xf32> -> vector<2x128xf32>
    %236 = vector.extract_strided_slice %235 {offsets = [0, 0], sizes = [1, 128], strides = [1, 1]} : vector<2x128xf32> to vector<1x128xf32>
    %237 = vector.shape_cast %236 : vector<1x128xf32> to vector<1x128xf32>
    %238 = vector.broadcast %237 : vector<1x128xf32> to vector<8x128xf32>
    %239 = vector.extract_strided_slice %235 {offsets = [1, 0], sizes = [1, 128], strides = [1, 1]} : vector<2x128xf32> to vector<1x128xf32>
    %240 = vector.shape_cast %239 : vector<1x128xf32> to vector<1x128xf32>
    %241 = vector.broadcast %240 : vector<1x128xf32> to vector<8x128xf32>
    %242 = tpu.concatenate %238, %241 in 0 : vector<8x128xf32>, vector<8x128xf32> -> vector<16x128xf32>
    %243 = arith.mulf %234, %242 : vector<16x128xf32>
    %c0_115 = arith.constant 0 : index
    %c0_116 = arith.constant 0 : index
    %244 = vector.load %arg14[%c0_115, %c0_116] : memref<16x128xf32, #tpu.memory_space<vmem>>, vector<16x128xf32>
    %245 = arith.addf %243, %244 : vector<16x128xf32>
    %cst_117 = arith.constant 0.000000e+00 : f32
    %246 = vector.broadcast %cst_117 : f32 to vector<16x128xf32>
    %247 = arith.cmpf oge, %245, %246 : vector<16x128xf32>
    %cst_118 = arith.constant 1.41421354 : f32
    %248 = vector.broadcast %cst_118 : f32 to vector<16x128xf32>
    %249 = arith.mulf %245, %248 : vector<16x128xf32>
    %cst_119 = arith.constant 0.282842726 : f32
    %250 = vector.broadcast %cst_119 : f32 to vector<16x128xf32>
    %251 = arith.mulf %245, %250 : vector<16x128xf32>
    %252 = arith.select %247, %249, %251 : vector<16x128xi1>, vector<16x128xf32>
    %253 = vector.extract_strided_slice %43 {offsets = [0, 96], sizes = [2, 16], strides = [1, 1]} : vector<2x128xf32> to vector<2x16xf32>
    %254 = tpu.concatenate %253, %253, %253, %253, %253, %253, %253, %253 in 1 : vector<2x16xf32>, vector<2x16xf32>, vector<2x16xf32>, vector<2x16xf32>, vector<2x16xf32>, vector<2x16xf32>, vector<2x16xf32>, vector<2x16xf32> -> vector<2x128xf32>
    %255 = vector.extract_strided_slice %254 {offsets = [0, 0], sizes = [1, 128], strides = [1, 1]} : vector<2x128xf32> to vector<1x128xf32>
    %256 = vector.shape_cast %255 : vector<1x128xf32> to vector<1x128xf32>
    %257 = vector.broadcast %256 : vector<1x128xf32> to vector<8x128xf32>
    %258 = vector.extract_strided_slice %254 {offsets = [1, 0], sizes = [1, 128], strides = [1, 1]} : vector<2x128xf32> to vector<1x128xf32>
    %259 = vector.shape_cast %258 : vector<1x128xf32> to vector<1x128xf32>
    %260 = vector.broadcast %259 : vector<1x128xf32> to vector<8x128xf32>
    %261 = tpu.concatenate %257, %260 in 0 : vector<8x128xf32>, vector<8x128xf32> -> vector<16x128xf32>
    %262 = arith.mulf %252, %261 : vector<16x128xf32>
    %263 = arith.truncf %262 : vector<16x128xf32> to vector<16x128xbf16>
    %c0_120 = arith.constant 0 : index
    %c0_121 = arith.constant 0 : index
    %264 = vector.load %arg18[%c0_120, %c0_121] : memref<128x24xbf16, #tpu.memory_space<vmem>>, vector<128x24xbf16>
    %cst_122 = arith.constant dense<0.000000e+00> : vector<16x24xf32>
    %265 = tpu.matmul %263, %264, %cst_122 {dimension_numbers = #tpu.dot_dimension_numbers<[1], [0], [0], [1], [0, 0, 1, 1], [], []>} : vector<16x128xbf16>, vector<128x24xbf16>, vector<16x24xf32> -> vector<16x24xf32>
    %c0_123 = arith.constant 0 : index
    %c0_124 = arith.constant 0 : index
    %266 = vector.load %arg21[%c0_123, %c0_124] : memref<1x24xf32, #tpu.memory_space<vmem>>, vector<1x24xf32>
    %267 = vector.broadcast %266 : vector<1x24xf32> to vector<16x24xf32>
    %268 = arith.addf %265, %267 : vector<16x24xf32>
    %269 = arith.addf %134, %268 : vector<16x24xf32>
    %c0_125 = arith.constant 0 : index
    %c0_126 = arith.constant 0 : index
    %270 = vector.load %arg24[%c0_125, %c0_126] : memref<128x256xf32, #tpu.memory_space<vmem>>, vector<128x256xf32>
    %cst_127 = arith.constant dense<0.000000e+00> : vector<16x256xf32>
    %271 = tpu.matmul %252, %270, %cst_127 {dimension_numbers = #tpu.dot_dimension_numbers<[1], [0], [0], [1], [0, 0, 1, 1], [], []>} : vector<16x128xf32>, vector<128x256xf32>, vector<16x256xf32> -> vector<16x256xf32>
    %c0_128 = arith.constant 0 : index
    %c0_129 = arith.constant 0 : index
    %272 = vector.load %arg28[%c0_128, %c0_129] : memref<32x16xf32, #tpu.memory_space<vmem>>, vector<32x16xf32>
    %cst_130 = arith.constant dense<0.000000e+00> : vector<32x256xf32>
    %273 = tpu.matmul %272, %271, %cst_130 {dimension_numbers = #tpu.dot_dimension_numbers<[1], [0], [0], [1], [0, 0, 1, 1], [], []>} : vector<32x16xf32>, vector<16x256xf32>, vector<32x256xf32> -> vector<32x256xf32>
    %c0_131 = arith.constant 0 : index
    %c0_132 = arith.constant 0 : index
    %274 = vector.load %arg26[%c0_131, %c0_132] : memref<24x48xf32, #tpu.memory_space<vmem>>, vector<24x48xf32>
    %cst_133 = arith.constant dense<0.000000e+00> : vector<16x48xf32>
    %275 = tpu.matmul %269, %274, %cst_133 {dimension_numbers = #tpu.dot_dimension_numbers<[1], [0], [0], [1], [0, 0, 1, 1], [], []>} : vector<16x24xf32>, vector<24x48xf32>, vector<16x48xf32> -> vector<16x48xf32>
    %c0_134 = arith.constant 0 : index
    %c0_135 = arith.constant 0 : index
    %276 = vector.load %arg28[%c0_134, %c0_135] : memref<32x16xf32, #tpu.memory_space<vmem>>, vector<32x16xf32>
    %cst_136 = arith.constant dense<0.000000e+00> : vector<32x48xf32>
    %277 = tpu.matmul %276, %275, %cst_136 {dimension_numbers = #tpu.dot_dimension_numbers<[1], [0], [0], [1], [0, 0, 1, 1], [], []>} : vector<32x16xf32>, vector<16x48xf32>, vector<32x48xf32> -> vector<32x48xf32>
    %278 = vector.extract_strided_slice %43 {offsets = [0, 48], sizes = [2, 16], strides = [1, 1]} : vector<2x128xf32> to vector<2x16xf32>
    %279 = vector.extract_strided_slice %50 {offsets = [0, 48], sizes = [2, 16], strides = [1, 1]} : vector<2x80xf32> to vector<2x16xf32>
    %280 = tpu.concatenate %278, %278, %278, %278, %278, %278, %278, %278, %278, %278, %278, %278, %278, %278, %278, %278 in 1 : vector<2x16xf32>, vector<2x16xf32>, vector<2x16xf32>, vector<2x16xf32>, vector<2x16xf32>, vector<2x16xf32>, vector<2x16xf32>, vector<2x16xf32>, vector<2x16xf32>, vector<2x16xf32>, vector<2x16xf32>, vector<2x16xf32>, vector<2x16xf32>, vector<2x16xf32>, vector<2x16xf32>, vector<2x16xf32> -> vector<2x256xf32>
    %281 = vector.extract_strided_slice %280 {offsets = [0, 0], sizes = [1, 256], strides = [1, 1]} : vector<2x256xf32> to vector<1x256xf32>
    %282 = vector.shape_cast %281 : vector<1x256xf32> to vector<1x256xf32>
    %283 = vector.broadcast %282 : vector<1x256xf32> to vector<16x256xf32>
    %284 = vector.extract_strided_slice %280 {offsets = [1, 0], sizes = [1, 256], strides = [1, 1]} : vector<2x256xf32> to vector<1x256xf32>
    %285 = vector.shape_cast %284 : vector<1x256xf32> to vector<1x256xf32>
    %286 = vector.broadcast %285 : vector<1x256xf32> to vector<16x256xf32>
    %287 = tpu.concatenate %283, %286 in 0 : vector<16x256xf32>, vector<16x256xf32> -> vector<32x256xf32>
    %288 = arith.mulf %273, %287 : vector<32x256xf32>
    %289 = arith.truncf %288 : vector<32x256xf32> to vector<32x256xbf16>
    %c1_137 = arith.constant 1 : index
    %c0_138 = arith.constant 0 : index
    %c0_139 = arith.constant 0 : index
    %290 = vector.load %arg10[%c1_137, %c0_138, %c0_139] : memref<3x256x256xbf16, #tpu.memory_space<vmem>>, vector<1x256x256xbf16>
    %291 = vector.shape_cast %290 : vector<1x256x256xbf16> to vector<256x256xbf16>
    %cst_140 = arith.constant dense<0.000000e+00> : vector<32x256xf32>
    %292 = tpu.matmul %289, %291, %cst_140 {dimension_numbers = #tpu.dot_dimension_numbers<[1], [0], [0], [1], [0, 0, 1, 1], [], []>} : vector<32x256xbf16>, vector<256x256xbf16>, vector<32x256xf32> -> vector<32x256xf32>
    %c1_i32_141 = arith.constant 1 : i32
    %293 = tpu.dynamic_rotate %288 by %c1_i32_141 dim 0 : vector<32x256xf32>, i32 -> vector<32x256xf32>
    %294 = tpu.iota {dimensions = array<i32: 0>} : vector<32x256xi32>
    %c15_i32_142 = arith.constant 15 : i32
    %295 = vector.broadcast %c15_i32_142 : i32 to vector<32x256xi32>
    %296 = arith.andi %294, %295 : vector<32x256xi32>
    %c1_i32_143 = arith.constant 1 : i32
    %297 = vector.broadcast %c1_i32_143 : i32 to vector<32x256xi32>
    %298 = arith.cmpi sge, %296, %297 : vector<32x256xi32>
    %cst_144 = arith.constant 0.000000e+00 : f32
    %299 = vector.broadcast %cst_144 : f32 to vector<32x256xf32>
    %300 = arith.select %298, %293, %299 : vector<32x256xi1>, vector<32x256xf32>
    %301 = arith.truncf %300 : vector<32x256xf32> to vector<32x256xbf16>
    %c0_145 = arith.constant 0 : index
    %c0_146 = arith.constant 0 : index
    %c0_147 = arith.constant 0 : index
    %302 = vector.load %arg10[%c0_145, %c0_146, %c0_147] : memref<3x256x256xbf16, #tpu.memory_space<vmem>>, vector<1x256x256xbf16>
    %303 = vector.shape_cast %302 : vector<1x256x256xbf16> to vector<256x256xbf16>
    %cst_148 = arith.constant dense<0.000000e+00> : vector<32x256xf32>
    %304 = tpu.matmul %301, %303, %cst_148 {dimension_numbers = #tpu.dot_dimension_numbers<[1], [0], [0], [1], [0, 0, 1, 1], [], []>} : vector<32x256xbf16>, vector<256x256xbf16>, vector<32x256xf32> -> vector<32x256xf32>
    %305 = arith.addf %292, %304 : vector<32x256xf32>
    %c31_i32 = arith.constant 31 : i32
    %306 = tpu.dynamic_rotate %288 by %c31_i32 dim 0 : vector<32x256xf32>, i32 -> vector<32x256xf32>
    %307 = tpu.iota {dimensions = array<i32: 0>} : vector<32x256xi32>
    %c15_i32_149 = arith.constant 15 : i32
    %308 = vector.broadcast %c15_i32_149 : i32 to vector<32x256xi32>
    %309 = arith.andi %307, %308 : vector<32x256xi32>
    %c15_i32_150 = arith.constant 15 : i32
    %310 = vector.broadcast %c15_i32_150 : i32 to vector<32x256xi32>
    %311 = arith.cmpi slt, %309, %310 : vector<32x256xi32>
    %cst_151 = arith.constant 0.000000e+00 : f32
    %312 = vector.broadcast %cst_151 : f32 to vector<32x256xf32>
    %313 = arith.select %311, %306, %312 : vector<32x256xi1>, vector<32x256xf32>
    %314 = arith.truncf %313 : vector<32x256xf32> to vector<32x256xbf16>
    %c2_152 = arith.constant 2 : index
    %c0_153 = arith.constant 0 : index
    %c0_154 = arith.constant 0 : index
    %315 = vector.load %arg10[%c2_152, %c0_153, %c0_154] : memref<3x256x256xbf16, #tpu.memory_space<vmem>>, vector<1x256x256xbf16>
    %316 = vector.shape_cast %315 : vector<1x256x256xbf16> to vector<256x256xbf16>
    %cst_155 = arith.constant dense<0.000000e+00> : vector<32x256xf32>
    %317 = tpu.matmul %314, %316, %cst_155 {dimension_numbers = #tpu.dot_dimension_numbers<[1], [0], [0], [1], [0, 0, 1, 1], [], []>} : vector<32x256xbf16>, vector<256x256xbf16>, vector<32x256xf32> -> vector<32x256xf32>
    %318 = arith.addf %305, %317 : vector<32x256xf32>
    %319 = tpu.concatenate %279, %279, %279, %279, %279, %279, %279, %279, %279, %279, %279, %279, %279, %279, %279, %279 in 1 : vector<2x16xf32>, vector<2x16xf32>, vector<2x16xf32>, vector<2x16xf32>, vector<2x16xf32>, vector<2x16xf32>, vector<2x16xf32>, vector<2x16xf32>, vector<2x16xf32>, vector<2x16xf32>, vector<2x16xf32>, vector<2x16xf32>, vector<2x16xf32>, vector<2x16xf32>, vector<2x16xf32>, vector<2x16xf32> -> vector<2x256xf32>
    %320 = vector.extract_strided_slice %319 {offsets = [0, 0], sizes = [1, 256], strides = [1, 1]} : vector<2x256xf32> to vector<1x256xf32>
    %321 = vector.shape_cast %320 : vector<1x256xf32> to vector<1x256xf32>
    %322 = vector.broadcast %321 : vector<1x256xf32> to vector<16x256xf32>
    %323 = vector.extract_strided_slice %319 {offsets = [1, 0], sizes = [1, 256], strides = [1, 1]} : vector<2x256xf32> to vector<1x256xf32>
    %324 = vector.shape_cast %323 : vector<1x256xf32> to vector<1x256xf32>
    %325 = vector.broadcast %324 : vector<1x256xf32> to vector<16x256xf32>
    %326 = tpu.concatenate %322, %325 in 0 : vector<16x256xf32>, vector<16x256xf32> -> vector<32x256xf32>
    %327 = arith.mulf %318, %326 : vector<32x256xf32>
    %c0_156 = arith.constant 0 : index
    %c0_157 = arith.constant 0 : index
    %328 = vector.load %arg15[%c0_156, %c0_157] : memref<32x256xf32, #tpu.memory_space<vmem>>, vector<32x256xf32>
    %329 = arith.addf %327, %328 : vector<32x256xf32>
    %cst_158 = arith.constant 0.000000e+00 : f32
    %330 = vector.broadcast %cst_158 : f32 to vector<32x256xf32>
    %331 = arith.cmpf oge, %329, %330 : vector<32x256xf32>
    %cst_159 = arith.constant 1.41421354 : f32
    %332 = vector.broadcast %cst_159 : f32 to vector<32x256xf32>
    %333 = arith.mulf %329, %332 : vector<32x256xf32>
    %cst_160 = arith.constant 0.282842726 : f32
    %334 = vector.broadcast %cst_160 : f32 to vector<32x256xf32>
    %335 = arith.mulf %329, %334 : vector<32x256xf32>
    %336 = arith.select %331, %333, %335 : vector<32x256xi1>, vector<32x256xf32>
    %337 = vector.extract_strided_slice %43 {offsets = [0, 64], sizes = [2, 16], strides = [1, 1]} : vector<2x128xf32> to vector<2x16xf32>
    %338 = vector.extract_strided_slice %50 {offsets = [0, 64], sizes = [2, 16], strides = [1, 1]} : vector<2x80xf32> to vector<2x16xf32>
    %339 = tpu.concatenate %337, %337, %337, %337, %337, %337, %337, %337, %337, %337, %337, %337, %337, %337, %337, %337 in 1 : vector<2x16xf32>, vector<2x16xf32>, vector<2x16xf32>, vector<2x16xf32>, vector<2x16xf32>, vector<2x16xf32>, vector<2x16xf32>, vector<2x16xf32>, vector<2x16xf32>, vector<2x16xf32>, vector<2x16xf32>, vector<2x16xf32>, vector<2x16xf32>, vector<2x16xf32>, vector<2x16xf32>, vector<2x16xf32> -> vector<2x256xf32>
    %340 = vector.extract_strided_slice %339 {offsets = [0, 0], sizes = [1, 256], strides = [1, 1]} : vector<2x256xf32> to vector<1x256xf32>
    %341 = vector.shape_cast %340 : vector<1x256xf32> to vector<1x256xf32>
    %342 = vector.broadcast %341 : vector<1x256xf32> to vector<16x256xf32>
    %343 = vector.extract_strided_slice %339 {offsets = [1, 0], sizes = [1, 256], strides = [1, 1]} : vector<2x256xf32> to vector<1x256xf32>
    %344 = vector.shape_cast %343 : vector<1x256xf32> to vector<1x256xf32>
    %345 = vector.broadcast %344 : vector<1x256xf32> to vector<16x256xf32>
    %346 = tpu.concatenate %342, %345 in 0 : vector<16x256xf32>, vector<16x256xf32> -> vector<32x256xf32>
    %347 = arith.mulf %336, %346 : vector<32x256xf32>
    %348 = arith.truncf %347 : vector<32x256xf32> to vector<32x256xbf16>
    %c1_161 = arith.constant 1 : index
    %c0_162 = arith.constant 0 : index
    %c0_163 = arith.constant 0 : index
    %349 = vector.load %arg11[%c1_161, %c0_162, %c0_163] : memref<3x256x256xbf16, #tpu.memory_space<vmem>>, vector<1x256x256xbf16>
    %350 = vector.shape_cast %349 : vector<1x256x256xbf16> to vector<256x256xbf16>
    %cst_164 = arith.constant dense<0.000000e+00> : vector<32x256xf32>
    %351 = tpu.matmul %348, %350, %cst_164 {dimension_numbers = #tpu.dot_dimension_numbers<[1], [0], [0], [1], [0, 0, 1, 1], [], []>} : vector<32x256xbf16>, vector<256x256xbf16>, vector<32x256xf32> -> vector<32x256xf32>
    %c1_i32_165 = arith.constant 1 : i32
    %352 = tpu.dynamic_rotate %347 by %c1_i32_165 dim 0 : vector<32x256xf32>, i32 -> vector<32x256xf32>
    %353 = tpu.iota {dimensions = array<i32: 0>} : vector<32x256xi32>
    %c15_i32_166 = arith.constant 15 : i32
    %354 = vector.broadcast %c15_i32_166 : i32 to vector<32x256xi32>
    %355 = arith.andi %353, %354 : vector<32x256xi32>
    %c1_i32_167 = arith.constant 1 : i32
    %356 = vector.broadcast %c1_i32_167 : i32 to vector<32x256xi32>
    %357 = arith.cmpi sge, %355, %356 : vector<32x256xi32>
    %cst_168 = arith.constant 0.000000e+00 : f32
    %358 = vector.broadcast %cst_168 : f32 to vector<32x256xf32>
    %359 = arith.select %357, %352, %358 : vector<32x256xi1>, vector<32x256xf32>
    %360 = arith.truncf %359 : vector<32x256xf32> to vector<32x256xbf16>
    %c0_169 = arith.constant 0 : index
    %c0_170 = arith.constant 0 : index
    %c0_171 = arith.constant 0 : index
    %361 = vector.load %arg11[%c0_169, %c0_170, %c0_171] : memref<3x256x256xbf16, #tpu.memory_space<vmem>>, vector<1x256x256xbf16>
    %362 = vector.shape_cast %361 : vector<1x256x256xbf16> to vector<256x256xbf16>
    %cst_172 = arith.constant dense<0.000000e+00> : vector<32x256xf32>
    %363 = tpu.matmul %360, %362, %cst_172 {dimension_numbers = #tpu.dot_dimension_numbers<[1], [0], [0], [1], [0, 0, 1, 1], [], []>} : vector<32x256xbf16>, vector<256x256xbf16>, vector<32x256xf32> -> vector<32x256xf32>
    %364 = arith.addf %351, %363 : vector<32x256xf32>
    %c31_i32_173 = arith.constant 31 : i32
    %365 = tpu.dynamic_rotate %347 by %c31_i32_173 dim 0 : vector<32x256xf32>, i32 -> vector<32x256xf32>
    %366 = tpu.iota {dimensions = array<i32: 0>} : vector<32x256xi32>
    %c15_i32_174 = arith.constant 15 : i32
    %367 = vector.broadcast %c15_i32_174 : i32 to vector<32x256xi32>
    %368 = arith.andi %366, %367 : vector<32x256xi32>
    %c15_i32_175 = arith.constant 15 : i32
    %369 = vector.broadcast %c15_i32_175 : i32 to vector<32x256xi32>
    %370 = arith.cmpi slt, %368, %369 : vector<32x256xi32>
    %cst_176 = arith.constant 0.000000e+00 : f32
    %371 = vector.broadcast %cst_176 : f32 to vector<32x256xf32>
    %372 = arith.select %370, %365, %371 : vector<32x256xi1>, vector<32x256xf32>
    %373 = arith.truncf %372 : vector<32x256xf32> to vector<32x256xbf16>
    %c2_177 = arith.constant 2 : index
    %c0_178 = arith.constant 0 : index
    %c0_179 = arith.constant 0 : index
    %374 = vector.load %arg11[%c2_177, %c0_178, %c0_179] : memref<3x256x256xbf16, #tpu.memory_space<vmem>>, vector<1x256x256xbf16>
    %375 = vector.shape_cast %374 : vector<1x256x256xbf16> to vector<256x256xbf16>
    %cst_180 = arith.constant dense<0.000000e+00> : vector<32x256xf32>
    %376 = tpu.matmul %373, %375, %cst_180 {dimension_numbers = #tpu.dot_dimension_numbers<[1], [0], [0], [1], [0, 0, 1, 1], [], []>} : vector<32x256xbf16>, vector<256x256xbf16>, vector<32x256xf32> -> vector<32x256xf32>
    %377 = arith.addf %364, %376 : vector<32x256xf32>
    %378 = tpu.concatenate %338, %338, %338, %338, %338, %338, %338, %338, %338, %338, %338, %338, %338, %338, %338, %338 in 1 : vector<2x16xf32>, vector<2x16xf32>, vector<2x16xf32>, vector<2x16xf32>, vector<2x16xf32>, vector<2x16xf32>, vector<2x16xf32>, vector<2x16xf32>, vector<2x16xf32>, vector<2x16xf32>, vector<2x16xf32>, vector<2x16xf32>, vector<2x16xf32>, vector<2x16xf32>, vector<2x16xf32>, vector<2x16xf32> -> vector<2x256xf32>
    %379 = vector.extract_strided_slice %378 {offsets = [0, 0], sizes = [1, 256], strides = [1, 1]} : vector<2x256xf32> to vector<1x256xf32>
    %380 = vector.shape_cast %379 : vector<1x256xf32> to vector<1x256xf32>
    %381 = vector.broadcast %380 : vector<1x256xf32> to vector<16x256xf32>
    %382 = vector.extract_strided_slice %378 {offsets = [1, 0], sizes = [1, 256], strides = [1, 1]} : vector<2x256xf32> to vector<1x256xf32>
    %383 = vector.shape_cast %382 : vector<1x256xf32> to vector<1x256xf32>
    %384 = vector.broadcast %383 : vector<1x256xf32> to vector<16x256xf32>
    %385 = tpu.concatenate %381, %384 in 0 : vector<16x256xf32>, vector<16x256xf32> -> vector<32x256xf32>
    %386 = arith.mulf %377, %385 : vector<32x256xf32>
    %c0_181 = arith.constant 0 : index
    %c0_182 = arith.constant 0 : index
    %387 = vector.load %arg16[%c0_181, %c0_182] : memref<32x256xf32, #tpu.memory_space<vmem>>, vector<32x256xf32>
    %388 = arith.addf %386, %387 : vector<32x256xf32>
    %cst_183 = arith.constant 0.000000e+00 : f32
    %389 = vector.broadcast %cst_183 : f32 to vector<32x256xf32>
    %390 = arith.cmpf oge, %388, %389 : vector<32x256xf32>
    %cst_184 = arith.constant 1.41421354 : f32
    %391 = vector.broadcast %cst_184 : f32 to vector<32x256xf32>
    %392 = arith.mulf %388, %391 : vector<32x256xf32>
    %cst_185 = arith.constant 0.282842726 : f32
    %393 = vector.broadcast %cst_185 : f32 to vector<32x256xf32>
    %394 = arith.mulf %388, %393 : vector<32x256xf32>
    %395 = arith.select %390, %392, %394 : vector<32x256xi1>, vector<32x256xf32>
    %396 = vector.extract_strided_slice %43 {offsets = [0, 112], sizes = [2, 16], strides = [1, 1]} : vector<2x128xf32> to vector<2x16xf32>
    %397 = tpu.concatenate %396, %396, %396, %396, %396, %396, %396, %396, %396, %396, %396, %396, %396, %396, %396, %396 in 1 : vector<2x16xf32>, vector<2x16xf32>, vector<2x16xf32>, vector<2x16xf32>, vector<2x16xf32>, vector<2x16xf32>, vector<2x16xf32>, vector<2x16xf32>, vector<2x16xf32>, vector<2x16xf32>, vector<2x16xf32>, vector<2x16xf32>, vector<2x16xf32>, vector<2x16xf32>, vector<2x16xf32>, vector<2x16xf32> -> vector<2x256xf32>
    %398 = vector.extract_strided_slice %397 {offsets = [0, 0], sizes = [1, 256], strides = [1, 1]} : vector<2x256xf32> to vector<1x256xf32>
    %399 = vector.shape_cast %398 : vector<1x256xf32> to vector<1x256xf32>
    %400 = vector.broadcast %399 : vector<1x256xf32> to vector<16x256xf32>
    %401 = vector.extract_strided_slice %397 {offsets = [1, 0], sizes = [1, 256], strides = [1, 1]} : vector<2x256xf32> to vector<1x256xf32>
    %402 = vector.shape_cast %401 : vector<1x256xf32> to vector<1x256xf32>
    %403 = vector.broadcast %402 : vector<1x256xf32> to vector<16x256xf32>
    %404 = tpu.concatenate %400, %403 in 0 : vector<16x256xf32>, vector<16x256xf32> -> vector<32x256xf32>
    %405 = arith.mulf %395, %404 : vector<32x256xf32>
    %406 = arith.truncf %405 : vector<32x256xf32> to vector<32x256xbf16>
    %c0_186 = arith.constant 0 : index
    %c0_187 = arith.constant 0 : index
    %407 = vector.load %arg19[%c0_186, %c0_187] : memref<256x48xbf16, #tpu.memory_space<vmem>>, vector<256x48xbf16>
    %cst_188 = arith.constant dense<0.000000e+00> : vector<32x48xf32>
    %408 = tpu.matmul %406, %407, %cst_188 {dimension_numbers = #tpu.dot_dimension_numbers<[1], [0], [0], [1], [0, 0, 1, 1], [], []>} : vector<32x256xbf16>, vector<256x48xbf16>, vector<32x48xf32> -> vector<32x48xf32>
    %c0_189 = arith.constant 0 : index
    %c0_190 = arith.constant 0 : index
    %409 = vector.load %arg22[%c0_189, %c0_190] : memref<1x48xf32, #tpu.memory_space<vmem>>, vector<1x48xf32>
    %410 = vector.broadcast %409 : vector<1x48xf32> to vector<32x48xf32>
    %411 = arith.addf %408, %410 : vector<32x48xf32>
    %412 = arith.addf %277, %411 : vector<32x48xf32>
    %c0_191 = arith.constant 0 : index
    %c0_192 = arith.constant 0 : index
    %413 = vector.load %arg29[%c0_191, %c0_192] : memref<32x48xf32, #tpu.memory_space<vmem>>, vector<32x48xf32>
    tpu.vector_store %arg29[%c0_191, %c0_192], %412 {strides = array<i32>} : memref<32x48xf32, #tpu.memory_space<vmem>>, vector<32x48xf32>,
    return
  }
}

</mosaic_0001>

<bundles_post_ra>
// kernel: stylegan2_forward.1
= control target key start
LH: loop header
LB: loop body
LE: loop exit
PB: predicated region body
PF: predicated region fallthrough
CT: control target
= control target key end

     0   :  { %s6708_s6 = smov 1   ;;  %s6709_s10 = smov 2   ;;  %s7991_s0 = inlined_call_operand.smem [shape: u32[30], index: -1, kind: input, shape index: {}] }
   0x1   :  { %s6780_s5 = sld [smem:[%s7991_s0]]   ;;  %s6710_s14 = smov 3  }
   0x2   :  { %s6785_s9 = sld [smem:[%s7991_s0 + %s6708_s6]]   ;;  %s6711_s18 = smov 4  }
   0x3   :  { %s6790_s13 = sld [smem:[%s7991_s0 + %s6709_s10]]   ;;  %s6712_s22 = smov 5  }
   0x4   :  { %s6795_s17 = sld [smem:[%s7991_s0 + %s6710_s14]]   ;;  %s6713_s26 = smov 6  }
   0x5   :  { %s6800_s21 = sld [smem:[%s7991_s0 + %s6711_s18]]   ;;  %s6714_s30 = smov 7  }
   0x6   :  { %s6805_s25 = sld [smem:[%s7991_s0 + %s6712_s22]]   ;;  %s6715_s4 = smov 8  }
   0x7   :  { %s6810_s29 = sld [smem:[%s7991_s0 + %s6713_s26]]   ;;  %s6716_s10 = smov 9  }
   0x8   :  { %s6815_s3 = sld [smem:[%s7991_s0 + %s6714_s30]]   ;;  %s6717_s15 = smov 10  }
   0x9   :  { %s6820_s8 = sld [smem:[%s7991_s0 + %s6715_s4]]   ;;  %s6718_s20 = smov 11  }
   0xa   :  { %s6825_s14 = sld [smem:[%s7991_s0 + %s6716_s10]]   ;;  %s6719_s26 = smov 12  }
   0xb   :  { %s6830_s19 = sld [smem:[%s7991_s0 + %s6717_s15]]   ;;  %s6720_s1 = smov 13  }
   0xc   :  { %8002 = sst [smem:[#allocation41_spill]] %s6805_s25  ;;  %s6721_s7 = smov 14  }
   0xd   :  { %s6835_s24 = sld [smem:[%s7991_s0 + %s6718_s20]]   ;;  %s6722_s15 = smov 15  }
   0xe   :  { %8003 = sst [smem:[#allocation42_spill]] %s6815_s3  ;;  %s6723_s22 = smov 16  }
   0xf   :  { %s6840_s30 = sld [smem:[%s7991_s0 + %s6719_s26]]   ;;  %s6724_s28 = smov 17  }
  0x10   :  { %s6845_s6 = sld [smem:[%s7991_s0 + %s6720_s1]]  }
  0x11   :  { %s6850_s12 = sld [smem:[%s7991_s0 + %s6721_s7]]   ;;  %s6725_s7 = smov 18  }
  0x12   :  { %s6855_s20 = sld [smem:[%s7991_s0 + %s6722_s15]]   ;;  %s6726_s15 = smov 19  }
  0x13   :  { %s6860_s27 = sld [smem:[%s7991_s0 + %s6723_s22]]   ;;  %s6727_s22 = smov 20  }
  0x14   :  { %s6865_s4 = sld [smem:[%s7991_s0 + %s6724_s28]]   ;;  %s6728_s28 = smov 21  }
  0x15   :  { %8004 = sst [smem:[#allocation43_spill]] %s6840_s30 }
  0x16   :  { %s6870_s3 = sld [smem:[%s7991_s0 + %s6725_s7]]   ;;  %s6729_s7 = smov 22  }
  0x17   :  { %8005 = sst [smem:[#allocation44_spill]] %s6850_s12 }
  0x18   :  { %s6875_s25 = sld [smem:[%s7991_s0 + %s6726_s15]]   ;;  %s6730_s15 = smov 23  }
  0x19   :  { %8006 = sst [smem:[#allocation45_spill]] %s6860_s27 }
  0x1a   :  { %8007 = sst [smem:[#allocation46_spill]] %s6865_s4 }
  0x1b   :  { %s6880_s27 = sld [smem:[%s7991_s0 + %s6727_s22]]   ;;  %s6731_s22 = smov 24  }
  0x1c   :  { %8008 = sst [smem:[#allocation47_spill]] %s6870_s3 }
  0x1d   :  { %s6885_s4 = sld [smem:[%s7991_s0 + %s6728_s28]]   ;;  %s6732_s28 = smov 25  }
  0x1e   :  { %8009 = sst [smem:[#allocation48_spill]] %s6875_s25 }
  0x1f   :  { %s6890_s3 = sld [smem:[%s7991_s0 + %s6729_s7]]   ;;  %s6733_s7 = smov 26  }
  0x20   :  { %s6895_s25 = sld [smem:[%s7991_s0 + %s6730_s15]]   ;;  %s6734_s15 = smov 27  }
  0x21   :  { %8010 = sst [smem:[#allocation49_spill]] %s6880_s27 }
  0x22   :  { %s6900_s27 = sld [smem:[%s7991_s0 + %s6731_s22]]   ;;  %s6735_s22 = smov 28  }
  0x23   :  { %8011 = sst [smem:[#allocation50_spill]] %s6885_s4 }
  0x24   :  { %s6905_s4 = sld [smem:[%s7991_s0 + %s6732_s28]]   ;;  %s6736_s28 = smov 29  }
  0x25   :  { %s6910_s12 = sld [smem:[%s7991_s0 + %s6733_s7]]  }
  0x26   :  { %8012 = sst [smem:[#allocation51_spill]] %s6895_s25 }
  0x27   :  { %s6915_s25 = sld [smem:[%s7991_s0 + %s6734_s15]]  }
  0x28   :  { %8013 = sst [smem:[#allocation52_spill]] %s6900_s27 }
  0x29   :  { %s6920_s27 = sld [smem:[%s7991_s0 + %s6735_s22]]  }
  0x2a   :  { %s6925_s30 = sld [smem:[%s7991_s0 + %s6736_s28]]  }
  0x2b   :  { %64 = vsyncpa [#allocation3], 0 }
  0x2c   :  { %65 = vsyncpa [#allocation5], 0 }
  0x2d   :  { %66 = vsyncpa [#allocation8], 0 }
  0x2e   :  { %67 = vsyncpa [#allocation11], 0 }
  0x2f   :  { %68 = vsyncpa [#allocation14], 0 }
  0x30   :  { %69 = vsyncpa [#allocation17], 0 }
  0x31   :  { %70 = vsyncpa [#allocation20], 0 }
  0x32   :  { %71 = vsyncpa [#allocation23], 0 }
  0x33   :  { %72 = vsyncpa [#allocation26], 0 }
  0x34   :  { %73 = vsyncpa [#allocation29], 0  ;;  %s6737_s7 = smov [#allocation4]   ;;  %s6270_s11 = scalar_lea.hbm %s6785_s9, 1024 }
  0x35   :  { %s89_s10 = sshll.u32 %s6737_s7, 4  ;;  %p6271_p0 = scmp.ne.s32.totalorder %s6785_s9, %s6270_s11  ;;  %s90_s10 = int_to_ptr.vmem [resolvable:$true] %s89_s10 }
  0x36   :  { %p6274_p1 = scmp.lt.u32.totalorder %s6270_s11, %s6785_s9 }
  0x38   :  { %p6276_p2 = pnand %p6274_p1, %p6271_p0 }
  0x3a   :  { %6279 = shalt.err (!%p6276_p2)
}
  0x3b   :  { %s6280_s0 = scalar_lea.vmem %s90_s10, 1024  ;;  %p6285_p4 = scmp.lt.s32.totalorder %s90_s10, %s90_s10 }
  0x3c   :  { %p6281_p3 = scmp.ne.s32.totalorder %s90_s10, %s6280_s0  ;;  %p6286_p5 = scmp.lt.s32.totalorder %s6280_s0, %s6280_s0 }
  0x3e   :  { %p6287_p6 = por %p6286_p5, %p6285_p4 }
  0x40   :  { %p6288_p7 = pnand %p6287_p6, %p6281_p3 }
  0x42   :  { %6291 = shalt.err (!%p6288_p7)
}
  0x43   :  { %s6738_s15 = smov 128   ;;  %s6739_s16 = smov 8  }
  0x44   :  { %95 = dma.hbm_to_vmem [thread:$0]  %s6785_s9, 1024, %s90_s10, [#allocation5], %s6738_s15, %s6738_s15, %s6739_s16  }
  0x45   :  { %s6740_s18 = smov [#allocation7]   ;;  %s6741_s23 = smov [#allocation10]  }
  0x46   :  { %s113_s22 = sshll.u32 %s6740_s18, 4  ;;  %s138_s26 = sshll.u32 %s6741_s23, 4  ;;  %s114_s22 = int_to_ptr.vmem [resolvable:$true] %s113_s22  ;;  %s139_s26 = int_to_ptr.vmem [resolvable:$true] %s138_s26 }
  0x47   :  { %s6292_s28 = scalar_lea.hbm %s6795_s17, 512 }
  0x48   :  { %p6293_p8 = scmp.ne.s32.totalorder %s6795_s17, %s6292_s28  ;;  %p6296_p9 = scmp.lt.u32.totalorder %s6292_s28, %s6795_s17 }
  0x4a   :  { %p6298_p10 = pnand %p6296_p9, %p6293_p8 }
  0x4c   :  { %6301 = shalt.err (!%p6298_p10)
}
  0x4d   :  { %s6302_s1 = scalar_lea.vmem %s114_s22, 512  ;;  %p6307_p12 = scmp.lt.s32.totalorder %s114_s22, %s114_s22 }
  0x4e   :  { %p6303_p11 = scmp.ne.s32.totalorder %s114_s22, %s6302_s1  ;;  %p6308_p13 = scmp.lt.s32.totalorder %s6302_s1, %s6302_s1 }
  0x50   :  { %p6309_p0 = por %p6308_p13, %p6307_p12 }
  0x52   :  { %p6310_p1 = pnand %p6309_p0, %p6303_p11 }
  0x54   :  { %6313 = shalt.err (!%p6310_p1)
}
  0x55   :  { %119 = dma.hbm_to_vmem [thread:$0]  %s6795_s17, 512, %s114_s22, [#allocation8], %s6738_s15, %s6738_s15, %s6739_s16  }
  0x56   :  { %s6314_s9 = scalar_lea.hbm %s6810_s29, 128 }
  0x57   :  { %p6315_p2 = scmp.ne.s32.totalorder %s6810_s29, %s6314_s9  ;;  %p6318_p3 = scmp.lt.u32.totalorder %s6314_s9, %s6810_s29 }
  0x59   :  { %p6320_p4 = pnand %p6318_p3, %p6315_p2 }
  0x5b   :  { %6323 = shalt.err (!%p6320_p4)
}
  0x5c   :  { %s6324_s2 = scalar_lea.vmem %s139_s26, 128  ;;  %p6329_p6 = scmp.lt.s32.totalorder %s139_s26, %s139_s26 }
  0x5d   :  { %p6325_p5 = scmp.ne.s32.totalorder %s139_s26, %s6324_s2  ;;  %p6330_p7 = scmp.lt.s32.totalorder %s6324_s2, %s6324_s2 }
  0x5f   :  { %p6331_p8 = por %p6330_p7, %p6329_p6 }
  0x61   :  { %p6332_p9 = pnand %p6331_p8, %p6325_p5 }
  0x63   :  { %6335 = shalt.err (!%p6332_p9)
}
  0x64   :  { %141 = dma.hbm_to_vmem [thread:$0]  %s6810_s29, 128, %s139_s26, [#allocation11]  }
  0x65   :  { %s6742_s7 = smov [#allocation13]   ;;  %s6743_s10 = smov [#allocation16]  }
  0x66   :  { %s161_s17 = sshll.u32 %s6742_s7, 4  ;;  %s185_s11 = sshll.u32 %s6743_s10, 4  ;;  %s162_s17 = int_to_ptr.vmem [resolvable:$true] %s161_s17  ;;  %s186_s11 = int_to_ptr.vmem [resolvable:$true] %s185_s11 }
  0x67   :  { %s6336_s0 = scalar_lea.hbm %s6825_s14, 3072 }
  0x68   :  { %p6337_p10 = scmp.ne.s32.totalorder %s6825_s14, %s6336_s0  ;;  %p6340_p11 = scmp.lt.u32.totalorder %s6336_s0, %s6825_s14 }
  0x6a   :  { %p6342_p12 = pnand %p6340_p11, %p6337_p10 }
  0x6c   :  { %6345 = shalt.err (!%p6342_p12)
}
  0x6d   :  { %s6346_s18 = scalar_lea.vmem %s162_s17, 3072  ;;  %p6351_p0 = scmp.lt.s32.totalorder %s162_s17, %s162_s17 }
  0x6e   :  { %p6347_p13 = scmp.ne.s32.totalorder %s162_s17, %s6346_s18  ;;  %p6352_p1 = scmp.lt.s32.totalorder %s6346_s18, %s6346_s18 }
  0x70   :  { %p6353_p2 = por %p6352_p1, %p6351_p0 }
  0x72   :  { %p6354_p3 = pnand %p6353_p2, %p6347_p13 }
  0x74   :  { %6357 = shalt.err (!%p6354_p3)
}
  0x75   :  { %s6744_s22 = smov 64   ;;  %s6745_s29 = smov 4  }
  0x76   :  { %167 = dma.hbm_to_vmem [thread:$0]  %s6825_s14, 3072, %s162_s17, [#allocation14], %s6744_s22, %s6744_s22, %s6745_s29  }
  0x77   :  { %s6358_s23 = scalar_lea.hbm %s6835_s24, 12288 }
  0x78   :  { %p6359_p4 = scmp.ne.s32.totalorder %s6835_s24, %s6358_s23  ;;  %p6362_p5 = scmp.lt.u32.totalorder %s6358_s23, %s6835_s24 }
  0x7a   :  { %p6364_p6 = pnand %p6362_p5, %p6359_p4 }
  0x7c   :  { %6367 = shalt.err (!%p6364_p6)
}
  0x7d   :  { %s6368_s26 = scalar_lea.vmem %s186_s11, 12288  ;;  %p6373_p8 = scmp.lt.s32.totalorder %s186_s11, %s186_s11 }
  0x7e   :  { %p6369_p7 = scmp.ne.s32.totalorder %s186_s11, %s6368_s26  ;;  %p6374_p9 = scmp.lt.s32.totalorder %s6368_s26, %s6368_s26 }
  0x80   :  { %p6375_p10 = por %p6374_p9, %p6373_p8 }
  0x82   :  { %p6376_p11 = pnand %p6375_p10, %p6369_p7 }
  0x84   :  { %6379 = shalt.err (!%p6376_p11)
}
  0x85   :  { %191 = dma.hbm_to_vmem [thread:$0]  %s6835_s24, 12288, %s186_s11, [#allocation17], %s6738_s15, %s6738_s15, %s6739_s16  }
  0x86   :  { %s6746_s14 = smov [#allocation19]   ;;  %s6380_s1 = scalar_lea.hbm %s6845_s6, 256 }
  0x87   :  { %s207_s28 = sshll.u32 %s6746_s14, 4  ;;  %p6381_p12 = scmp.ne.s32.totalorder %s6845_s6, %s6380_s1  ;;  %s208_s28 = int_to_ptr.vmem [resolvable:$true] %s207_s28 }
  0x88   :  { %p6384_p13 = scmp.lt.u32.totalorder %s6380_s1, %s6845_s6 }
  0x8a   :  { %p6386_p0 = pnand %p6384_p13, %p6381_p12 }
  0x8c   :  { %6389 = shalt.err (!%p6386_p0)
}
  0x8d   :  { %s6390_s9 = scalar_lea.vmem %s208_s28, 256  ;;  %p6395_p2 = scmp.lt.s32.totalorder %s208_s28, %s208_s28 }
  0x8e   :  { %p6391_p1 = scmp.ne.s32.totalorder %s208_s28, %s6390_s9  ;;  %p6396_p3 = scmp.lt.s32.totalorder %s6390_s9, %s6390_s9 }
  0x90   :  { %p6397_p4 = por %p6396_p3, %p6395_p2 }
  0x92   :  { %p6398_p5 = pnand %p6397_p4, %p6391_p1 }
  0x94   :  { %6401 = shalt.err (!%p6398_p5)
}
  0x95   :  { %213 = dma.hbm_to_vmem [thread:$0]  %s6845_s6, 256, %s208_s28, [#allocation20], %s6738_s15, %s6738_s15, %s6739_s16  }
  0x96   :  { %s6747_s24 = smov [#allocation22]   ;;  %s6402_s7 = scalar_lea.hbm %s6855_s20, 1024 }
  0x97   :  { %s231_s2 = sshll.u32 %s6747_s24, 4  ;;  %p6403_p6 = scmp.ne.s32.totalorder %s6855_s20, %s6402_s7  ;;  %s232_s2 = int_to_ptr.vmem [resolvable:$true] %s231_s2 }
  0x98   :  { %p6406_p7 = scmp.lt.u32.totalorder %s6402_s7, %s6855_s20 }
  0x9a   :  { %p6408_p8 = pnand %p6406_p7, %p6403_p6 }
  0x9c   :  { %6411 = shalt.err (!%p6408_p8)
}
  0x9d   :  { %s6412_s17 = scalar_lea.vmem %s232_s2, 1024  ;;  %p6417_p10 = scmp.lt.s32.totalorder %s232_s2, %s232_s2 }
  0x9e   :  { %p6413_p9 = scmp.ne.s32.totalorder %s232_s2, %s6412_s17  ;;  %p6418_p11 = scmp.lt.s32.totalorder %s6412_s17, %s6412_s17 }
  0xa0   :  { %p6419_p12 = por %p6418_p11, %p6417_p10 }
  0xa2   :  { %p6420_p13 = pnand %p6419_p12, %p6413_p9 }
  0xa4   :  { %6423 = shalt.err (!%p6420_p13)
}
  0xa5   :  { %s6748_s10 = smov 256   ;;  %s6749_s6 = smov 16  }
  0xa6   :  { %237 = dma.hbm_to_vmem [thread:$0]  %s6855_s20, 1024, %s232_s2, [#allocation23], %s6748_s10, %s6748_s10, %s6749_s6  }
  0xa7   :  { %s6750_s11 = smov [#allocation25]   ;;  %s6751_s18 = smov [#allocation28]  }
  0xa8   :  { %s266_s0 = sshll.u32 %s6750_s11, 4  ;;  %s289_s23 = sshll.u32 %s6751_s18, 4  ;;  %s267_s0 = int_to_ptr.vmem [resolvable:$true] %s266_s0  ;;  %s290_s23 = int_to_ptr.vmem [resolvable:$true] %s289_s23 }
  0xa9   :  { %s6424_s26 = scalar_lea.hbm %s6890_s3, 16 }
  0xaa   :  { %p6425_p0 = scmp.ne.s32.totalorder %s6890_s3, %s6424_s26  ;;  %p6428_p1 = scmp.lt.u32.totalorder %s6424_s26, %s6890_s3 }
  0xac   :  { %p6430_p2 = pnand %p6428_p1, %p6425_p0 }
  0xae   :  { %6433 = shalt.err (!%p6430_p2)
}
  0xaf   :  { %s6434_s14 = scalar_lea.vmem %s267_s0, 16  ;;  %s6438_s28 = scalar_lea.vmem %s267_s0, 32 }
  0xb0   :  { %p6435_p3 = scmp.ne.s32.totalorder %s267_s0, %s6434_s14  ;;  %p6439_p4 = scmp.lt.s32.totalorder %s267_s0, %s267_s0 }
  0xb1   :  { %p6440_p5 = scmp.lt.s32.totalorder %s6438_s28, %s6434_s14 }
  0xb3   :  { %p6441_p6 = por %p6440_p5, %p6439_p4 }
  0xb5   :  { %p6442_p7 = pnand %p6441_p6, %p6435_p3 }
  0xb7   :  { %6445 = shalt.err (!%p6442_p7)
}
  0xb8   :  { %269 = dma.hbm_to_vmem [thread:$0]  %s6890_s3, 16, %s267_s0, [#allocation26]  }
  0xb9   :  { %s6446_s20 = scalar_lea.hbm %s6905_s4, 256 }
  0xba   :  { %p6447_p8 = scmp.ne.s32.totalorder %s6905_s4, %s6446_s20  ;;  %p6450_p9 = scmp.lt.u32.totalorder %s6446_s20, %s6905_s4 }
  0xbc   :  { %p6452_p10 = pnand %p6450_p9, %p6447_p8 }
  0xbe   :  { %6455 = shalt.err (!%p6452_p10)
}
  0xbf   :  { %s6456_s1 = scalar_lea.vmem %s290_s23, 256  ;;  %p6461_p12 = scmp.lt.s32.totalorder %s290_s23, %s290_s23 }
  0xc0   :  { %p6457_p11 = scmp.ne.s32.totalorder %s290_s23, %s6456_s1  ;;  %p6462_p13 = scmp.lt.s32.totalorder %s6456_s1, %s6456_s1 }
  0xc2   :  { %p6463_p0 = por %p6462_p13, %p6461_p12 }
  0xc4   :  { %p6464_p1 = pnand %p6463_p0, %p6457_p11 }
  0xc6   :  { %6467 = shalt.err (!%p6464_p1)
}
  0xc7   :  { %295 = dma.hbm_to_vmem [thread:$0]  %s6905_s4, 256, %s290_s23, [#allocation29], %s6738_s15, %s6738_s15, %s6739_s16  }
  0xc8   :  { %s6752_s3 = smov [#allocation2]   ;;  %s6753_s24 = smov [#allocation6]  }
  0xc9   :  { %s80_s9 = sshll.u32 %s6752_s3, 4  ;;  %s101_s2 = sshll.u32 %s6753_s24, 4  ;;  %s81_s9 = int_to_ptr.vmem [resolvable:$true] %s80_s9  ;;  %s102_s2 = int_to_ptr.vmem [resolvable:$true] %s101_s2 }
  0xca   :  { %s6468_s7 = scalar_lea.hbm %s6780_s5, 32 }
  0xcb   :  { %p6469_p2 = scmp.ne.s32.totalorder %s6780_s5, %s6468_s7  ;;  %p6472_p3 = scmp.lt.u32.totalorder %s6468_s7, %s6780_s5 }
  0xcd   :  { %p6474_p4 = pnand %p6472_p3, %p6469_p2 }
  0xcf   :  { %6477 = shalt.err (!%p6474_p4)
}
  0xd0   :  { %s6478_s17 = scalar_lea.vmem %s81_s9, 32  ;;  %p6483_p6 = scmp.lt.s32.totalorder %s81_s9, %s81_s9 }
  0xd1   :  { %p6479_p5 = scmp.ne.s32.totalorder %s81_s9, %s6478_s17  ;;  %p6484_p7 = scmp.lt.s32.totalorder %s6478_s17, %s6478_s17 }
  0xd3   :  { %p6485_p8 = por %p6484_p7, %p6483_p6 }
  0xd5   :  { %p6486_p9 = pnand %p6485_p8, %p6479_p5 }
  0xd7   :  { %6489 = shalt.err (!%p6486_p9)
}
  0xd8   :  { %83 = dma.hbm_to_vmem [thread:$0]  %s6780_s5, 32, %s81_s9, [#allocation3]  }
  0xd9   :  { %s6490_s4 = scalar_lea.hbm %s6790_s13, 32 }
  0xda   :  { %p6491_p10 = scmp.ne.s32.totalorder %s6790_s13, %s6490_s4  ;;  %p6494_p11 = scmp.lt.u32.totalorder %s6490_s4, %s6790_s13 }
  0xdc   :  { %p6496_p12 = pnand %p6494_p11, %p6491_p10 }
  0xde   :  { %6499 = shalt.err (!%p6496_p12)
}
  0xdf   :  { %s6500_s11 = scalar_lea.vmem %s102_s2, 32  ;;  %p6505_p0 = scmp.lt.s32.totalorder %s102_s2, %s102_s2 }
  0xe0   :  { %p6501_p13 = scmp.ne.s32.totalorder %s102_s2, %s6500_s11  ;;  %p6506_p1 = scmp.lt.s32.totalorder %s6500_s11, %s6500_s11 }
  0xe2   :  { %p6507_p2 = por %p6506_p1, %p6505_p0 }
  0xe4   :  { %p6508_p3 = pnand %p6507_p2, %p6501_p13 }
  0xe6   :  { %6511 = shalt.err (!%p6508_p3)
}
  0xe7   :  { %s6754_s0 = smov 1   ;;  %s6755_s5 = smov [#allocation9]  }
  0xe8   :  { %107 = dma.hbm_to_vmem [thread:$0]  %s6790_s13, 32, %s102_s2, [#allocation5], %s6749_s6, %s6749_s6, %s6754_s0  }
  0xe9   :  { %s126_s18 = sshll.u32 %s6755_s5, 4  ;;  %s6756_s23 = smov [#allocation12]   ;;  %s127_s18 = int_to_ptr.vmem [resolvable:$true] %s126_s18 }
  0xea   :  { %s149_s26 = sshll.u32 %s6756_s23, 4  ;;  %s6512_s14 = scalar_lea.hbm %s6800_s21, 16  ;;  %s6994_s26 = int_to_ptr.vmem [resolvable:$true] %s149_s26 }
  0xeb   :  { %p6513_p4 = scmp.ne.s32.totalorder %s6800_s21, %s6512_s14  ;;  %p6516_p5 = scmp.lt.u32.totalorder %s6512_s14, %s6800_s21 }
  0xed   :  { %p6518_p6 = pnand %p6516_p5, %p6513_p4 }
  0xef   :  { %6521 = shalt.err (!%p6518_p6)
}
  0xf0   :  { %s6522_s28 = scalar_lea.vmem %s127_s18, 16  ;;  %s6526_s20 = scalar_lea.vmem %s127_s18, 32 }
  0xf1   :  { %p6523_p7 = scmp.ne.s32.totalorder %s127_s18, %s6522_s28  ;;  %p6527_p8 = scmp.lt.s32.totalorder %s127_s18, %s127_s18 }
  0xf2   :  { %p6528_p9 = scmp.lt.s32.totalorder %s6526_s20, %s6522_s28 }
  0xf4   :  { %p6529_p10 = por %p6528_p9, %p6527_p8 }
  0xf6   :  { %p6530_p11 = pnand %p6529_p10, %p6523_p7 }
  0xf8   :  { %6533 = shalt.err (!%p6530_p11)
}
  0xf9   :  { %129 = dma.hbm_to_vmem [thread:$0]  %s6800_s21, 16, %s127_s18, [#allocation8]  }
  0xfa   :  { %s6534_s13 = scalar_lea.hbm %s6820_s8, 3072 }
  0xfb   :  { %p6535_p12 = scmp.ne.s32.totalorder %s6820_s8, %s6534_s13  ;;  %p6538_p13 = scmp.lt.u32.totalorder %s6534_s13, %s6820_s8 }
  0xfd   :  { %p6540_p0 = pnand %p6538_p13, %p6535_p12 }
  0xff   :  { %6543 = shalt.err (!%p6540_p0)
}
 0x100   :  { %s6544_s1 = scalar_lea.vmem %s6994_s26, 3072  ;;  %p6549_p2 = scmp.lt.s32.totalorder %s6994_s26, %s6994_s26 }
 0x101   :  { %p6545_p1 = scmp.ne.s32.totalorder %s6994_s26, %s6544_s1  ;;  %p6550_p3 = scmp.lt.s32.totalorder %s6544_s1, %s6544_s1 }
 0x103   :  { %p6551_p4 = por %p6550_p3, %p6549_p2 }
 0x105   :  { %p6552_p5 = pnand %p6551_p4, %p6545_p1 }
 0x107   :  { %6555 = shalt.err (!%p6552_p5)
}
 0x108   :  { %155 = dma.hbm_to_vmem [thread:$0]  %s6820_s8, 3072, %s6994_s26, [#allocation11], %s6744_s22, %s6744_s22, %s6745_s29  }
 0x109   :  { %s6757_s21 = smov [#allocation15]   ;;  %s6758_s9 = smov [#allocation18]  }
 0x10a   :  { %s173_s3 = sshll.u32 %s6757_s21, 4  ;;  %s198_s24 = sshll.u32 %s6758_s9, 4  ;;  %s174_s3 = int_to_ptr.vmem [resolvable:$true] %s173_s3  ;;  %s199_s24 = int_to_ptr.vmem [resolvable:$true] %s198_s24 }
 0x10b   :  { %s6556_s2 = scalar_lea.hbm %s6830_s19, 12288 }
 0x10c   :  { %p6557_p6 = scmp.ne.s32.totalorder %s6830_s19, %s6556_s2  ;;  %p6560_p7 = scmp.lt.u32.totalorder %s6556_s2, %s6830_s19 }
 0x10e   :  { %p6562_p8 = pnand %p6560_p7, %p6557_p6 }
 0x110   :  { %6565 = shalt.err (!%p6562_p8)
}
 0x111   :  { %s6566_s7 = scalar_lea.vmem %s174_s3, 12288  ;;  %p6571_p10 = scmp.lt.s32.totalorder %s174_s3, %s174_s3 }
 0x112   :  { %p6567_p9 = scmp.ne.s32.totalorder %s174_s3, %s6566_s7  ;;  %p6572_p11 = scmp.lt.s32.totalorder %s6566_s7, %s6566_s7 }
 0x114   :  { %p6573_p12 = por %p6572_p11, %p6571_p10 }
 0x116   :  { %p6574_p13 = pnand %p6573_p12, %p6567_p9 }
 0x118   :  { %6577 = shalt.err (!%p6574_p13)
}
 0x119   :  { %s8014_s8 = sld [smem:[#allocation43_spill]] }
 0x11a   :  { %179 = dma.hbm_to_vmem [thread:$0]  %s6830_s19, 12288, %s174_s3, [#allocation14], %s6738_s15, %s6738_s15, %s6739_s16  }
 0x11f   :  { %s6578_s29 = scalar_lea.hbm %s8014_s8, 128 }
 0x120   :  { %p6579_p0 = scmp.ne.s32.totalorder %s8014_s8, %s6578_s29  ;;  %p6582_p1 = scmp.lt.u32.totalorder %s6578_s29, %s8014_s8 }
 0x122   :  { %p6584_p2 = pnand %p6582_p1, %p6579_p0 }
 0x124   :  { %6587 = shalt.err (!%p6584_p2)
}
 0x125   :  { %s6588_s17 = scalar_lea.vmem %s199_s24, 128  ;;  %p6593_p4 = scmp.lt.s32.totalorder %s199_s24, %s199_s24 }
 0x126   :  { %p6589_p3 = scmp.ne.s32.totalorder %s199_s24, %s6588_s17  ;;  %p6594_p5 = scmp.lt.s32.totalorder %s6588_s17, %s6588_s17 }
 0x128   :  { %p6595_p6 = por %p6594_p5, %p6593_p4 }
 0x12a   :  { %p6596_p7 = pnand %p6595_p6, %p6589_p3 }
 0x12c   :  { %6599 = shalt.err (!%p6596_p7)
}
 0x12d   :  { %s8015_s4 = sld [smem:[#allocation44_spill]]  ;;  %s6759_s11 = smov [#allocation21]  }
 0x12e   :  { %201 = dma.hbm_to_vmem [thread:$0]  %s8014_s8, 128, %s199_s24, [#allocation17]  }
 0x12f   :  { %s219_s0 = sshll.u32 %s6759_s11, 4  ;;  %s6760_s19 = smov [#allocation24]   ;;  %s220_s0 = int_to_ptr.vmem [resolvable:$true] %s219_s0 }
 0x130   :  { %s243_s5 = sshll.u32 %s6760_s19, 4  ;;  %s7023_s5 = int_to_ptr.vmem [resolvable:$true] %s243_s5 }
 0x133   :  { %s6600_s18 = scalar_lea.hbm %s8015_s4, 256 }
 0x134   :  { %p6601_p8 = scmp.ne.s32.totalorder %s8015_s4, %s6600_s18  ;;  %p6604_p9 = scmp.lt.u32.totalorder %s6600_s18, %s8015_s4 }
 0x136   :  { %p6606_p10 = pnand %p6604_p9, %p6601_p8 }
 0x138   :  { %6609 = shalt.err (!%p6606_p10)
}
 0x139   :  { %s6610_s23 = scalar_lea.vmem %s220_s0, 256  ;;  %p6615_p12 = scmp.lt.s32.totalorder %s220_s0, %s220_s0 }
 0x13a   :  { %p6611_p11 = scmp.ne.s32.totalorder %s220_s0, %s6610_s23  ;;  %p6616_p13 = scmp.lt.s32.totalorder %s6610_s23, %s6610_s23 }
 0x13c   :  { %p6617_p0 = por %p6616_p13, %p6615_p12 }
 0x13e   :  { %p6618_p1 = pnand %p6617_p0, %p6611_p11 }
 0x140   :  { %6621 = shalt.err (!%p6618_p1)
}
 0x141   :  { %s8016_s26 = sld [smem:[#allocation45_spill]] }
 0x142   :  { %225 = dma.hbm_to_vmem [thread:$0]  %s8015_s4, 256, %s220_s0, [#allocation20], %s6738_s15, %s6738_s15, %s6739_s16  }
 0x147   :  { %s6622_s14 = scalar_lea.hbm %s8016_s26, 1024 }
 0x148   :  { %p6623_p2 = scmp.ne.s32.totalorder %s8016_s26, %s6622_s14  ;;  %p6626_p3 = scmp.lt.u32.totalorder %s6622_s14, %s8016_s26 }
 0x14a   :  { %p6628_p4 = pnand %p6626_p3, %p6623_p2 }
 0x14c   :  { %6631 = shalt.err (!%p6628_p4)
}
 0x14d   :  { %s6632_s28 = scalar_lea.vmem %s7023_s5, 1024  ;;  %p6637_p6 = scmp.lt.s32.totalorder %s7023_s5, %s7023_s5 }
 0x14e   :  { %p6633_p5 = scmp.ne.s32.totalorder %s7023_s5, %s6632_s28  ;;  %p6638_p7 = scmp.lt.s32.totalorder %s6632_s28, %s6632_s28 }
 0x150   :  { %p6639_p8 = por %p6638_p7, %p6637_p6 }
 0x152   :  { %p6640_p9 = pnand %p6639_p8, %p6633_p5 }
 0x154   :  { %6643 = shalt.err (!%p6640_p9)
}
 0x155   :  { %s8017_s20 = sld [smem:[#allocation51_spill]]  ;;  %s6761_s13 = smov [#allocation27]  }
 0x156   :  { %249 = dma.hbm_to_vmem [thread:$0]  %s8016_s26, 1024, %s7023_s5, [#allocation23], %s6748_s10, %s6748_s10, %s6749_s6  }
 0x157   :  { %s275_s1 = sshll.u32 %s6761_s13, 4  ;;  %s6762_s21 = smov [#allocation30]   ;;  %s276_s1 = int_to_ptr.vmem [resolvable:$true] %s275_s1 }
 0x158   :  { %s301_s3 = sshll.u32 %s6762_s21, 4  ;;  %s7044_s3 = int_to_ptr.vmem [resolvable:$true] %s301_s3 }
 0x15b   :  { %s6644_s9 = scalar_lea.hbm %s8017_s20, 1024 }
 0x15c   :  { %p6645_p10 = scmp.ne.s32.totalorder %s8017_s20, %s6644_s9  ;;  %p6648_p11 = scmp.lt.u32.totalorder %s6644_s9, %s8017_s20 }
 0x15e   :  { %p6650_p12 = pnand %p6648_p11, %p6645_p10 }
 0x160   :  { %6653 = shalt.err (!%p6650_p12)
}
 0x161   :  { %s6654_s24 = scalar_lea.vmem %s276_s1, 1024  ;;  %p6659_p0 = scmp.lt.s32.totalorder %s276_s1, %s276_s1 }
 0x162   :  { %p6655_p13 = scmp.ne.s32.totalorder %s276_s1, %s6654_s24  ;;  %p6660_p1 = scmp.lt.s32.totalorder %s6654_s24, %s6654_s24 }
 0x164   :  { %p6661_p2 = por %p6660_p1, %p6659_p0 }
 0x166   :  { %p6662_p3 = pnand %p6661_p2, %p6655_p13 }
 0x168   :  { %6665 = shalt.err (!%p6662_p3)
}
 0x169   :  { %281 = dma.hbm_to_vmem [thread:$0]  %s8017_s20, 1024, %s276_s1, [#allocation26], %s6738_s15, %s6738_s15, %s6739_s16  }
 0x16a   :  { %s6666_s10 = scalar_lea.hbm %s6910_s12, 384 }
 0x16b   :  { %p6667_p4 = scmp.ne.s32.totalorder %s6910_s12, %s6666_s10  ;;  %p6670_p5 = scmp.lt.u32.totalorder %s6666_s10, %s6910_s12 }
 0x16d   :  { %p6672_p6 = pnand %p6670_p5, %p6667_p4 }
 0x16f   :  { %6675 = shalt.err (!%p6672_p6)
}
 0x170   :  { %s6676_s2 = scalar_lea.vmem %s7044_s3, 384  ;;  %p6681_p8 = scmp.lt.s32.totalorder %s7044_s3, %s7044_s3 }
 0x171   :  { %p6677_p7 = scmp.ne.s32.totalorder %s7044_s3, %s6676_s2  ;;  %p6682_p9 = scmp.lt.s32.totalorder %s6676_s2, %s6676_s2 }
 0x173   :  { %p6683_p10 = por %p6682_p9, %p6681_p8 }
 0x175   :  { %p6684_p11 = pnand %p6683_p10, %p6677_p7 }
 0x177   :  { %6687 = shalt.err (!%p6684_p11)
}
 0x178   :  { %307 = dma.hbm_to_vmem [thread:$0]  %s6910_s12, 384, %s7044_s3, [#allocation29], %s6738_s15, %s6738_s15, %s6739_s16  }
 0x179   :  { %6688 = dma.done.wait [#allocation3], 32  }
 0x17a   :  { %6689 = vsyncadd [#allocation3], 4294967264 }
 0x17b   :  { %6690 = dma.done.wait [#allocation5], 1056  }
 0x17c   :  { %6691 = vsyncadd [#allocation5], 4294966240 }
 0x17d   :  { %6692 = dma.done.wait [#allocation8], 528  }
 0x17e   :  { %6693 = vsyncadd [#allocation8], 4294966768 }
 0x17f   :  { %6694 = dma.done.wait [#allocation11], 3200  }
 0x180   :  { %6695 = vsyncadd [#allocation11], 4294964096 }
 0x181   :  { %6696 = dma.done.wait [#allocation14], 15360  }
 0x182   :  { %6697 = vsyncadd [#allocation14], 4294951936 }
 0x183   :  { %6698 = dma.done.wait [#allocation17], 12416  }
 0x184   :  { %6699 = vsyncadd [#allocation17], 4294954880 }
 0x185   :  { %6700 = dma.done.wait [#allocation20], 512  }
 0x186   :  { %6701 = vsyncadd [#allocation20], 4294966784 }
 0x187   :  { %6702 = dma.done.wait [#allocation23], 2048  }
 0x188   :  { %6703 = vsyncadd [#allocation23], 4294965248 }
 0x189   :  { %6704 = dma.done.wait [#allocation26], 1040  }
 0x18a   :  { %6705 = vsyncadd [#allocation26], 4294966256 }
 0x18b   :  { %6706 = dma.done.wait [#allocation29], 640  }
 0x18c   :  { %6707 = vsyncadd [#allocation29], 4294966656  ;;  %vm372_vm0 = vcmask 254976   ;;  %v370_v0 = vld [vmem:[#allocation2] sm:$0x3]  ;;  %v381_v3 = vld [vmem:[#allocation4] sm:$0xff] }
 0x18d   :  { %v371_v1 = vmul.f32 %v370_v0, %v370_v0  ;;  %v382_v4 = vld [vmem:[#allocation4 + $0x8] sm:$0xff]  ;;  %v383_v5 = vld [vmem:[#allocation4 + $0x10] sm:$0xff]  ;;  %v6763_v6 = vmov 0.0|0.0   ;;  %v384_v8 = vld [vmem:[#allocation4 + $0x18] sm:$0xff]  ;;  %vm6764_vm1 = vmmov 0   ;;  %v6765_v9 = vmov 0.0  }
 0x18e   :  { %5673 = vmatprep.subr.bf16.mxu1 %v6763_v6  ;;  %v5674_v7 = vpack.c.bf16 %v382_v4, %v381_v3  ;;  %5382 = vmatprep.mubr.msk.f32.mxu1 %vm6764_vm1, %v6765_v9  ;;  %v5677_v10 = vpack.c.bf16 %v384_v8, %v383_v5  ;;  %v471_v14 = vld [vmem:[#allocation4 + $0x20] sm:$0xff]  ;;  %v472_v15 = vld [vmem:[#allocation4 + $0x28] sm:$0xff]  ;;  %vm392_vm2 = vcmask 261120   ;;  %v473_v19 = vld [vmem:[#allocation4 + $0x30] sm:$0xff]  ;;  %s8018_s12 = sld [smem:[#allocation41_spill]]  ;;  %s8019_s15 = sld [smem:[#allocation42_spill]] }
 0x18f   :  { %v373_v2 = vsel %vm372_vm0, %v371_v1, 0.0  ;;  %5685 = vmatprep.subr.bf16.mxu0 %v6763_v6  ;;  %5404 = vmatprep.mubr.msk.f32.mxu0 %vm6764_vm1, %v6765_v9  ;;  %v5680_v17 = vpack.c.bf16 %v472_v15, %v471_v14  ;;  %v474_v20 = vld [vmem:[#allocation4 + $0x38] sm:$0xff]  ;;  %v560_v22 = vld [vmem:[#allocation7] sm:$0xff]  ;;  %v561_v23 = vld [vmem:[#allocation7 + $0x8] sm:$0xff]  ;;  %vm655_vm5 = vcmask 654336   ;;  %s6766_s16 = smov 32  }
 0x190   :  { %374 = vadd.xlane.f32.xlu0 %v373_v2  ;;  %5675 = vmatpush3.bf16.msra.mxu1 %v5674_v7  ;;  %v5683_v21 = vpack.c.bf16 %v474_v20, %v473_v19  ;;  %v5686_v24 = vpack.c.bf16 %v561_v23, %v560_v22  ;;  %v4821_v25 = vld [vmem:[#allocation6] ss:$0 sm:$0xff]  ;;  %v562_v32 = vld [vmem:[#allocation7 + $0x10] sm:$0xff]  ;;  %v4823_v47 = vld [vmem:[#allocation6 + $0x1] ss:$0 sm:$0xff]  ;;  %s6767_s7 = smov 48   ;;  %v746_v2 = vlaneseq }
 0x191   :  { %5676 = vmatprep.subr.bf16.mxu1 %v6763_v6  ;;  %v563_v33 = vld [vmem:[#allocation7 + $0x18] sm:$0xff]  ;;  %v4825_v61 = vld [vmem:[#allocation9] ss:$0 sm:$0xff]  ;;  %s6768_s8 = smov 96   ;;  %vm741_vm6 = vcmask 130048   ;;  %vm744_vm7 = vcmask 392192  }
 0x192   :  { %5687 = vmatpush3.bf16.msra.mxu0 %v5686_v24  ;;  %v5689_v34 = vpack.c.bf16 %v563_v33, %v562_v32  ;;  %v7124_v3 = vshrl.u32 %v746_v2, 7  ;;  %vm754_vm8 = vcmask 1043456   ;;  %vm806_vm10 = vcmask 523264   ;;  %s8020_s29 = sld [smem:[#allocation46_spill]]  ;;  %s6769_s17 = smov 112  }
 0x193   :  { %5688 = vmatprep.subr.bf16.mxu0 %v6763_v6  ;;  %s6770_s4 = smov 80   ;;  %vm1384_vm12 = vcmask 785408   ;;  %vm1386_vm13 = vcmask 916480   ;;  %vm1215_vm15 = vcmask 64512   ;;  %vm6771_vm0 = vmmov 1   ;;  %s8032_s11 = sld [smem:[#allocation50_spill]] }
 0x194   :  { %5678 = vmatpush3.bf16.msra.mxu1 %v5677_v10  ;;  %v645_v35 = vld [vmem:[%s8018_s12] sm:$0xff]  ;;  %v646_v36 = vld [vmem:[%s8018_s12 + $0x8] sm:$0xff]  ;;  %v647_v37 = vld [vmem:[%s8018_s12 + $0x10] sm:$0xff]  ;;  %v7134_v8 = vsub.s32 0, %v7124_v3  ;;  %v7137_v10 = vsub.s32 1, %v7124_v3  ;;  %s8045_s0 = sld [smem:[#allocation48_spill]] }
 0x195   :  { %5679 = vmatprep.subr.bf16.mxu1 %v6763_v6  ;;  %v5692_v38 = vpack.c.bf16 %v646_v36, %v645_v35  ;;  %v648_v39 = vld [vmem:[%s8018_s12 + $0x18] sm:$0xff]  ;;  %v649_v41 = vld [vmem:[%s8018_s12 + $0x20] sm:$0xff]  ;;  %v650_v42 = vld [vmem:[%s8018_s12 + $0x28] sm:$0xff] }
 0x196   :  { %5690 = vmatpush3.bf16.msra.mxu0 %v5689_v34  ;;  %v5695_v40 = vpack.c.bf16 %v648_v39, %v647_v37  ;;  %v5698_v43 = vpack.c.bf16 %v650_v42, %v649_v41  ;;  %v651_v44 = vld [vmem:[%s8018_s12 + $0x30] sm:$0xff]  ;;  %v652_v45 = vld [vmem:[%s8018_s12 + $0x38] sm:$0xff]  ;;  %v653_v54 = vld [vmem:[%s8018_s12 + $0x40] sm:$0xff] }
 0x197   :  { %5430 = vmatprep.subr.bf16.mxu0 %v6765_v9  ;;  %v5701_v46 = vpack.c.bf16 %v652_v45, %v651_v44  ;;  %v654_v55 = vld [vmem:[%s8018_s12 + $0x48] sm:$0xff]  ;;  %v5886_v57 = vld [vmem:[%s8019_s15] sm:$0xff]   ;;  %v5888_v59 = vld [vmem:[%s8019_s15 + $0x10] sm:$0xff]  }
 0x198   :  { %v5704_v56 = vpack.c.bf16 %v654_v55, %v653_v54  ;;  %v5887_v58 = vld [vmem:[%s8019_s15 + $0x8] sm:$0xff]   ;;  %v5889_v60 = vld [vmem:[%s8019_s15 + $0x18] sm:$0xff]   ;;  %v5890_v22 = vld [vmem:[%s8019_s15 + $0x20] sm:$0xff]  }
 0x199   :  { %v5891_v24 = vld [vmem:[%s8019_s15 + $0x28] sm:$0xff]   ;;  %v5897_v32 = vld [vmem:[%s8019_s15 + $0x58] sm:$0xff]   ;;  %v5898_v39 = vld [vmem:[%s8020_s29] sm:$0xff]  }
 0x19a   :  { %v5900_v41 = vld [vmem:[%s8020_s29 + $0x10] sm:$0xff]   ;;  %v5901_v42 = vld [vmem:[%s8020_s29 + $0x18] sm:$0xff]  }
 0x21d   :  { %v375_v11 = vpop.xlane.xlu0 %374 }
 0x21e   :  { %v377_v12 = vmul.f32 0.03125, %v375_v11 }
 0x220   :  { %v378_v13 = vadd.f32 1e-08, %v377_v12 }
 0x222   :  { %6262 = vrsqrt.f32 %v378_v13 }
 0x22c   :  { %v6263_v16 = vpop.eup %6262 }
 0x22d   :  { %v380_v18 = vmul.f32 %v6263_v16, %v370_v0  ;;  %v730_v16 = vld [vmem:[#allocation10] sm:$0xff] }
 0x22f   :  { %5383 = vmatmul.mubr.msk.f32.vlgmr.msra.gmra.mrb[0].mxu1 %vm392_vm2, %v380_v18 }
 0x230   :  { %5681 = vmatpush3.bf16.msra.mxu1 %v5680_v17  ;;  %5393 = vmatprep.mubr.msk.f32.mxu1 %vm6764_vm1, %v6765_v9  ;;  %v770_v17 = vand.u32 3, %v7124_v3 }
 0x231   :  { %5682 = vmatprep.subr.bf16.mxu1 %v6763_v6 }
 0x232   :  { %vm771_vm9 = vcmp.ge.s32.totalorder %v770_v17, 1  ;;  %vm918_vm11 = vcmp.lt.s32.totalorder %v770_v17, 3 }
 0x234   :  { %5684 = vmatpush3.bf16.msra.mxu1 %v5683_v21 }
 0x235   :  { %5691 = vmatprep.subr.bf16.mxu1 %v6763_v6 }
 0x302   :  { %v462_v26 = vpop.f32.mrb[0].mxu1 }
 0x303   :  { %v463_v27 = vadd.f32 %v4821_v25, %v462_v26  ;;  %v5384_v28 = vpop.f32.mrb[1].mxu1  ;;  %v5892_v25 = vld [vmem:[%s8019_s15 + $0x30] sm:$0xff]   ;;  %v5893_v26 = vld [vmem:[%s8019_s15 + $0x38] sm:$0xff]  }
 0x305   :  { %vm466_vm3 = vcmp.ge.f32.partialorder %v463_v27, 0.0  ;;  %v467_v29 = vmul.f32 1.4142135, %v463_v27  ;;  %v468_v30 = vmul.f32 0.28284273, %v463_v27  ;;  %v5894_v27 = vld [vmem:[%s8019_s15 + $0x40] sm:$0xff]  }
 0x307   :  { %v469_v31 = vsel %vm466_vm3, %v467_v29, %v468_v30  ;;  %v5895_v29 = vld [vmem:[%s8019_s15 + $0x48] sm:$0xff]   ;;  %v5896_v30 = vld [vmem:[%s8019_s15 + $0x50] sm:$0xff]   ;;  %vm1299_vm3 = vcmask 97280  }
 0x308   :  { %5394 = vmatmul.mubr.msk.f32.vlgmr.msra.gmra.mrb[2].mxu1 %vm392_vm2, %v469_v31 }
 0x309   :  { %5427 = vmatprep.mubr.msk.f32.mxu1 %vm6764_vm1, %v6765_v9  ;;  %5693 = vmatpush3.bf16.msra.mxu1 %v5692_v38 }
 0x30a   :  { %5694 = vmatprep.subr.bf16.mxu1 %v6763_v6 }
 0x30d   :  { %5696 = vmatpush3.bf16.msra.mxu1 %v5695_v40  ;;  %v5899_v40 = vld [vmem:[%s8020_s29 + $0x8] sm:$0xff]  }
 0x30e   :  { %5697 = vmatprep.subr.bf16.mxu1 %v6763_v6 }
 0x311   :  { %5699 = vmatpush3.bf16.msra.mxu1 %v5698_v43 }
 0x312   :  { %5700 = vmatprep.subr.bf16.mxu1 %v6763_v6 }
 0x315   :  { %5702 = vmatpush3.bf16.msra.mxu1 %v5701_v46 }
 0x316   :  { %5703 = vmatprep.subr.bf16.mxu1 %v6763_v6 }
 0x319   :  { %5705 = vmatpush3.bf16.msra.mxu1 %v5704_v56 }
 0x31a   :  { %5466 = vmatprep.subr.bf16.mxu1 %v6765_v9 }
 0x3db   :  { %v552_v48 = vpop.f32.mrb[2].mxu1 }
 0x3dc   :  { %v553_v49 = vadd.f32 %v4823_v47, %v552_v48  ;;  %v5395_v50 = vpop.f32.mrb[3].mxu1 }
 0x3de   :  { %vm556_vm4 = vcmp.ge.f32.partialorder %v553_v49, 0.0  ;;  %v557_v51 = vmul.f32 1.4142135, %v553_v49  ;;  %v558_v52 = vmul.f32 0.28284273, %v553_v49 }
 0x3e0   :  { %v559_v53 = vsel %vm556_vm4, %v557_v51, %v558_v52 }
 0x3e1   :  { %5405 = vmatmul.mubr.msk.f32.vlgmr.msra.gmra.mrb[0].mxu0 %vm392_vm2, %v559_v53 }
 0x3e2   :  { %5438 = vmatprep.mubr.msk.bf16.mxu0 %vm6764_vm1, %v6765_v9  ;;  %5431 = vmatpush3.bf16.msra.mxu0 %v5886_v57 }
 0x3e3   :  { %5432 = vmatprep.subr.bf16.mxu0 %v6765_v9 }
 0x3e6   :  { %5433 = vmatpush3.bf16.msra.mxu0 %v5887_v58 }
 0x3e7   :  { %5434 = vmatprep.subr.bf16.mxu0 %v6765_v9 }
 0x3ea   :  { %5435 = vmatpush3.bf16.msra.mxu0 %v5888_v59 }
 0x3eb   :  { %5436 = vmatprep.subr.bf16.mxu0 %v6765_v9 }
 0x3ee   :  { %5437 = vmatpush3.bf16.msra.mxu0 %v5889_v60 }
 0x3ef   :  { %5442 = vmatprep.subr.bf16.mxu0 %v6765_v9 }
 0x4b4   :  { %v640_v62 = vpop.f32.mrb[0].mxu0 }
 0x4b5   :  { %v7108_v63 = vadd.f32 %v4825_v61, %v640_v62  ;;  %v5406_v0 = vpop.f32.mrb[1].mxu0 }
 0x4b7   :  { %735 = vrot.lane.b32.xlu1 %v7108_v63, %s6766_s16  ;;  %732 = vrot.lane.b32.xlu0 %v7108_v63, %s6749_s6  ;;  %v644_v1 = vmul.f32 %v7108_v63, %v7108_v63 }
 0x4b9   :  { %5428 = vmatmul.mubr.msk.f32.vlgmr.msra.gmra.mrb[4].mxu1 %vm655_vm5, %v644_v1 }
 0x4ba   :  { %5474 = vmatprep.mubr.msk.bf16.mxu1 %vm6764_vm1, %v6765_v9  ;;  %5467 = vmatpush3.bf16.msra.mxu1 %v5898_v39 }
 0x4bb   :  { %738 = vrot.lane.b32.xlu1 %v7108_v63, %s6767_s7  ;;  %1033 = vrot.lane.b32.xlu0 %v7108_v63, %s6768_s8 }
 0x4bc   :  { %5468 = vmatprep.subr.bf16.mxu1 %v6765_v9 }
 0x4be   :  { %5469 = vmatpush3.bf16.msra.mxu1 %v5899_v40 }
 0x4bf   :  { %5470 = vmatprep.subr.bf16.mxu1 %v6765_v9 }
 0x4c2   :  { %5471 = vmatpush3.bf16.msra.mxu1 %v5900_v41 }
 0x4c3   :  { %5472 = vmatprep.subr.bf16.mxu1 %v6765_v9 }
 0x4c6   :  { %5473 = vmatpush3.bf16.msra.mxu1 %v5901_v42 }
 0x4c7   :  { %5706 = vmatprep.subr.bf16.mxu1 %v6763_v6 }
 0x529   :  { %v7126_v4 = vpop.permute.xlu1 %735  ;;  %v7128_v5 = vpop.permute.xlu0 %732 }
 0x52a   :  { %v742_v7 = vsel %vm741_vm6, %v7108_v63, %v7128_v5  ;;  %v4478_v53 = vsel %vm741_vm6, %v7128_v5, %v7126_v4 }
 0x52b   :  { %v743_v11 = vsel %vm392_vm2, %v742_v7, %v7126_v4 }
 0x52d   :  { %v7141_v12 = vpop.permute.xlu1 %738  ;;  %v7200_v43 = vpop.permute.xlu0 %1033 }
 0x52e   :  { %v745_v13 = vsel %vm744_vm7, %v743_v11, %v7141_v12  ;;  %v2162_v54 = vsel %vm741_vm6, %v7126_v4, %v7141_v12  ;;  %v4479_v55 = vsel %vm392_vm2, %v4478_v53, %v7141_v12 }
 0x52f   :  { %v749_v14 = vrot.slane %v745_v13, %v7134_v8  ;;  %v753_v15 = vrot.slane %v745_v13, %v7137_v10 }
 0x531   :  { %v755_v18 = vsel %vm754_vm8, %v749_v14, %v753_v15 }
 0x532   :  { %v756_v19 = vmul.f32 %v755_v18, %v730_v16 }
 0x534   :  { %v767_v20 = vrot.slane %v756_v19, 7  ;;  %v757_v28 = vpack.c.bf16 %v756_v19, %v756_v19  ;;  %v917_v31 = vrot.slane %v756_v19, 1 }
 0x536   :  { %v772_v21 = vsel %vm771_vm9, %v767_v20, 0.0  ;;  %v919_v33 = vsel %vm918_vm11, %v917_v31, 0.0  ;;  %vm1418_vm9 = vcmp.lt.s32.totalorder %v7124_v3, 1 }
 0x537   :  { %v773_v23 = vpack.c.bf16 %v772_v21, %v772_v21  ;;  %v920_v34 = vpack.c.bf16 %v919_v33, %v919_v33 }
 0x539   :  { %5439 = vmatmul.mubr.msk.bf16.vlgmr.msra.gmra.mrb[4].mxu0 %vm806_vm10, %v773_v23 }
 0x53a   :  { %5443 = vmatpush3.bf16.msra.mxu0 %v5890_v22  ;;  %5450 = vmatprep.mubr.msk.bf16.mxu0 %vm6764_vm1, %v6765_v9 }
 0x53b   :  { %5444 = vmatprep.subr.bf16.mxu0 %v6765_v9 }
 0x53e   :  { %5445 = vmatpush3.bf16.msra.mxu0 %v5891_v24 }
 0x53f   :  { %5446 = vmatprep.subr.bf16.mxu0 %v6765_v9 }
 0x542   :  { %5447 = vmatpush3.bf16.msra.mxu0 %v5892_v25 }
 0x543   :  { %5448 = vmatprep.subr.bf16.mxu0 %v6765_v9 }
 0x546   :  { %5449 = vmatpush3.bf16.msra.mxu0 %v5893_v26 }
 0x547   :  { %5454 = vmatprep.subr.bf16.mxu0 %v6765_v9 }
 0x549   :  { %5451 = vmatmul.mubr.msk.bf16.vlgmr.msra.gmra.mrb[4].mxu0 %vm806_vm10, %v757_v28 }
 0x54a   :  { %5455 = vmatpush3.bf16.msra.mxu0 %v5894_v27  ;;  %5462 = vmatprep.mubr.msk.bf16.mxu0 %vm6764_vm1, %v6765_v9 }
 0x54b   :  { %5456 = vmatprep.subr.bf16.mxu0 %v6765_v9 }
 0x54e   :  { %5457 = vmatpush3.bf16.msra.mxu0 %v5895_v29 }
 0x54f   :  { %5458 = vmatprep.subr.bf16.mxu0 %v6765_v9 }
 0x552   :  { %5459 = vmatpush3.bf16.msra.mxu0 %v5896_v30 }
 0x553   :  { %5460 = vmatprep.subr.bf16.mxu0 %v6765_v9 }
 0x556   :  { %5461 = vmatpush3.bf16.msra.mxu0 %v5897_v32 }
 0x557   :  { %5509 = vmatprep.subr.bf16.mxu0 %v6765_v9 }
 0x559   :  { %5463 = vmatmul.mubr.msk.bf16.vlgmr.msra.gmra.mrb[4].mxu0 %vm806_vm10, %v920_v34 }
 0x55a   :  { %5525 = vmatprep.mubr.msk.bf16.mxu0 %vm6764_vm1, %v6765_v9 }
 0x58c   :  { %v725_v35 = vpop.f32.mrb[4].mxu1 }
 0x58d   :  { %v726_v36 = vadd.f32 1e-08, %v725_v35  ;;  %v5429_v37 = vpop.f32.mrb[5].mxu1 }
 0x58f   :  { %6264 = vrsqrt.f32 %v726_v36 }
 0x599   :  { %v7174_v38 = vpop.eup %6264 }
 0x59a   :  { %1741 = vrot.lane.b32.xlu0 %v7174_v38, %s6769_s17  ;;  %999 = vrot.lane.b32.xlu1 %v7174_v38, %s6749_s6  ;;  %s8031_s6 = sld [smem:[#allocation52_spill]] }
 0x59e   :  { %1747 = vrot.lane.b32.xlu0 %v7174_v38, %s6770_s4  ;;  %1002 = vrot.lane.b32.xlu1 %v7174_v38, %s6766_s16 }
 0x5a2   :  { %1005 = vrot.lane.b32.xlu1 %v7174_v38, %s6767_s7 }
 0x5a6   :  { %1027 = vrot.lane.b32.xlu1 %v7108_v63, %s6744_s22 }
 0x5aa   :  { %1030 = vrot.lane.b32.xlu1 %v7108_v63, %s6770_s4 }
 0x5ae   :  { %1376 = vrot.lane.b32.xlu1 %v7108_v63, %s6769_s17 }
 0x5b2   :  { %1744 = vrot.lane.b32.xlu1 %v7174_v38, %s6744_s22  ;;  %s8021_s22 = sld [smem:[#allocation49_spill]] }
 0x5b6   :  { %1750 = vrot.lane.b32.xlu1 %v7174_v38, %s6768_s8 }
 0x60c   :  { %v7202_v44 = vpop.permute.xlu0 %1741  ;;  %v7204_v45 = vpop.permute.xlu1 %999 }
 0x60d   :  { %v1753_v46 = vsel %vm741_vm6, %v7202_v44, %v7174_v38  ;;  %v1008_v59 = vsel %vm741_vm6, %v7174_v38, %v7204_v45 }
 0x60e   :  { %v1754_v47 = vsel %vm392_vm2, %v1753_v46, %v7204_v45 }
 0x610   :  { %v7211_v48 = vpop.permute.xlu1 %1002  ;;  %v1748_v26 = vpop.permute.xlu0 %1747 }
 0x611   :  { %v1755_v49 = vsel %vm744_vm7, %v1754_v47, %v7211_v48  ;;  %v1009_v11 = vsel %vm392_vm2, %v1008_v59, %v7211_v48 }
 0x614   :  { %v7215_v50 = vpop.permute.xlu1 %1005 }
 0x615   :  { %v1756_v51 = vsel %vm806_vm10, %v1755_v49, %v7215_v50  ;;  %v1010_v14 = vsel %vm744_vm7, %v1009_v11, %v7215_v50 }
 0x616   :  { %v1014_v25 = vrot.slane %v1010_v14, %v7134_v8  ;;  %v1018_v53 = vrot.slane %v1010_v14, %v7137_v10  ;;  %v1021_v14 = vld [vmem:[#allocation18] sm:$0xff] }
 0x618   :  { %v7219_v52 = vpop.permute.xlu1 %1027 }
 0x619   :  { %v2163_v56 = vsel %vm392_vm2, %v2162_v54, %v7219_v52  ;;  %v4480_v57 = vsel %vm744_vm7, %v4479_v55, %v7219_v52  ;;  %v1036_v32 = vsel %vm741_vm6, %v7141_v12, %v7219_v52 }
 0x61c   :  { %v1031_v58 = vpop.permute.xlu1 %1030 }
 0x61d   :  { %v2164_v60 = vsel %vm744_vm7, %v2163_v56, %v1031_v58  ;;  %v3579_v61 = vsel %vm741_vm6, %v7219_v52, %v1031_v58  ;;  %v4481_v62 = vsel %vm806_vm10, %v4480_v57, %v1031_v58  ;;  %v2666_v1 = vsel %vm741_vm6, %v1031_v58, %v7200_v43 }
 0x61e   :  { %v2165_v0 = vsel %vm806_vm10, %v2164_v60, %v7200_v43  ;;  %v3580_v2 = vsel %vm392_vm2, %v3579_v61, %v7200_v43  ;;  %v4482_v7 = vsel %vm655_vm5, %v4481_v62, %v7200_v43  ;;  %v1037_v41 = vsel %vm392_vm2, %v1036_v32, %v1031_v58 }
 0x61f   :  { %v1038_v62 = vsel %vm744_vm7, %v1037_v41, %v7200_v43 }
 0x620   :  { %v1377_v13 = vpop.permute.xlu1 %1376 }
 0x621   :  { %v1379_v15 = vsel %vm741_vm6, %v1377_v13, %v7108_v63  ;;  %v1782_v16 = vsel %vm741_vm6, %v7200_v43, %v1377_v13  ;;  %v2166_v17 = vsel %vm655_vm5, %v2165_v0, %v1377_v13  ;;  %v2667_v18 = vsel %vm392_vm2, %v2666_v1, %v1377_v13 }
 0x622   :  { %v1380_v19 = vsel %vm392_vm2, %v1379_v15, %v7128_v5  ;;  %v1783_v20 = vsel %vm392_vm2, %v1782_v16, %v7108_v63  ;;  %v3581_v21 = vsel %vm744_vm7, %v3580_v2, %v1377_v13  ;;  %v4483_v24 = vsel %vm1384_vm12, %v4482_v7, %v1377_v13 }
 0x623   :  { %v1784_v22 = vsel %vm744_vm7, %v1783_v20, %v7128_v5  ;;  %v3582_v23 = vsel %vm806_vm10, %v3581_v21, %v7108_v63  ;;  %v7275_v29 = vsel %vm1386_vm13, %v4483_v24, %v7108_v63  ;;  %v1381_v31 = vsel %vm744_vm7, %v1380_v19, %v7126_v4 }
 0x624   :  { %v1785_v27 = vsel %vm806_vm10, %v1784_v22, %v7126_v4  ;;  %v3583_v28 = vsel %vm655_vm5, %v3582_v23, %v7128_v5  ;;  %v1745_v30 = vpop.permute.xlu1 %1744  ;;  %v1382_v36 = vsel %vm806_vm10, %v1381_v31, %v7141_v12  ;;  %v2167_v40 = vsel %vm1384_vm12, %v2166_v17, %v7108_v63 }
 0x625   :  { %v3584_v33 = vsel %vm1384_vm12, %v3583_v28, %v7126_v4  ;;  %v1757_v34 = vsel %vm655_vm5, %v1756_v51, %v1745_v30  ;;  %v4407_v35 = vsel %vm741_vm6, %v1745_v30, %v1748_v26  ;;  %v1786_v39 = vsel %vm655_vm5, %v1785_v27, %v7141_v12 }
 0x626   :  { %v1758_v37 = vsel %vm1384_vm12, %v1757_v34, %v1748_v26  ;;  %v1383_v42 = vsel %vm655_vm5, %v1382_v36, %v7219_v52  ;;  %v1787_v46 = vsel %vm1384_vm12, %v1786_v39, %v7219_v52  ;;  %v7300_v47 = vsel %vm1386_vm13, %v2167_v40, %v7128_v5  ;;  %v1132_v36 = vld [vmem:[#allocation27] sm:$0xff] }
 0x627   :  { %v2668_v49 = vsel %vm744_vm7, %v2667_v18, %v7108_v63  ;;  %v1385_v54 = vsel %vm1384_vm12, %v1383_v42, %v1031_v58  ;;  %v7307_v55 = vsel %vm1386_vm13, %v1787_v46, %v1031_v58  ;;  %v1042_v17 = vrot.slane %v1038_v62, %v7134_v8  ;;  %v1134_v42 = vld [vmem:[#allocation27 + $0x10] sm:$0xff]  ;;  %v1135_v46 = vld [vmem:[#allocation27 + $0x18] sm:$0xff] }
 0x628   :  { %v1751_v51 = vpop.permute.xlu1 %1750  ;;  %v7315_v60 = vsel %vm1386_vm13, %v1385_v54, %v7200_v43  ;;  %v2669_v7 = vsel %vm806_vm10, %v2668_v49, %v7128_v5  ;;  %v1019_v43 = vsel %vm754_vm8, %v1014_v25, %v1018_v53  ;;  %v1046_v18 = vrot.slane %v1038_v62, %v7137_v10  ;;  %v1136_v49 = vld [vmem:[#allocation27 + $0x20] sm:$0xff]  ;;  %v1139_v53 = vld [vmem:[#allocation27 + $0x38] sm:$0xff] }
 0x629   :  { %v2133_v56 = vsel %vm741_vm6, %v1751_v51, %v7202_v44  ;;  %v3508_v57 = vsel %vm741_vm6, %v1748_v26, %v1751_v51  ;;  %v4408_v59 = vsel %vm392_vm2, %v4407_v35, %v1751_v51  ;;  %v7339_v15 = vsel %vm1386_vm13, %v1758_v37, %v1751_v51  ;;  %v1133_v37 = vld [vmem:[#allocation27 + $0x8] sm:$0xff]  ;;  %v5907_v62 = vld [vmem:[#allocation12 + $0x28] sm:$0xff]  }
 0x62a   :  { %v2134_v63 = vsel %vm392_vm2, %v2133_v56, %v7174_v38  ;;  %v3509_v61 = vsel %vm392_vm2, %v3508_v57, %v7202_v44  ;;  %v4409_v58 = vsel %vm744_vm7, %v4408_v59, %v7202_v44  ;;  %v2670_v20 = vsel %vm655_vm5, %v2669_v7, %v7126_v4  ;;  %v7385_v56 = vld [vmem:[%s6915_s25] sm:$0xff]  ;;  %v5902_v57 = vld [vmem:[#allocation12] sm:$0xff]   ;;  %v5903_v59 = vld [vmem:[#allocation12 + $0x8] sm:$0xff]  }
 0x62b   :  { %v2135_v0 = vsel %vm744_vm7, %v2134_v63, %v7204_v45  ;;  %v3510_v1 = vsel %vm744_vm7, %v3509_v61, %v7174_v38  ;;  %v4410_v2 = vsel %vm806_vm10, %v4409_v58, %v7174_v38  ;;  %v2671_v25 = vsel %vm1384_vm12, %v2670_v20, %v7141_v12  ;;  %5510 = vmatpush3.bf16.msra.mxu0 %v5902_v57  ;;  %v5904_v63 = vld [vmem:[#allocation12 + $0x10] sm:$0xff]   ;;  %v5905_v61 = vld [vmem:[#allocation12 + $0x18] sm:$0xff]   ;;  %v5906_v58 = vld [vmem:[#allocation12 + $0x20] sm:$0xff]  }
 0x62c   :  { %v3511_v11 = vsel %vm806_vm10, %v3510_v1, %v7204_v45  ;;  %v4411_v44 = vsel %vm655_vm5, %v4410_v2, %v7204_v45  ;;  %v991_v13 = vpop.f32.mrb[4].mxu0  ;;  %v2136_v45 = vsel %vm806_vm10, %v2135_v0, %v7211_v48  ;;  %v7361_v31 = vsel %vm1386_vm13, %v2671_v25, %v7219_v52  ;;  %5511 = vmatprep.subr.bf16.mxu0 %v6765_v9  ;;  %vm5720_vm2 = vmpackc.low %vm754_vm8, %vm6771_vm0  ;;  %v5929_v25 = vld [vmem:[#allocation13 + $0x18] sm:$0xff]   ;;  %v2373_v20 = vld [vmem:[%s8031_s6 + $0x30] sm:$0xff] }
 0x62d   :  { %v3512_v16 = vsel %vm655_vm5, %v3511_v11, %v7211_v48  ;;  %v1020_v38 = vmul.f32 %v1019_v43, %v991_v13  ;;  %v5464_v5 = vpop.f32.mrb[5].mxu0  ;;  %v2137_v24 = vsel %vm655_vm5, %v2136_v45, %v7215_v50  ;;  %v7365_v4 = vsel %vm1386_vm13, %v3584_v33, %v7141_v12  ;;  %v1297_v11 = vld [vmem:[#allocation28] sm:$0xff]  ;;  %v7396_v43 = vld [vmem:[%s6915_s25 + $0x8] sm:$0xff]  ;;  %s8030_s25 = sld [smem:[#allocation47_spill]] }
 0x62e   :  { %v994_v19 = vpop.f32.mrb[6].mxu0  ;;  %v3513_v21 = vsel %vm1384_vm12, %v3512_v16, %v7215_v50  ;;  %v2138_v28 = vsel %vm1384_vm12, %v2137_v24, %v1745_v30  ;;  %v1047_v40 = vsel %vm754_vm8, %v1042_v17, %v1046_v18  ;;  %v4412_v52 = vsel %vm1384_vm12, %v4411_v44, %v7211_v48  ;;  %v1137_v48 = vld [vmem:[#allocation27 + $0x28] sm:$0xff] }
 0x62f   :  { %v1022_v22 = vadd.f32 %v1021_v14, %v1020_v38  ;;  %v5465_v23 = vpop.f32.mrb[7].mxu0  ;;  %v7356_v27 = vsel %vm1386_vm13, %v3513_v21, %v1745_v30  ;;  %v7368_v35 = vsel %vm1386_vm13, %v2138_v28, %v1748_v26  ;;  %v5707_v41 = vpack.c.bf16 %v1133_v37, %v1132_v36  ;;  %5512 = vmatpush3.bf16.msra.mxu0 %v5903_v59  ;;  %v1298_v44 = vld [vmem:[#allocation28 + $0x8] sm:$0xf]  ;;  %v5909_v18 = vld [vmem:[#allocation12 + $0x38] sm:$0xff]   ;;  %v5911_v59 = vld [vmem:[#allocation12 + $0x48] sm:$0xff]  }
 0x630   :  { %v7375_v12 = vsel %vm1386_vm13, %v4412_v52, %v7215_v50  ;;  %v5710_v26 = vpack.c.bf16 %v1135_v46, %v1134_v42  ;;  %v5713_v51 = vpack.c.bf16 %v1137_v48, %v1136_v49  ;;  %v1138_v50 = vld [vmem:[#allocation27 + $0x30] sm:$0xff]  ;;  %5513 = vmatprep.subr.bf16.mxu0 %v6765_v9  ;;  %v5719_v14 = vpack.c.bf16 %v1298_v44, %v1297_v11  ;;  %v4859_v38 = vld [vmem:[%s8021_s22] ss:$0 sm:$0xff]  ;;  %v5927_v23 = vld [vmem:[#allocation13 + $0x8] sm:$0xff]  }
 0x631   :  { %vm1023_vm14 = vcmp.ge.f32.partialorder %v1022_v22, 0.0  ;;  %v1024_v32 = vmul.f32 1.4142135, %v1022_v22  ;;  %v1025_v34 = vmul.f32 0.28284273, %v1022_v22  ;;  %v5716_v54 = vpack.c.bf16 %v1139_v53, %v1138_v50  ;;  %v5908_v5 = vld [vmem:[#allocation12 + $0x30] sm:$0xff]  }
 0x632   :  { %v1422_v19 = vand.u32 7, %v7124_v3  ;;  %v5926_v22 = vld [vmem:[#allocation13] sm:$0xff]   ;;  %v5928_v24 = vld [vmem:[#allocation13 + $0x10] sm:$0xff]   ;;  %v1395_v28 = vrot.slane %v7315_v60, %v7137_v10  ;;  %v5921_v44 = vld [vmem:[#allocation12 + $0x98] sm:$0xff]  }
 0x633   :  { %v1026_v39 = vsel %vm1023_vm14, %v1024_v32, %v1025_v34  ;;  %5514 = vmatpush3.bf16.msra.mxu0 %v5904_v63  ;;  %v1391_v34 = vrot.slane %v7315_v60, %v7134_v8  ;;  %v5910_v53 = vld [vmem:[#allocation12 + $0x40] sm:$0xff]   ;;  %v5912_v63 = vld [vmem:[#allocation12 + $0x50] sm:$0xff]   ;;  %v5939_v52 = vld [vmem:[#allocation13 + $0x68] sm:$0xff]  }
 0x634   :  { %v1048_v30 = vmul.f32 %v1047_v40, %v1026_v39  ;;  %5515 = vmatprep.subr.bf16.mxu0 %v6765_v9  ;;  %vm7416_vm4 = vcmp.lt.s32.totalorder %v1422_v19, 7  ;;  %vm7438_vm11 = vcmp.ge.s32.totalorder %v1422_v19, 1  ;;  %v5920_v11 = vld [vmem:[#allocation12 + $0x90] sm:$0xff]   ;;  %v5933_v19 = vld [vmem:[#allocation13 + $0x38] sm:$0xff]  }
 0x636   :  { %v1049_v33 = vpack.c.bf16 %v1048_v30, %v1048_v30 }
 0x637   :  { %5516 = vmatpush3.bf16.msra.mxu0 %v5905_v61  ;;  %v5913_v61 = vld [vmem:[#allocation12 + $0x58] sm:$0xff]  }
 0x638   :  { %5475 = vmatmul.mubr.msk.bf16.vlgmr.msra.gmra.mrb[8].mxu1 %vm806_vm10, %v1049_v33  ;;  %5517 = vmatprep.subr.bf16.mxu0 %v6765_v9 }
 0x639   :  { %5708 = vmatpush3.bf16.msra.mxu1 %v5707_v41  ;;  %5494 = vmatprep.mubr.msk.f32.mxu1 %vm6764_vm1, %v6765_v9  ;;  %v5938_v41 = vld [vmem:[#allocation13 + $0x60] sm:$0xff]  }
 0x63a   :  { %5709 = vmatprep.subr.bf16.mxu1 %v6763_v6 }
 0x63b   :  { %5518 = vmatpush3.bf16.msra.mxu0 %v5906_v58  ;;  %v5914_v58 = vld [vmem:[#allocation12 + $0x60] sm:$0xff]  }
 0x63c   :  { %5519 = vmatprep.subr.bf16.mxu0 %v6765_v9 }
 0x63d   :  { %5711 = vmatpush3.bf16.msra.mxu1 %v5710_v26 }
 0x63e   :  { %5712 = vmatprep.subr.bf16.mxu1 %v6763_v6 }
 0x63f   :  { %5520 = vmatpush3.bf16.msra.mxu0 %v5907_v62  ;;  %v5915_v62 = vld [vmem:[#allocation12 + $0x68] sm:$0xff]  }
 0x640   :  { %5521 = vmatprep.subr.bf16.mxu0 %v6765_v9 }
 0x641   :  { %5714 = vmatpush3.bf16.msra.mxu1 %v5713_v51 }
 0x642   :  { %5715 = vmatprep.subr.bf16.mxu1 %v6763_v6 }
 0x643   :  { %5522 = vmatpush3.bf16.msra.mxu0 %v5908_v5  ;;  %v5931_v5 = vld [vmem:[#allocation13 + $0x28] sm:$0xff]  }
 0x644   :  { %5523 = vmatprep.subr.bf16.mxu0 %v6765_v9 }
 0x645   :  { %5717 = vmatpush3.bf16.msra.mxu1 %v5716_v54 }
 0x647   :  { %5524 = vmatpush3.bf16.msra.mxu0 %v5909_v18  ;;  %v5932_v18 = vld [vmem:[#allocation13 + $0x30] sm:$0xff]  }
 0x648   :  { %5495 = vmatmul.mubr.msk.f32.vlgmr.msra.gmra.mrb[6].mxu1 %vm806_vm10, %v1026_v39  ;;  %5529 = vmatprep.subr.bf16.mxu0 %v6765_v9  ;;  %vm1625_vm10 = vcmp.lt.s32.totalorder %v7124_v3, 7 }
 0x649   :  { %5499 = vmatprep.mubr.msk.f32.mxu1 %vm1215_vm15, %v7385_v56 }
 0x70b   :  { %v1126_v0 = vpop.f32.mrb[8].mxu1 }
 0x70c   :  { %v5476_v1 = vpop.f32.mrb[9].mxu1  ;;  %v1127_v17 = vadd.f32 %v4859_v38, %v1126_v0  ;;  %v5916_v0 = vld [vmem:[#allocation12 + $0x70] sm:$0xff]   ;;  %v5925_v38 = vld [vmem:[#allocation12 + $0xb8] sm:$0xff]  }
 0x70d   :  { %v1129_v2 = vpop.f32.mrb[10].mxu1  ;;  %v5917_v1 = vld [vmem:[#allocation12 + $0x78] sm:$0xff]  }
 0x70e   :  { %v5477_v7 = vpop.f32.mrb[11].mxu1  ;;  %v5918_v2 = vld [vmem:[#allocation12 + $0x80] sm:$0xff]  }
 0x70f   :  { %v5919_v7 = vld [vmem:[#allocation12 + $0x88] sm:$0xff]  }
 0x71b   :  { %v1209_v13 = vpop.f32.mrb[6].mxu1 }
 0x71c   :  { %v5496_v16 = vpop.f32.mrb[7].mxu1  ;;  %5497 = vmatprep.subr.mxu1 %v1209_v13 }
 0x71d   :  { %5498 = vmatpush3.msra.mxu1 %v1209_v13  ;;  %v5922_v13 = vld [vmem:[#allocation12 + $0xa0] sm:$0xff]   ;;  %v5924_v16 = vld [vmem:[#allocation12 + $0xb0] sm:$0xff]  }
 0x71e   :  { %5500 = vmatmul.mubr.msk.f32.vlgmr.msra.gmra.mrb[12].mxu1 %vm1215_vm15, %v7396_v43  ;;  %5718 = vmatprep.subr.bf16.mxu1 %v6763_v6  ;;  %v7412_v6 = vadd.s32 8, %v7124_v3 }
 0x71f   :  { %5721 = vmatpush3.bf16.msk.msra.mxu1 %vm5720_vm2, %v5719_v14  ;;  %5506 = vmatprep.mubr.msk.f32.mxu1 %vm6764_vm1, %v6765_v9  ;;  %v5923_v14 = vld [vmem:[#allocation12 + $0xa8] sm:$0xff]  }
 0x720   :  { %5569 = vmatprep.subr.bf16.mxu1 %v6765_v9  ;;  %v1423_v45 = vand.u32 7, %v7412_v6 }
 0x722   :  { %5507 = vmatmul.mubr.msk.f32.vlgmr.msra.gmra.mrb[14].mxu1 %vm1299_vm3, %v1127_v17  ;;  %vm7420_vm5 = vcmp.lt.s32.totalorder %v1423_v45, 7  ;;  %vm7442_vm12 = vcmp.ge.s32.totalorder %v1423_v45, 1  ;;  %v5930_v17 = vld [vmem:[#allocation13 + $0x20] sm:$0xff]   ;;  %v5950_v45 = vld [vmem:[%s8030_s25] sm:$0xff]   ;;  %vm2584_vm3 = vcmask 195584  }
 0x723   :  { %5585 = vmatprep.mubr.msk.bf16.mxu1 %vm6764_vm1, %v6765_v9  ;;  %vm4897_vm8 = vmpackc.low %vm7420_vm5, %vm7416_vm4  ;;  %5570 = vmatpush3.bf16.msra.mxu1 %v5926_v22  ;;  %v5951_v22 = vld [vmem:[%s8030_s25 + $0x8] sm:$0xff]  }
 0x724   :  { %5571 = vmatprep.subr.bf16.mxu1 %v6765_v9  ;;  %vm4878_vm13 = vmpackc.low %vm7442_vm12, %vm7438_vm11 }
 0x727   :  { %5572 = vmatpush3.bf16.msra.mxu1 %v5927_v23  ;;  %v5952_v23 = vld [vmem:[%s8030_s25 + $0x10] sm:$0xff]  }
 0x728   :  { %5573 = vmatprep.subr.bf16.mxu1 %v6765_v9 }
 0x72b   :  { %5574 = vmatpush3.bf16.msra.mxu1 %v5928_v24  ;;  %v5953_v24 = vld [vmem:[%s8030_s25 + $0x18] sm:$0xff]  }
 0x72c   :  { %5575 = vmatprep.subr.bf16.mxu1 %v6765_v9 }
 0x72f   :  { %5576 = vmatpush3.bf16.msra.mxu1 %v5929_v25  ;;  %v5954_v25 = vld [vmem:[%s8030_s25 + $0x20] sm:$0xff]  }
 0x730   :  { %5577 = vmatprep.subr.bf16.mxu1 %v6765_v9 }
 0x733   :  { %5578 = vmatpush3.bf16.msra.mxu1 %v5930_v17  ;;  %v5937_v17 = vld [vmem:[#allocation13 + $0x58] sm:$0xff]  }
 0x734   :  { %5579 = vmatprep.subr.bf16.mxu1 %v6765_v9 }
 0x737   :  { %5580 = vmatpush3.bf16.msra.mxu1 %v5931_v5  ;;  %v5940_v5 = vld [vmem:[#allocation13 + $0x70] sm:$0xff]  }
 0x738   :  { %5581 = vmatprep.subr.bf16.mxu1 %v6765_v9 }
 0x73b   :  { %5582 = vmatpush3.bf16.msra.mxu1 %v5932_v18  ;;  %v5941_v18 = vld [vmem:[#allocation13 + $0x78] sm:$0xff]  }
 0x73c   :  { %5583 = vmatprep.subr.bf16.mxu1 %v6765_v9 }
 0x73f   :  { %5584 = vmatpush3.bf16.msra.mxu1 %v5933_v19  ;;  %v5942_v19 = vld [vmem:[#allocation13 + $0x80] sm:$0xff]  }
 0x740   :  { %5589 = vmatprep.subr.bf16.mxu1 %v6765_v9 }
 0x7f1   :  { %v5501_v32 = vpop.f32.mrb[12].mxu1 }
 0x7f2   :  { %v1397_v36 = vmul.f32 %v5501_v32, %v1395_v28  ;;  %v1288_v37 = vpop.f32.mrb[13].mxu1  ;;  %v1763_v28 = vrot.slane %v7339_v15, %v7134_v8 }
 0x7f3   :  { %v1396_v39 = vmul.f32 %v1391_v34, %v1288_v37  ;;  %v1770_v34 = vld [vmem:[#allocation19] sm:$0xff] }
 0x7f4   :  { %v1417_v40 = vrot.slane %v1397_v36, 7  ;;  %v1624_v30 = vrot.slane %v1397_v36, 1 }
 0x7f5   :  { %v1398_v33 = vpack.c.bf16 %v1397_v36, %v1396_v39  ;;  %v1416_v42 = vrot.slane %v1396_v39, 7  ;;  %v1623_v60 = vrot.slane %v1396_v39, 1  ;;  %v7446_v46 = vpop.f32.mrb[14].mxu1  ;;  %v1767_v39 = vrot.slane %v7339_v15, %v7137_v10 }
 0x7f6   :  { %v5508_v26 = vpop.f32.mrb[15].mxu1  ;;  %v1796_v15 = vrot.slane %v7307_v55, %v7137_v10 }
 0x7f7   :  { %v1419_v49 = vsel %vm1418_vm9, %v1416_v42, %v1417_v40  ;;  %v1420_v48 = vsel %vm1418_vm9, %v1417_v40, %v1416_v42  ;;  %v1626_v51 = vsel %vm1625_vm10, %v1623_v60, %v1624_v30  ;;  %v1627_v50 = vsel %vm1625_vm10, %v1624_v30, %v1623_v60  ;;  %v1771_v30 = vld [vmem:[#allocation19 + $0x8] sm:$0xff] }
 0x7f8   :  { %v4879_v54 = vpack.c.bf16 %v1419_v49, %v1420_v48  ;;  %v4898_v57 = vpack.c.bf16 %v1627_v50, %v1626_v51  ;;  %v1792_v51 = vrot.slane %v7307_v55, %v7134_v8 }
 0x7fa   :  { %5526 = vmatmul.mubr.msk.bf16.vlgmr.msra.gmra.mrb[8].mxu0 %vm4878_vm13, %v4879_v54 }
 0x7fb   :  { %5530 = vmatpush3.bf16.msra.mxu0 %v5910_v53  ;;  %5545 = vmatprep.mubr.msk.bf16.mxu0 %vm6764_vm1, %v6765_v9 }
 0x7fc   :  { %5531 = vmatprep.subr.bf16.mxu0 %v6765_v9 }
 0x7ff   :  { %5532 = vmatpush3.bf16.msra.mxu0 %v5911_v59 }
 0x800   :  { %5533 = vmatprep.subr.bf16.mxu0 %v6765_v9 }
 0x803   :  { %5534 = vmatpush3.bf16.msra.mxu0 %v5912_v63 }
 0x804   :  { %5535 = vmatprep.subr.bf16.mxu0 %v6765_v9 }
 0x807   :  { %5536 = vmatpush3.bf16.msra.mxu0 %v5913_v61 }
 0x808   :  { %5537 = vmatprep.subr.bf16.mxu0 %v6765_v9 }
 0x80b   :  { %5538 = vmatpush3.bf16.msra.mxu0 %v5914_v58 }
 0x80c   :  { %5539 = vmatprep.subr.bf16.mxu0 %v6765_v9 }
 0x80f   :  { %5540 = vmatpush3.bf16.msra.mxu0 %v5915_v62 }
 0x810   :  { %5541 = vmatprep.subr.bf16.mxu0 %v6765_v9 }
 0x813   :  { %5542 = vmatpush3.bf16.msra.mxu0 %v5916_v0 }
 0x814   :  { %5543 = vmatprep.subr.bf16.mxu0 %v6765_v9 }
 0x817   :  { %5544 = vmatpush3.bf16.msra.mxu0 %v5917_v1 }
 0x818   :  { %5549 = vmatprep.subr.bf16.mxu0 %v6765_v9 }
 0x81a   :  { %5546 = vmatmul.mubr.bf16.vlgmr.msra.gmra.mrb[8].mxu0 %v1398_v33 }
 0x81b   :  { %5550 = vmatpush3.bf16.msra.mxu0 %v5918_v2  ;;  %5565 = vmatprep.mubr.msk.bf16.mxu0 %vm6764_vm1, %v6765_v9 }
 0x81c   :  { %5551 = vmatprep.subr.bf16.mxu0 %v6765_v9 }
 0x81f   :  { %5552 = vmatpush3.bf16.msra.mxu0 %v5919_v7 }
 0x820   :  { %5553 = vmatprep.subr.bf16.mxu0 %v6765_v9 }
 0x823   :  { %5554 = vmatpush3.bf16.msra.mxu0 %v5920_v11  ;;  %v5934_v11 = vld [vmem:[#allocation13 + $0x40] sm:$0xff]  }
 0x824   :  { %5555 = vmatprep.subr.bf16.mxu0 %v6765_v9 }
 0x827   :  { %5556 = vmatpush3.bf16.msra.mxu0 %v5921_v44 }
 0x828   :  { %5557 = vmatprep.subr.bf16.mxu0 %v6765_v9 }
 0x82b   :  { %5558 = vmatpush3.bf16.msra.mxu0 %v5922_v13 }
 0x82c   :  { %5559 = vmatprep.subr.bf16.mxu0 %v6765_v9 }
 0x82f   :  { %5560 = vmatpush3.bf16.msra.mxu0 %v5923_v14 }
 0x830   :  { %5561 = vmatprep.subr.bf16.mxu0 %v6765_v9 }
 0x833   :  { %5562 = vmatpush3.bf16.msra.mxu0 %v5924_v16  ;;  %v5935_v16 = vld [vmem:[#allocation13 + $0x48] sm:$0xff]  }
 0x834   :  { %5563 = vmatprep.subr.bf16.mxu0 %v6765_v9 }
 0x837   :  { %5564 = vmatpush3.bf16.msra.mxu0 %v5925_v38  ;;  %v5936_v38 = vld [vmem:[#allocation13 + $0x50] sm:$0xff]  }
 0x838   :  { %5629 = vmatprep.subr.bf16.mxu0 %v6765_v9 }
 0x83a   :  { %5566 = vmatmul.mubr.msk.bf16.vlgmr.msra.gmra.mrb[8].mxu0 %vm4897_vm8, %v4898_v57 }
 0x83b   :  { %5645 = vmatprep.mubr.msk.bf16.mxu0 %vm6764_vm1, %v6765_v9  ;;  %5630 = vmatpush3.bf16.msra.mxu0 %v5950_v45  ;;  %v5943_v45 = vld [vmem:[#allocation13 + $0x88] sm:$0xff]  }
 0x83c   :  { %5631 = vmatprep.subr.bf16.mxu0 %v6765_v9 }
 0x83f   :  { %5632 = vmatpush3.bf16.msra.mxu0 %v5951_v22  ;;  %v5944_v22 = vld [vmem:[#allocation13 + $0x90] sm:$0xff]  }
 0x840   :  { %5633 = vmatprep.subr.bf16.mxu0 %v6765_v9 }
 0x843   :  { %5634 = vmatpush3.bf16.msra.mxu0 %v5952_v23  ;;  %v5945_v23 = vld [vmem:[#allocation13 + $0x98] sm:$0xff]  }
 0x844   :  { %5635 = vmatprep.subr.bf16.mxu0 %v6765_v9 }
 0x847   :  { %5636 = vmatpush3.bf16.msra.mxu0 %v5953_v24  ;;  %v5946_v24 = vld [vmem:[#allocation13 + $0xa0] sm:$0xff]  }
 0x848   :  { %5637 = vmatprep.subr.bf16.mxu0 %v6765_v9 }
 0x84b   :  { %5638 = vmatpush3.bf16.msra.mxu0 %v5954_v25  ;;  %v5947_v25 = vld [vmem:[#allocation13 + $0xa8] sm:$0xff]  }
 0x84c   :  { %5639 = vmatprep.subr.bf16.mxu0 %v6765_v9 }
 0x90d   :  { %v1732_v32 = vpop.f32.mrb[8].mxu0 }
 0x90e   :  { %v1768_v36 = vmul.f32 %v1763_v28, %v1732_v32  ;;  %v5567_v37 = vpop.f32.mrb[9].mxu0  ;;  %v5948_v28 = vld [vmem:[#allocation13 + $0xb0] sm:$0xff]   ;;  %v5949_v32 = vld [vmem:[#allocation13 + $0xb8] sm:$0xff]  }
 0x90f   :  { %v1735_v40 = vpop.f32.mrb[10].mxu0 }
 0x910   :  { %v1772_v33 = vadd.f32 %v1770_v34, %v1768_v36  ;;  %v1769_v42 = vmul.f32 %v1767_v39, %v1735_v40  ;;  %v5568_v60 = vpop.f32.mrb[11].mxu0  ;;  %v2368_v34 = vld [vmem:[%s8031_s6 + $0x8] sm:$0xff]  ;;  %v2370_v36 = vld [vmem:[%s8031_s6 + $0x18] sm:$0xff]  ;;  %v2367_v39 = vld [vmem:[%s8031_s6] sm:$0xff] }
 0x911   :  { %v5722_v37 = vpack.c.bf16 %v2370_v36, %v2368_v34  ;;  %v2369_v40 = vld [vmem:[%s8031_s6 + $0x10] sm:$0xff]  ;;  %v2371_v60 = vld [vmem:[%s8031_s6 + $0x20] sm:$0xff] }
 0x912   :  { %vm1774_vm14 = vcmp.ge.f32.partialorder %v1772_v33, 0.0  ;;  %v1776_v26 = vmul.f32 1.4142135, %v1772_v33  ;;  %v1778_v49 = vmul.f32 0.28284273, %v1772_v33  ;;  %v1773_v48 = vadd.f32 %v1771_v30, %v1769_v42  ;;  %v2372_v30 = vld [vmem:[%s8031_s6 + $0x28] sm:$0xff] }
 0x913   :  { %v2374_v33 = vld [vmem:[%s8031_s6 + $0x38] sm:$0xff]  ;;  %v5724_v42 = vpack.c.bf16 %v2369_v40, %v2367_v39  ;;  %v2150_v36 = vld [vmem:[#allocation21] sm:$0xff]  ;;  %v2147_v40 = vrot.slane %v7368_v35, %v7137_v10 }
 0x914   :  { %v1780_v50 = vsel %vm1774_vm14, %v1776_v26, %v1778_v49  ;;  %vm1775_vm2 = vcmp.ge.f32.partialorder %v1773_v48, 0.0  ;;  %v1777_v53 = vmul.f32 1.4142135, %v1773_v48  ;;  %v1779_v54 = vmul.f32 0.28284273, %v1773_v48  ;;  %v2376_v26 = vld [vmem:[%s8031_s6 + $0x48] sm:$0xff] }
 0x915   :  { %v1797_v57 = vmul.f32 %v1792_v51, %v1780_v50  ;;  %v5726_v21 = vpack.c.bf16 %v2374_v33, %v2372_v30  ;;  %v2378_v49 = vld [vmem:[%s8031_s6 + $0x58] sm:$0xff]  ;;  %v2375_v48 = vld [vmem:[%s8031_s6 + $0x40] sm:$0xff]  ;;  %v2377_v51 = vld [vmem:[%s8031_s6 + $0x50] sm:$0xff] }
 0x916   :  { %v1781_v59 = vsel %vm1775_vm2, %v1777_v53, %v1779_v54  ;;  %v2380_v50 = vld [vmem:[%s8031_s6 + $0x68] sm:$0xff]  ;;  %v2382_v53 = vld [vmem:[%s8031_s6 + $0x78] sm:$0xff]  ;;  %v5732_v54 = vpack.c.bf16 %v2377_v51, %v2375_v48 }
 0x917   :  { %v1798_v63 = vmul.f32 %v1796_v15, %v1781_v59  ;;  %v1817_v61 = vrot.slane %v1797_v57, 7  ;;  %v2018_v58 = vrot.slane %v1797_v57, 1  ;;  %v2381_v15 = vld [vmem:[%s8031_s6 + $0x70] sm:$0xff]  ;;  %v2384_v59 = vld [vmem:[%s8031_s6 + $0x88] sm:$0xff] }
 0x918   :  { %v2151_v33 = vld [vmem:[#allocation21 + $0x8] sm:$0xff] }
 0x919   :  { %v1818_v62 = vrot.slane %v1798_v63, 7  ;;  %v2019_v0 = vrot.slane %v1798_v63, 1  ;;  %v1799_v1 = vpack.c.bf16 %v1798_v63, %v1797_v57  ;;  %v2379_v57 = vld [vmem:[%s8031_s6 + $0x60] sm:$0xff]  ;;  %v2386_v63 = vld [vmem:[%s8031_s6 + $0x98] sm:$0xff] }
 0x91b   :  { %v1819_v2 = vsel %vm1418_vm9, %v1817_v61, %v1818_v62  ;;  %v1820_v7 = vsel %vm1418_vm9, %v1818_v62, %v1817_v61  ;;  %v2020_v44 = vsel %vm1625_vm10, %v2018_v58, %v2019_v0  ;;  %v2021_v55 = vsel %vm1625_vm10, %v2019_v0, %v2018_v58  ;;  %v2383_v62 = vld [vmem:[%s8031_s6 + $0x80] sm:$0xff]  ;;  %v2385_v0 = vld [vmem:[%s8031_s6 + $0x90] sm:$0xff] }
 0x91c   :  { %v4909_v13 = vpack.c.bf16 %v1819_v2, %v1820_v7  ;;  %v4928_v14 = vpack.c.bf16 %v2021_v55, %v2020_v44  ;;  %v5736_v61 = vpack.c.bf16 %v2381_v15, %v2379_v57  ;;  %v5738_v58 = vpack.c.bf16 %v2386_v63, %v2384_v59  ;;  %v2390_v2 = vld [vmem:[%s8031_s6 + $0xb8] sm:$0xff]  ;;  %v2387_v44 = vld [vmem:[%s8031_s6 + $0xa0] sm:$0xff]  ;;  %v2389_v55 = vld [vmem:[%s8031_s6 + $0xb0] sm:$0xff] }
 0x91d   :  { %v5740_v7 = vpack.c.bf16 %v2385_v0, %v2383_v62  ;;  %v2581_v59 = vld [vmem:[#allocation30] sm:$0xff]  ;;  %v2582_v63 = vld [vmem:[#allocation30 + $0x8] sm:$0xff] }
 0x91e   :  { %5586 = vmatmul.mubr.msk.bf16.vlgmr.msra.gmra.mrb[16].mxu1 %vm4878_vm13, %v4909_v13  ;;  %v5744_v13 = vpack.c.bf16 %v2389_v55, %v2387_v44  ;;  %v5960_v55 = vld [vmem:[#allocation15 + $0x4] ss:$8 sps:$4 sm:$0xff]  }
 0x91f   :  { %5590 = vmatpush3.bf16.msra.mxu1 %v5934_v11  ;;  %5605 = vmatprep.mubr.msk.bf16.mxu1 %vm6764_vm1, %v6765_v9 }
 0x920   :  { %5591 = vmatprep.subr.bf16.mxu1 %v6765_v9 }
 0x923   :  { %5592 = vmatpush3.bf16.msra.mxu1 %v5935_v16  ;;  %v2394_v16 = vld [vmem:[%s8031_s6 + $0xd8] sm:$0xff] }
 0x924   :  { %5593 = vmatprep.subr.bf16.mxu1 %v6765_v9 }
 0x927   :  { %5594 = vmatpush3.bf16.msra.mxu1 %v5936_v38 }
 0x928   :  { %5595 = vmatprep.subr.bf16.mxu1 %v6765_v9 }
 0x92b   :  { %5596 = vmatpush3.bf16.msra.mxu1 %v5937_v17  ;;  %v2391_v17 = vld [vmem:[%s8031_s6 + $0xc0] sm:$0xff] }
 0x92c   :  { %5597 = vmatprep.subr.bf16.mxu1 %v6765_v9 }
 0x92f   :  { %5598 = vmatpush3.bf16.msra.mxu1 %v5938_v41  ;;  %v2393_v41 = vld [vmem:[%s8031_s6 + $0xd0] sm:$0xff] }
 0x930   :  { %5599 = vmatprep.subr.bf16.mxu1 %v6765_v9 }
 0x933   :  { %5600 = vmatpush3.bf16.msra.mxu1 %v5939_v52  ;;  %v5748_v52 = vpack.c.bf16 %v2393_v41, %v2391_v17 }
 0x934   :  { %5601 = vmatprep.subr.bf16.mxu1 %v6765_v9 }
 0x937   :  { %5602 = vmatpush3.bf16.msra.mxu1 %v5940_v5  ;;  %v5955_v5 = vld [vmem:[%s8030_s25 + $0x28] sm:$0xff]  }
 0x938   :  { %5603 = vmatprep.subr.bf16.mxu1 %v6765_v9  ;;  %5640 = vmatpush3.bf16.msra.mxu0 %v5955_v5  ;;  %v5958_v5 = vld [vmem:[#allocation15] ss:$8 sps:$4 sm:$0xff]  }
 0x939   :  { %5641 = vmatprep.subr.bf16.mxu0 %v6765_v9 }
 0x93b   :  { %5604 = vmatpush3.bf16.msra.mxu1 %v5941_v18  ;;  %v2396_v18 = vld [vmem:[%s8031_s6 + $0xe8] sm:$0xff] }
 0x93c   :  { %5609 = vmatprep.subr.bf16.mxu1 %v6765_v9 }
 0x93e   :  { %5606 = vmatmul.mubr.bf16.vlgmr.msra.gmra.mrb[16].mxu1 %v1799_v1  ;;  %v2388_v1 = vld [vmem:[%s8031_s6 + $0xa8] sm:$0xff] }
 0x93f   :  { %5610 = vmatpush3.bf16.msra.mxu1 %v5942_v19  ;;  %5625 = vmatprep.mubr.msk.bf16.mxu1 %vm6764_vm1, %v6765_v9  ;;  %v5742_v11 = vpack.c.bf16 %v2390_v2, %v2388_v1  ;;  %v2398_v19 = vld [vmem:[%s8031_s6 + $0xf8] sm:$0xff]  ;;  %v4930_v1 = vld [vmem:[%s8032_s11] ss:$0 sm:$0xff] }
 0x940   :  { %5611 = vmatprep.subr.bf16.mxu1 %v6765_v9 }
 0x943   :  { %5612 = vmatpush3.bf16.msra.mxu1 %v5943_v45  ;;  %v5750_v45 = vpack.c.bf16 %v2398_v19, %v2396_v18  ;;  %v5963_v19 = vld [vmem:[#allocation15 + $0x14] ss:$8 sps:$4 sm:$0xff]  }
 0x944   :  { %5613 = vmatprep.subr.bf16.mxu1 %v6765_v9 }
 0x947   :  { %5614 = vmatpush3.bf16.msra.mxu1 %v5944_v22  ;;  %v2395_v22 = vld [vmem:[%s8031_s6 + $0xe0] sm:$0xff] }
 0x948   :  { %5615 = vmatprep.subr.bf16.mxu1 %v6765_v9 }
 0x94b   :  { %5616 = vmatpush3.bf16.msra.mxu1 %v5945_v23  ;;  %v2397_v23 = vld [vmem:[%s8031_s6 + $0xf0] sm:$0xff] }
 0x94c   :  { %5617 = vmatprep.subr.bf16.mxu1 %v6765_v9 }
 0x94f   :  { %5618 = vmatpush3.bf16.msra.mxu1 %v5946_v24  ;;  %v5752_v24 = vpack.c.bf16 %v2397_v23, %v2395_v22  ;;  %v5961_v22 = vld [vmem:[#allocation15 + $0x10] ss:$8 sps:$4 sm:$0xff]   ;;  %v5966_v23 = vld [vmem:[#allocation15 + $0x24] ss:$8 sps:$4 sm:$0xff]  }
 0x950   :  { %5619 = vmatprep.subr.bf16.mxu1 %v6765_v9 }
 0x953   :  { %5620 = vmatpush3.bf16.msra.mxu1 %v5947_v25  ;;  %v5956_v25 = vld [vmem:[%s8030_s25 + $0x30] sm:$0xff]  }
 0x954   :  { %5621 = vmatprep.subr.bf16.mxu1 %v6765_v9  ;;  %5642 = vmatpush3.bf16.msra.mxu0 %v5956_v25  ;;  %v5964_v25 = vld [vmem:[#allocation15 + $0x20] ss:$8 sps:$4 sm:$0xff]  }
 0x955   :  { %5643 = vmatprep.subr.bf16.mxu0 %v6765_v9 }
 0x957   :  { %5622 = vmatpush3.bf16.msra.mxu1 %v5948_v28  ;;  %v5957_v28 = vld [vmem:[%s8030_s25 + $0x38] sm:$0xff]  }
 0x958   :  { %5623 = vmatprep.subr.bf16.mxu1 %v6765_v9  ;;  %5644 = vmatpush3.bf16.msra.mxu0 %v5957_v28  ;;  %v5969_v28 = vld [vmem:[#allocation15 + $0x34] ss:$8 sps:$4 sm:$0xff]  }
 0x95b   :  { %5624 = vmatpush3.bf16.msra.mxu1 %v5949_v32  ;;  %v2143_v32 = vrot.slane %v7368_v35, %v7134_v8  ;;  %v2176_v35 = vrot.slane %v7300_v47, %v7137_v10 }
 0x95c   :  { %5649 = vmatprep.subr.mxu1 %v7446_v46 }
 0x95e   :  { %5626 = vmatmul.mubr.msk.bf16.vlgmr.msra.gmra.mrb[16].mxu1 %vm4897_vm8, %v4928_v14  ;;  %v2392_v14 = vld [vmem:[%s8031_s6 + $0xc8] sm:$0xff] }
 0x95f   :  { %5650 = vmatpush3.msra.mxu1 %v7446_v46  ;;  %5651 = vmatprep.mubr.msk.f32.mxu1 %vm1215_vm15, %v7385_v56  ;;  %v5728_v56 = vpack.c.bf16 %v2373_v20, %v2371_v60  ;;  %v5730_v46 = vpack.c.bf16 %v2378_v49, %v2376_v26  ;;  %v5746_v38 = vpack.c.bf16 %v2394_v16, %v2392_v14 }
 0x960   :  { %5723 = vmatprep.subr.bf16.mxu1 %v5722_v37 }
 0x966   :  { %5652 = vmatmul.mubr.msk.f32.vlgmr.msra.gmra.mrb[20].mxu1 %vm1215_vm15, %v7396_v43  ;;  %v5734_v43 = vpack.c.bf16 %v2382_v53, %v2380_v50 }
 0x967   :  { %5725 = vmatpush1.bf16.msra.mxu1 %v5724_v42  ;;  %2463 = vmatprep.mubr.f32.mxu1 %v6765_v9 }
 0x968   :  { %5727 = vmatprep.subr.bf16.mxu1 %v5726_v21 }
 0x96b   :  { %5729 = vmatpush1.bf16.msra.mxu1 %v5728_v56  ;;  %v2172_v56 = vrot.slane %v7300_v47, %v7134_v8 }
 0x96c   :  { %5731 = vmatprep.subr.bf16.mxu1 %v5730_v46 }
 0x96f   :  { %5733 = vmatpush1.bf16.msra.mxu1 %v5732_v54 }
 0x970   :  { %5735 = vmatprep.subr.bf16.mxu1 %v5734_v43 }
 0x973   :  { %5737 = vmatpush1.bf16.msra.mxu1 %v5736_v61  ;;  %v5758_v61 = vpack.c.bf16 %v2582_v63, %v2581_v59  ;;  %v6008_v59 = vld [vmem:[#allocation15 + $0x104] ss:$8 sps:$4 sm:$0xff]   ;;  %v2676_v63 = vrot.slane %v7361_v31, %v7134_v8 }
 0x974   :  { %5739 = vmatprep.subr.bf16.mxu1 %v5738_v58  ;;  %v2583_v58 = vld [vmem:[#allocation30 + $0x10] sm:$0xff] }
 0x977   :  { %5741 = vmatpush1.bf16.msra.mxu1 %v5740_v7 }
 0x978   :  { %5743 = vmatprep.subr.bf16.mxu1 %v5742_v11 }
 0x97b   :  { %5745 = vmatpush1.bf16.msra.mxu1 %v5744_v13 }
 0x97c   :  { %5747 = vmatprep.subr.bf16.mxu1 %v5746_v38 }
 0x97f   :  { %5749 = vmatpush1.bf16.msra.mxu1 %v5748_v52  ;;  %v2476_v52 = vld [vmem:[%s6920_s27] sm:$0xff] }
 0x980   :  { %5751 = vmatprep.subr.bf16.mxu1 %v5750_v45  ;;  %v2477_v45 = vld [vmem:[%s6920_s27 + $0x8] sm:$0xff] }
 0x983   :  { %5753 = vmatpush1.bf16.msra.mxu1 %v5752_v24  ;;  %v2478_v24 = vld [vmem:[%s6920_s27 + $0x10] sm:$0xff] }
 0x984   :  { %5759 = vmatprep.subr.bf16.mxu1 %v5758_v61 }
 0xa31   :  { %v2124_v34 = vpop.f32.mrb[16].mxu1 }
 0xa32   :  { %v2148_v37 = vmul.f32 %v2143_v32, %v2124_v34  ;;  %v5627_v39 = vpop.f32.mrb[17].mxu1  ;;  %v2479_v32 = vld [vmem:[%s6920_s27 + $0x18] sm:$0xff] }
 0xa33   :  { %v2127_v30 = vpop.f32.mrb[18].mxu1  ;;  %v5967_v34 = vld [vmem:[#allocation15 + $0x30] ss:$8 sps:$4 sm:$0xff]   ;;  %v5975_v39 = vld [vmem:[#allocation15 + $0x54] ss:$8 sps:$4 sm:$0xff]  }
 0xa34   :  { %v2152_v42 = vadd.f32 %v2150_v36, %v2148_v37  ;;  %v2149_v21 = vmul.f32 %v2147_v40, %v2127_v30  ;;  %v5628_v60 = vpop.f32.mrb[19].mxu1  ;;  %v5972_v36 = vld [vmem:[#allocation15 + $0x44] ss:$8 sps:$4 sm:$0xff]   ;;  %v5970_v37 = vld [vmem:[#allocation15 + $0x40] ss:$8 sps:$4 sm:$0xff]  }
 0xa35   :  { %v5973_v40 = vld [vmem:[#allocation15 + $0x50] ss:$8 sps:$4 sm:$0xff]   ;;  %v5978_v30 = vld [vmem:[#allocation15 + $0x64] ss:$8 sps:$4 sm:$0xff]   ;;  %v5982_v60 = vld [vmem:[#allocation15 + $0x80] ss:$8 sps:$4 sm:$0xff]  }
 0xa36   :  { %v2156_v20 = vmul.f32 1.4142135, %v2152_v42  ;;  %v2158_v26 = vmul.f32 0.28284273, %v2152_v42  ;;  %v2153_v49 = vadd.f32 %v2151_v33, %v2149_v21  ;;  %vm2154_vm1 = vcmp.ge.f32.partialorder %v2152_v42, 0.0 }
 0xa37   :  { %v5976_v33 = vld [vmem:[#allocation15 + $0x60] ss:$8 sps:$4 sm:$0xff]   ;;  %v5981_v42 = vld [vmem:[#allocation15 + $0x74] ss:$8 sps:$4 sm:$0xff]   ;;  %v5984_v21 = vld [vmem:[#allocation15 + $0x84] ss:$8 sps:$4 sm:$0xff]  }
 0xa38   :  { %v2160_v46 = vsel %vm2154_vm1, %v2156_v20, %v2158_v26  ;;  %vm2155_vm15 = vcmp.ge.f32.partialorder %v2153_v49, 0.0  ;;  %v2157_v48 = vmul.f32 1.4142135, %v2153_v49  ;;  %v2159_v51 = vmul.f32 0.28284273, %v2153_v49 }
 0xa39   :  { %v2177_v50 = vmul.f32 %v2172_v56, %v2160_v46  ;;  %2464 = vmatmul.mubr.f32.vlgmr.msra.gmra.mrb[22].mxu1 %v2160_v46  ;;  %v5653_v53 = vpop.f32.mrb[20].mxu1  ;;  %v5987_v20 = vld [vmem:[#allocation15 + $0x94] ss:$8 sps:$4 sm:$0xff]   ;;  %v5985_v26 = vld [vmem:[#allocation15 + $0x90] ss:$8 sps:$4 sm:$0xff]  }
 0xa3a   :  { %2469 = vmatprep.mubr.f32.mxu1 %v6765_v9  ;;  %v2161_v54 = vsel %vm2155_vm15, %v2157_v48, %v2159_v51  ;;  %v2358_v43 = vpop.f32.mrb[21].mxu1  ;;  %5761 = vmatpush3.bf16.msra.mxu1 %v5758_v61  ;;  %v5990_v49 = vld [vmem:[#allocation15 + $0xa4] ss:$8 sps:$4 sm:$0xff]   ;;  %v5988_v56 = vld [vmem:[#allocation15 + $0xa0] ss:$8 sps:$4 sm:$0xff]  }
 0xa3b   :  { %v2178_v57 = vmul.f32 %v2176_v35, %v2161_v54  ;;  %5658 = vmatprep.subr.mxu1 %v2583_v58  ;;  %v5991_v46 = vld [vmem:[#allocation15 + $0xb0] ss:$8 sps:$4 sm:$0xff]   ;;  %v5993_v48 = vld [vmem:[#allocation15 + $0xb4] ss:$8 sps:$4 sm:$0xff]   ;;  %v5994_v51 = vld [vmem:[#allocation15 + $0xc0] ss:$8 sps:$4 sm:$0xff]  }
 0xa3c   :  { %v5997_v35 = vld [vmem:[#allocation15 + $0xd0] ss:$8 sps:$4 sm:$0xff]  }
 0xa3d   :  { %v2179_v15 = vpack.c.bf16 %v2178_v57, %v2177_v50  ;;  %2470 = vmatmul.mubr.f32.gmra.mrb[24].mxu1 %v2161_v54  ;;  %v5996_v50 = vld [vmem:[#allocation15 + $0xc4] ss:$8 sps:$4 sm:$0xff]   ;;  %v6000_v54 = vld [vmem:[#allocation15 + $0xe0] ss:$8 sps:$4 sm:$0xff]   ;;  %v6005_v57 = vld [vmem:[#allocation15 + $0xf4] ss:$8 sps:$4 sm:$0xff]  }
 0xa3e   :  { %5659 = vmatpush3.msra.mxu1 %v2583_v58 }
 0xa3f   :  { %5646 = vmatmul.mubr.bf16.vlgmr.msra.gmra.mrb[12].mxu0 %v2179_v15  ;;  %v6003_v15 = vld [vmem:[#allocation15 + $0xf0] ss:$8 sps:$4 sm:$0xff]  }
 0xa40   :  { %2556 = vmatprep.mubr.f32.mxu0 %v6765_v9 }
 0xb0c   :  { %v2465_v47 = vpop.f32.mrb[22].mxu1 }
 0xb0d   :  { %v2467_v62 = vpop.f32.mrb[23].mxu1 }
 0xb10   :  { %v2471_v0 = vpop.f32.mrb[24].mxu1 }
 0xb11   :  { %v5756_v2 = vpack.c.bf16 %v2471_v0, %v2465_v47  ;;  %v2473_v7 = vpop.f32.mrb[25].mxu1 }
 0xb12   :  { %v5754_v11 = vpack.c.bf16 %v2473_v7, %v2467_v62  ;;  %v2285_v44 = vpop.f32.mrb[12].mxu0 }
 0xb13   :  { %v2286_v13 = vadd.f32 %v4930_v1, %v2285_v44  ;;  %v5647_v14 = vpop.f32.mrb[13].mxu0 }
 0xb14   :  { %v2288_v16 = vpop.f32.mrb[14].mxu0  ;;  %5755 = vmatprep.subr.bf16.mxu0 %v5754_v11 }
 0xb15   :  { %v2359_v38 = vadd.f32 %v2358_v43, %v2286_v13  ;;  %v2289_v17 = vadd.f32 %v4930_v1, %v2288_v16  ;;  %v5648_v41 = vpop.f32.mrb[15].mxu0  ;;  %5757 = vmatpush1.bf16.msra.mxu0 %v5756_v2  ;;  %v6002_v43 = vld [vmem:[#allocation15 + $0xe4] ss:$8 sps:$4 sm:$0xff]  }
 0xb16   :  { %2956 = vmatprep.subr.bf16.mxu0 %v5960_v55  ;;  %v2680_v55 = vrot.slane %v7361_v31, %v7137_v10 }
 0xb17   :  { %v2364_v18 = vadd.f32 %v5653_v53, %v2289_v17  ;;  %5660 = vmatprep.mubr.msk.f32.mxu1 %vm2584_vm3, %v2359_v38  ;;  %v5999_v53 = vld [vmem:[#allocation15 + $0xd4] ss:$8 sps:$4 sm:$0xff]   ;;  %v2742_v38 = vadd.s32 16, %v7124_v3 }
 0xb18   :  { %4941 = vmatmul.mubr.msk.f32.vlgmr.msra.gmra.mrb[2].mxu0 %vm741_vm6, %v2476_v52 }
 0xb19   :  { %5661 = vmatmul.mubr.msk.f32.vlgmr.msra.gmra.mrb[26].mxu1 %vm2584_vm3, %v2364_v18  ;;  %2562 = vmatprep.mubr.f32.mxu0 %v6765_v9 }
 0xb1a   :  { %2957 = vmatpush1.bf16.msra.mxu0 %v5958_v5 }
 0xb1b   :  { %2958 = vmatprep.subr.bf16.mxu0 %v5963_v19 }
 0xb1c   :  { %4942 = vmatmul.mubr.msk.f32.gmra.mrb[16].mxu0 %vm741_vm6, %v2477_v45 }
 0xb1d   :  { %2568 = vmatprep.mubr.f32.mxu0 %v6765_v9 }
 0xb1e   :  { %2959 = vmatpush1.bf16.msra.mxu0 %v5961_v22 }
 0xb1f   :  { %2960 = vmatprep.subr.bf16.mxu0 %v5966_v23 }
 0xb20   :  { %4943 = vmatmul.mubr.msk.f32.gmra.mrb[18].mxu0 %vm741_vm6, %v2478_v24 }
 0xb21   :  { %2574 = vmatprep.mubr.f32.mxu0 %v6765_v9  ;;  %v5979_v9 = vld [vmem:[#allocation15 + $0x70] ss:$8 sps:$4 sm:$0xff]  }
 0xb22   :  { %2961 = vmatpush1.bf16.msra.mxu0 %v5964_v25 }
 0xb23   :  { %2962 = vmatprep.subr.bf16.mxu0 %v5969_v28 }
 0xb24   :  { %4944 = vmatmul.mubr.msk.f32.gmra.mrb[20].mxu0 %vm741_vm6, %v2479_v32  ;;  %v2744_v32 = vand.u32 15, %v7124_v3 }
 0xb26   :  { %2963 = vmatpush1.bf16.msra.mxu0 %v5967_v34  ;;  %vm7671_vm4 = vcmp.ge.s32.totalorder %v2744_v32, 1  ;;  %v6012_v32 = vld [vmem:[#allocation15 + $0x120] ss:$8 sps:$4 sm:$0xff]  }
 0xb27   :  { %2964 = vmatprep.subr.bf16.mxu0 %v5972_v36  ;;  %vm7718_vm8 = vmpackc.low %vm6771_vm0, %vm7671_vm4 }
 0xb2a   :  { %2965 = vmatpush1.bf16.msra.mxu0 %v5970_v37 }
 0xb2b   :  { %2966 = vmatprep.subr.bf16.mxu0 %v5975_v39 }
 0xb2e   :  { %2967 = vmatpush1.bf16.msra.mxu0 %v5973_v40 }
 0xb2f   :  { %2968 = vmatprep.subr.bf16.mxu0 %v5978_v30 }
 0xb32   :  { %2969 = vmatpush1.bf16.msra.mxu0 %v5976_v33 }
 0xb33   :  { %2970 = vmatprep.subr.bf16.mxu0 %v5981_v42 }
 0xb36   :  { %2971 = vmatpush1.bf16.msra.mxu0 %v5979_v9  ;;  %v2746_v9 = vand.u32 15, %v2742_v38 }
 0xb37   :  { %2972 = vmatprep.subr.bf16.mxu0 %v5984_v21 }
 0xb38   :  { %vm7695_vm5 = vcmp.ge.s32.totalorder %v2746_v9, 1  ;;  %v6105_v9 = vld [vmem:[#allocation16 + $0x10] ss:$8 sps:$4 sm:$0xff]  }
 0xb39   :  { %vm7735_vm11 = vmpackc.low %vm6771_vm0, %vm7695_vm5 }
 0xb3a   :  { %2973 = vmatpush1.bf16.msra.mxu0 %v5982_v60 }
 0xb3b   :  { %2974 = vmatprep.subr.bf16.mxu0 %v5987_v20 }
 0xb3e   :  { %2975 = vmatpush1.bf16.msra.mxu0 %v5985_v26  ;;  %v6018_v26 = vld [vmem:[#allocation15 + $0x140] ss:$8 sps:$4 sm:$0xff]  }
 0xb3f   :  { %2976 = vmatprep.subr.bf16.mxu0 %v5990_v49 }
 0xb42   :  { %2977 = vmatpush1.bf16.msra.mxu0 %v5988_v56 }
 0xb43   :  { %2978 = vmatprep.subr.bf16.mxu0 %v5993_v48 }
 0xb46   :  { %2979 = vmatpush1.bf16.msra.mxu0 %v5991_v46 }
 0xb47   :  { %2980 = vmatprep.subr.bf16.mxu0 %v5996_v50 }
 0xb4a   :  { %2981 = vmatpush1.bf16.msra.mxu0 %v5994_v51 }
 0xb4b   :  { %2982 = vmatprep.subr.bf16.mxu0 %v5999_v53 }
 0xb4e   :  { %2983 = vmatpush1.bf16.msra.mxu0 %v5997_v35 }
 0xb4f   :  { %2984 = vmatprep.subr.bf16.mxu0 %v6002_v43 }
 0xb52   :  { %2985 = vmatpush1.bf16.msra.mxu0 %v6000_v54 }
 0xb53   :  { %2986 = vmatprep.subr.bf16.mxu0 %v6005_v57 }
 0xb56   :  { %2987 = vmatpush1.bf16.msra.mxu0 %v6003_v15  ;;  %v6114_v15 = vld [vmem:[#allocation16 + $0x40] ss:$8 sps:$4 sm:$0xff]  }
 0xb57   :  { %3169 = vmatprep.subr.bf16.mxu0 %v6008_v59 }
 0xbeb   :  { %v2558_v61 = vpop.f32.mrb[2].mxu0 }
 0xbec   :  { %v7619_v58 = vmul.f32 %v2676_v63, %v2558_v61  ;;  %v2560_v47 = vpop.f32.mrb[3].mxu0  ;;  %v5662_v62 = vpop.f32.mrb[26].mxu1 }
 0xbed   :  { %v7621_v0 = vmul.f32 %v2676_v63, %v2560_v47  ;;  %v2657_v1 = vpop.f32.mrb[27].mxu1 }
 0xbee   :  { %v7623_v2 = vpack.c.bf16 %v5662_v62, %v2657_v1  ;;  %v2726_v13 = vrot.slane %v7619_v58, 7  ;;  %v3222_v14 = vrot.slane %v7619_v58, 1 }
 0xbef   :  { %v2564_v7 = vpop.f32.mrb[16].mxu0  ;;  %v2727_v17 = vrot.slane %v7621_v0, 7  ;;  %v3223_v18 = vrot.slane %v7621_v0, 1 }
 0xbf0   :  { %v7625_v11 = vmul.f32 %v2676_v63, %v2564_v7  ;;  %v2566_v44 = vpop.f32.mrb[17].mxu0 }
 0xbf1   :  { %v7631_v16 = vmul.f32 %v2676_v63, %v2566_v44  ;;  %v6248_v44 = vld [vmem:[%s8045_s0 + $0x48] sm:$0xff]  }
 0xbf2   :  { %v2689_v41 = vpack.c.bf16 %v7625_v11, %v7619_v58  ;;  %v2728_v52 = vrot.slane %v7625_v11, 7  ;;  %v3224_v5 = vrot.slane %v7625_v11, 1  ;;  %v6063_v58 = vld [vmem:[#allocation15 + $0x230] ss:$8 sps:$4 sm:$0xff]   ;;  %v6068_v11 = vld [vmem:[#allocation15 + $0x244] ss:$8 sps:$4 sm:$0xff]  }
 0xbf3   :  { %v2729_v31 = vrot.slane %v7631_v16, 7  ;;  %v3225_v19 = vrot.slane %v7631_v16, 1  ;;  %v2570_v45 = vpop.f32.mrb[18].mxu0  ;;  %v2690_v22 = vpack.c.bf16 %v7631_v16, %v7621_v0  ;;  %v6021_v0 = vld [vmem:[#allocation15 + $0x150] ss:$8 sps:$4 sm:$0xff]  }
 0xbf4   :  { %v2738_v23 = vsel %vm1418_vm9, %v2726_v13, %v2728_v52  ;;  %v7648_v24 = vsel %vm1625_vm10, %v3222_v14, %v3224_v5  ;;  %v7650_v25 = vmul.f32 %v2680_v55, %v2570_v45  ;;  %v2572_v28 = vpop.f32.mrb[19].mxu0  ;;  %v6026_v16 = vld [vmem:[#allocation15 + $0x164] ss:$8 sps:$4 sm:$0xff]  }
 0xbf5   :  { %v7653_v34 = vmul.f32 %v2680_v55, %v2572_v28  ;;  %v2739_v36 = vsel %vm1418_vm9, %v2727_v17, %v2729_v31  ;;  %v7659_v37 = vsel %vm1625_vm10, %v3223_v18, %v3225_v19  ;;  %v6014_v28 = vld [vmem:[#allocation15 + $0x124] ss:$8 sps:$4 sm:$0xff]  }
 0xbf6   :  { %v2730_v39 = vrot.slane %v7650_v25, 7  ;;  %v3226_v40 = vrot.slane %v7650_v25, 1 }
 0xbf7   :  { %v2731_v30 = vrot.slane %v7653_v34, 7  ;;  %v3227_v33 = vrot.slane %v7653_v34, 1  ;;  %v2576_v42 = vpop.f32.mrb[20].mxu0 }
 0xbf8   :  { %v7667_v21 = vsel %vm1625_vm10, %v3224_v5, %v3226_v40  ;;  %v7669_v60 = vmul.f32 %v2680_v55, %v2576_v42  ;;  %v2578_v20 = vpop.f32.mrb[21].mxu0  ;;  %v2736_v49 = vsel %vm1418_vm9, %v2728_v52, %v2730_v39  ;;  %v6006_v52 = vld [vmem:[#allocation15 + $0x100] ss:$8 sps:$4 sm:$0xff]   ;;  %v6020_v42 = vld [vmem:[#allocation15 + $0x144] ss:$8 sps:$4 sm:$0xff]  }
 0xbf9   :  { %v5059_v56 = vpack.c.bf16 %v7667_v21, %v7648_v24  ;;  %v7679_v46 = vmul.f32 %v2680_v55, %v2578_v20  ;;  %v2737_v48 = vsel %vm1418_vm9, %v2729_v31, %v2731_v30  ;;  %v7685_v51 = vsel %vm1625_vm10, %v3225_v19, %v3227_v33  ;;  %v6011_v19 = vld [vmem:[#allocation15 + $0x114] ss:$8 sps:$4 sm:$0xff]   ;;  %v6110_v20 = vld [vmem:[#allocation16 + $0x24] ss:$8 sps:$4 sm:$0xff]   ;;  %v6135_v24 = vld [vmem:[#allocation16 + $0xb0] ss:$8 sps:$4 sm:$0xff]  }
 0xbfa   :  { %v2732_v50 = vrot.slane %v7669_v60, 7  ;;  %v3228_v35 = vrot.slane %v7669_v60, 1  ;;  %v2691_v53 = vpack.c.bf16 %v7669_v60, %v7650_v25  ;;  %v5056_v54 = vpack.c.bf16 %v7685_v51, %v7659_v37  ;;  %v6072_v25 = vld [vmem:[#allocation15 + $0x260] ss:$8 sps:$4 sm:$0xff]   ;;  %v6077_v60 = vld [vmem:[#allocation15 + $0x274] ss:$8 sps:$4 sm:$0xff]  }
 0xbfb   :  { %v2733_v43 = vrot.slane %v7679_v46, 7  ;;  %v3229_v57 = vrot.slane %v7679_v46, 1  ;;  %v2692_v59 = vpack.c.bf16 %v7679_v46, %v7653_v34  ;;  %v6071_v34 = vld [vmem:[#allocation15 + $0x254] ss:$8 sps:$4 sm:$0xff]   ;;  %v6069_v46 = vld [vmem:[#allocation15 + $0x250] ss:$8 sps:$4 sm:$0xff]  }
 0xbfc   :  { %v2740_v63 = vsel %vm1418_vm9, %v2732_v50, %v2726_v13  ;;  %v2734_v61 = vsel %vm1418_vm9, %v2730_v39, %v2732_v50  ;;  %v7707_v47 = vsel %vm1625_vm10, %v3226_v40, %v3228_v35  ;;  %v7711_v62 = vsel %vm1625_vm10, %v3228_v35, %v3222_v14  ;;  %v6102_v39 = vld [vmem:[#allocation16] ss:$8 sps:$4 sm:$0xff]   ;;  %v6104_v40 = vld [vmem:[#allocation16 + $0x4] ss:$8 sps:$4 sm:$0xff]   ;;  %v6113_v50 = vld [vmem:[#allocation16 + $0x34] ss:$8 sps:$4 sm:$0xff]  }
 0xbfd   :  { %v4983_v1 = vpack.c.bf16 %v2738_v23, %v2740_v63  ;;  %v2741_v7 = vsel %vm1418_vm9, %v2733_v43, %v2727_v17  ;;  %v2735_v55 = vsel %vm1418_vm9, %v2731_v30, %v2733_v43  ;;  %v4989_v13 = vpack.c.bf16 %v2734_v61, %v2736_v49  ;;  %v6015_v30 = vld [vmem:[#allocation15 + $0x130] ss:$8 sps:$4 sm:$0xff]   ;;  %3859 = vmatprep.subr.bf16.mxu1 %v6104_v40  ;;  %v6023_v49 = vld [vmem:[#allocation15 + $0x154] ss:$8 sps:$4 sm:$0xff]   ;;  %v6116_v35 = vld [vmem:[#allocation16 + $0x44] ss:$8 sps:$4 sm:$0xff]  }
 0xbfe   :  { %v4980_v38 = vpack.c.bf16 %v2739_v36, %v2741_v7  ;;  %v4986_v5 = vpack.c.bf16 %v2735_v55, %v2737_v48  ;;  %v7726_v14 = vsel %vm1625_vm10, %v3227_v33, %v3229_v57  ;;  %v7730_v17 = vsel %vm1625_vm10, %v3229_v57, %v3223_v18  ;;  %v6009_v18 = vld [vmem:[#allocation15 + $0x110] ss:$8 sps:$4 sm:$0xff]   ;;  %v6017_v36 = vld [vmem:[#allocation15 + $0x134] ss:$8 sps:$4 sm:$0xff]   ;;  %3860 = vmatpush1.bf16.msra.mxu1 %v6102_v39  ;;  %v6108_v48 = vld [vmem:[#allocation16 + $0x20] ss:$8 sps:$4 sm:$0xff]  }
 0xbff   :  { %v5062_v45 = vpack.c.bf16 %v7730_v17, %v7726_v14  ;;  %v5065_v23 = vpack.c.bf16 %v7711_v62, %v7707_v47  ;;  %v6107_v33 = vld [vmem:[#allocation16 + $0x14] ss:$8 sps:$4 sm:$0xff]   ;;  %v6024_v43 = vld [vmem:[#allocation15 + $0x160] ss:$8 sps:$4 sm:$0xff]   ;;  %v6027_v61 = vld [vmem:[#allocation15 + $0x170] ss:$8 sps:$4 sm:$0xff]  }
 0xc00   :  { %4981 = vmatprep.mubr.msk.bf16.mxu0 %vm7718_vm8, %v4980_v38  ;;  %3861 = vmatprep.subr.bf16.mxu1 %v6107_v33  ;;  %v6029_v57 = vld [vmem:[#allocation15 + $0x174] ss:$8 sps:$4 sm:$0xff]   ;;  %v6117_v7 = vld [vmem:[#allocation16 + $0x50] ss:$8 sps:$4 sm:$0xff]   ;;  %v6122_v55 = vld [vmem:[#allocation16 + $0x64] ss:$8 sps:$4 sm:$0xff]  }
 0xc01   :  { %4984 = vmatmul.mubr.msk.bf16.vlgmr.msra.gmra.mrb[24].mxu0 %vm7718_vm8, %v4983_v1  ;;  %v6119_v63 = vld [vmem:[#allocation16 + $0x54] ss:$8 sps:$4 sm:$0xff]   ;;  %v6032_v1 = vld [vmem:[#allocation15 + $0x184] ss:$8 sps:$4 sm:$0xff]   ;;  %v6126_v40 = vld [vmem:[#allocation16 + $0x80] ss:$8 sps:$4 sm:$0xff]  }
 0xc02   :  { %3170 = vmatpush1.bf16.msra.mxu0 %v6006_v52  ;;  %4987 = vmatprep.mubr.msk.bf16.mxu0 %vm7735_vm11, %v4986_v5  ;;  %v6035_v38 = vld [vmem:[#allocation15 + $0x194] ss:$8 sps:$4 sm:$0xff]   ;;  %v6120_v52 = vld [vmem:[#allocation16 + $0x60] ss:$8 sps:$4 sm:$0xff]   ;;  %v6039_v33 = vld [vmem:[#allocation15 + $0x1b0] ss:$8 sps:$4 sm:$0xff]  }
 0xc03   :  { %3171 = vmatprep.subr.bf16.mxu0 %v6011_v19  ;;  %3862 = vmatpush1.bf16.msra.mxu1 %v6105_v9  ;;  %v6125_v5 = vld [vmem:[#allocation16 + $0x74] ss:$8 sps:$4 sm:$0xff]   ;;  %v6033_v19 = vld [vmem:[#allocation15 + $0x190] ss:$8 sps:$4 sm:$0xff]   ;;  %v6080_v51 = vld [vmem:[#allocation15 + $0x284] ss:$8 sps:$4 sm:$0xff]  }
 0xc04   :  { %3863 = vmatprep.subr.bf16.mxu1 %v6110_v20  ;;  %v6041_v39 = vld [vmem:[#allocation15 + $0x1b4] ss:$8 sps:$4 sm:$0xff]   ;;  %v6129_v9 = vld [vmem:[#allocation16 + $0x90] ss:$8 sps:$4 sm:$0xff]   ;;  %v6042_v20 = vld [vmem:[#allocation15 + $0x1c0] ss:$8 sps:$4 sm:$0xff]  }
 0xc05   :  { %v6075_v37 = vld [vmem:[#allocation15 + $0x270] ss:$8 sps:$4 sm:$0xff]   ;;  %v6137_v21 = vld [vmem:[#allocation16 + $0xb4] ss:$8 sps:$4 sm:$0xff]   ;;  %v6144_v47 = vld [vmem:[#allocation16 + $0xe0] ss:$8 sps:$4 sm:$0xff]  }
 0xc06   :  { %3172 = vmatpush1.bf16.msra.mxu0 %v6009_v18  ;;  %v6038_v18 = vld [vmem:[#allocation15 + $0x1a4] ss:$8 sps:$4 sm:$0xff]   ;;  %v6143_v14 = vld [vmem:[#allocation16 + $0xd4] ss:$8 sps:$4 sm:$0xff]   ;;  %v6141_v17 = vld [vmem:[#allocation16 + $0xd0] ss:$8 sps:$4 sm:$0xff]  }
 0xc07   :  { %3173 = vmatprep.subr.bf16.mxu0 %v6014_v28  ;;  %3864 = vmatpush1.bf16.msra.mxu1 %v6108_v48  ;;  %v6123_v28 = vld [vmem:[#allocation16 + $0x70] ss:$8 sps:$4 sm:$0xff]   ;;  %v6050_v48 = vld [vmem:[#allocation15 + $0x1e4] ss:$8 sps:$4 sm:$0xff]   ;;  %v6149_v62 = vld [vmem:[#allocation16 + $0xf4] ss:$8 sps:$4 sm:$0xff]  }
 0xc08   :  { %3865 = vmatprep.subr.bf16.mxu1 %v6113_v50  ;;  %v6048_v50 = vld [vmem:[#allocation15 + $0x1e0] ss:$8 sps:$4 sm:$0xff]   ;;  %v6167_v31 = vld [vmem:[#allocation16 + $0x154] ss:$8 sps:$4 sm:$0xff]  }
 0xc09   :  { %4990 = vmatmul.mubr.msk.bf16.gmra.mrb[28].mxu0 %vm7735_vm11, %v4989_v13  ;;  %v6030_v13 = vld [vmem:[#allocation15 + $0x180] ss:$8 sps:$4 sm:$0xff]  }
 0xc0a   :  { %3174 = vmatpush1.bf16.msra.mxu0 %v6012_v32  ;;  %3201 = vmatprep.mubr.bf16.mxu0 %v2690_v22  ;;  %v6111_v22 = vld [vmem:[#allocation16 + $0x30] ss:$8 sps:$4 sm:$0xff]   ;;  %v6128_v32 = vld [vmem:[#allocation16 + $0x84] ss:$8 sps:$4 sm:$0xff]  }
 0xc0b   :  { %3175 = vmatprep.subr.bf16.mxu0 %v6017_v36  ;;  %3866 = vmatpush1.bf16.msra.mxu1 %v6111_v22  ;;  %v6036_v36 = vld [vmem:[#allocation15 + $0x1a0] ss:$8 sps:$4 sm:$0xff]   ;;  %v6056_v22 = vld [vmem:[#allocation15 + $0x204] ss:$8 sps:$4 sm:$0xff]  }
 0xc0c   :  { %3867 = vmatprep.subr.bf16.mxu1 %v6116_v35  ;;  %v6054_v35 = vld [vmem:[#allocation15 + $0x200] ss:$8 sps:$4 sm:$0xff]  }
 0xc0e   :  { %3176 = vmatpush1.bf16.msra.mxu0 %v6015_v30  ;;  %v6131_v30 = vld [vmem:[#allocation16 + $0x94] ss:$8 sps:$4 sm:$0xff]  }
 0xc0f   :  { %3177 = vmatprep.subr.bf16.mxu0 %v6020_v42  ;;  %3868 = vmatpush1.bf16.msra.mxu1 %v6114_v15  ;;  %v6044_v42 = vld [vmem:[#allocation15 + $0x1c4] ss:$8 sps:$4 sm:$0xff]   ;;  %v6057_v15 = vld [vmem:[#allocation15 + $0x210] ss:$8 sps:$4 sm:$0xff]  }
 0xc10   :  { %3869 = vmatprep.subr.bf16.mxu1 %v6119_v63  ;;  %v6062_v63 = vld [vmem:[#allocation15 + $0x224] ss:$8 sps:$4 sm:$0xff]  }
 0xc12   :  { %3178 = vmatpush1.bf16.msra.mxu0 %v6018_v26  ;;  %v6047_v26 = vld [vmem:[#allocation15 + $0x1d4] ss:$8 sps:$4 sm:$0xff]  }
 0xc13   :  { %3179 = vmatprep.subr.bf16.mxu0 %v6023_v49  ;;  %3870 = vmatpush1.bf16.msra.mxu1 %v6117_v7  ;;  %v6045_v49 = vld [vmem:[#allocation15 + $0x1d0] ss:$8 sps:$4 sm:$0xff]  }
 0xc14   :  { %3871 = vmatprep.subr.bf16.mxu1 %v6122_v55  ;;  %v6081_v7 = vld [vmem:[#allocation15 + $0x290] ss:$8 sps:$4 sm:$0xff]   ;;  %v6086_v55 = vld [vmem:[#allocation15 + $0x2a4] ss:$8 sps:$4 sm:$0xff]  }
 0xc16   :  { %3180 = vmatpush1.bf16.msra.mxu0 %v6021_v0  ;;  %v6053_v0 = vld [vmem:[#allocation15 + $0x1f4] ss:$8 sps:$4 sm:$0xff]  }
 0xc17   :  { %3181 = vmatprep.subr.bf16.mxu0 %v6026_v16  ;;  %3872 = vmatpush1.bf16.msra.mxu1 %v6120_v52  ;;  %v6051_v16 = vld [vmem:[#allocation15 + $0x1f0] ss:$8 sps:$4 sm:$0xff]  }
 0xc18   :  { %3873 = vmatprep.subr.bf16.mxu1 %v6125_v5  ;;  %v6087_v52 = vld [vmem:[#allocation15 + $0x2b0] ss:$8 sps:$4 sm:$0xff]   ;;  %v6092_v5 = vld [vmem:[#allocation15 + $0x2c4] ss:$8 sps:$4 sm:$0xff]  }
 0xc1a   :  { %3182 = vmatpush1.bf16.msra.mxu0 %v6024_v43  ;;  %v6059_v43 = vld [vmem:[#allocation15 + $0x214] ss:$8 sps:$4 sm:$0xff]  }
 0xc1b   :  { %3183 = vmatprep.subr.bf16.mxu0 %v6029_v57  ;;  %3874 = vmatpush1.bf16.msra.mxu1 %v6123_v28  ;;  %v2745_v57 = vand.u32 15, %v7412_v6  ;;  %v6065_v6 = vld [vmem:[#allocation15 + $0x234] ss:$8 sps:$4 sm:$0xff]   ;;  %v6093_v28 = vld [vmem:[#allocation15 + $0x2d0] ss:$8 sps:$4 sm:$0xff]  }
 0xc1c   :  { %3875 = vmatprep.subr.bf16.mxu1 %v6128_v32  ;;  %v6098_v32 = vld [vmem:[#allocation15 + $0x2e4] ss:$8 sps:$4 sm:$0xff]  }
 0xc1d   :  { %vm3239_vm12 = vcmp.lt.s32.totalorder %v2745_v57, 15 }
 0xc1e   :  { %3184 = vmatpush1.bf16.msra.mxu0 %v6027_v61  ;;  %v6060_v61 = vld [vmem:[#allocation15 + $0x220] ss:$8 sps:$4 sm:$0xff]   ;;  %vm7762_vm13 = vmpackc.low %vm3239_vm12, %vm6771_vm0 }
 0xc1f   :  { %3185 = vmatprep.subr.bf16.mxu0 %v6032_v1  ;;  %3876 = vmatpush1.bf16.msra.mxu1 %v6126_v40  ;;  %v6101_v40 = vld [vmem:[#allocation15 + $0x2f4] ss:$8 sps:$4 sm:$0xff]  }
 0xc20   :  { %3877 = vmatprep.subr.bf16.mxu1 %v6131_v30  ;;  %v6267_v1 = vld [vmem:[%s6920_s27 + $0x8] sm:$0xff] }
 0xc22   :  { %3186 = vmatpush1.bf16.msra.mxu0 %v6030_v13  ;;  %v6084_v13 = vld [vmem:[#allocation15 + $0x2a0] ss:$8 sps:$4 sm:$0xff]  }
 0xc23   :  { %3187 = vmatprep.subr.bf16.mxu0 %v6035_v38  ;;  %3878 = vmatpush1.bf16.msra.mxu1 %v6129_v9  ;;  %v6089_v38 = vld [vmem:[#allocation15 + $0x2b4] ss:$8 sps:$4 sm:$0xff]   ;;  %v6134_v9 = vld [vmem:[#allocation16 + $0xa4] ss:$8 sps:$4 sm:$0xff]  }
 0xc24   :  { %3879 = vmatprep.subr.bf16.mxu1 %v6134_v9 }
 0xc26   :  { %3188 = vmatpush1.bf16.msra.mxu0 %v6033_v19  ;;  %v6090_v19 = vld [vmem:[#allocation15 + $0x2c0] ss:$8 sps:$4 sm:$0xff]  }
 0xc27   :  { %3189 = vmatprep.subr.bf16.mxu0 %v6038_v18  ;;  %v6095_v18 = vld [vmem:[#allocation15 + $0x2d4] ss:$8 sps:$4 sm:$0xff]  }
 0xc2a   :  { %3190 = vmatpush1.bf16.msra.mxu0 %v6036_v36  ;;  %v2743_v36 = vadd.s32 24, %v7124_v3  ;;  %v6158_v3 = vld [vmem:[#allocation16 + $0x124] ss:$8 sps:$4 sm:$0xff]  }
 0xc2b   :  { %3191 = vmatprep.subr.bf16.mxu0 %v6041_v39  ;;  %v6096_v39 = vld [vmem:[#allocation15 + $0x2e0] ss:$8 sps:$4 sm:$0xff]  }
 0xc2c   :  { %v2747_v30 = vand.u32 15, %v2743_v36 }
 0xc2e   :  { %3192 = vmatpush1.bf16.msra.mxu0 %v6039_v33  ;;  %v6099_v33 = vld [vmem:[#allocation15 + $0x2f0] ss:$8 sps:$4 sm:$0xff]   ;;  %vm3241_vm14 = vcmp.lt.s32.totalorder %v2747_v30, 15 }
 0xc2f   :  { %3193 = vmatprep.subr.bf16.mxu0 %v6044_v42  ;;  %vm7776_vm2 = vmpackc.low %vm3241_vm14, %vm6771_vm0  ;;  %v6256_v42 = vld [vmem:[%s8045_s0 + $0x68] sm:$0xff]  }
 0xc32   :  { %3194 = vmatpush1.bf16.msra.mxu0 %v6042_v20  ;;  %v6132_v20 = vld [vmem:[#allocation16 + $0xa0] ss:$8 sps:$4 sm:$0xff]  }
 0xc33   :  { %3195 = vmatprep.subr.bf16.mxu0 %v6047_v26  ;;  %3880 = vmatpush1.bf16.msra.mxu1 %v6132_v20  ;;  %v6138_v26 = vld [vmem:[#allocation16 + $0xc0] ss:$8 sps:$4 sm:$0xff]  }
 0xc34   :  { %3881 = vmatprep.subr.bf16.mxu1 %v6137_v21 }
 0xc36   :  { %3196 = vmatpush1.bf16.msra.mxu0 %v6045_v49  ;;  %v6152_v49 = vld [vmem:[#allocation16 + $0x104] ss:$8 sps:$4 sm:$0xff]  }
 0xc37   :  { %3197 = vmatprep.subr.bf16.mxu0 %v6050_v48  ;;  %3882 = vmatpush1.bf16.msra.mxu1 %v6135_v24  ;;  %v3518_v48 = vrot.slane %v7356_v27, %v7134_v8  ;;  %v3537_v24 = vld [vmem:[#allocation22 + $0x30] sm:$0xff] }
 0xc3a   :  { %3198 = vmatpush1.bf16.msra.mxu0 %v6048_v50 }
 0xc3b   :  { %3199 = vmatprep.subr.bf16.mxu0 %v6053_v0  ;;  %v3531_v0 = vld [vmem:[#allocation22] sm:$0xff] }
 0xc3e   :  { %3200 = vmatpush1.bf16.msra.mxu0 %v6051_v16 }
 0xc3f   :  { %3447 = vmatprep.subr.bf16.mxu0 %v6056_v22 }
 0xc41   :  { %3202 = vmatmul.mubr.bf16.vlgmr.msra.gmra.mrb[24].mxu0 %v2689_v41  ;;  %v6066_v41 = vld [vmem:[#allocation15 + $0x240] ss:$8 sps:$4 sm:$0xff]  }
 0xc42   :  { %3211 = vmatprep.mubr.bf16.mxu0 %v2692_v59  ;;  %3448 = vmatpush1.bf16.msra.mxu0 %v6054_v35  ;;  %v6074_v59 = vld [vmem:[#allocation15 + $0x264] ss:$8 sps:$4 sm:$0xff]   ;;  %v3532_v35 = vld [vmem:[#allocation22 + $0x8] sm:$0xff] }
 0xc43   :  { %3449 = vmatprep.subr.bf16.mxu0 %v6059_v43 }
 0xc46   :  { %3450 = vmatpush1.bf16.msra.mxu0 %v6057_v15  ;;  %v3533_v15 = vld [vmem:[#allocation22 + $0x10] sm:$0xff] }
 0xc47   :  { %3451 = vmatprep.subr.bf16.mxu0 %v6062_v63 }
 0xc49   :  { %3212 = vmatmul.mubr.bf16.gmra.mrb[28].mxu0 %v2691_v53  ;;  %v6078_v53 = vld [vmem:[#allocation15 + $0x280] ss:$8 sps:$4 sm:$0xff]  }
 0xc4a   :  { %3452 = vmatpush1.bf16.msra.mxu0 %v6060_v61  ;;  %5057 = vmatprep.mubr.msk.bf16.mxu0 %vm7762_vm13, %v5056_v54  ;;  %v6083_v54 = vld [vmem:[#allocation15 + $0x294] ss:$8 sps:$4 sm:$0xff]   ;;  %v3589_v61 = vrot.slane %v7365_v4, %v7134_v8 }
 0xc4b   :  { %3453 = vmatprep.subr.bf16.mxu0 %v6065_v6 }
 0xc4e   :  { %3454 = vmatpush1.bf16.msra.mxu0 %v6063_v58 }
 0xc4f   :  { %3455 = vmatprep.subr.bf16.mxu0 %v6068_v11  ;;  %v3534_v11 = vld [vmem:[#allocation22 + $0x18] sm:$0xff] }
 0xc52   :  { %3456 = vmatpush1.bf16.msra.mxu0 %v6066_v41 }
 0xc53   :  { %3457 = vmatprep.subr.bf16.mxu0 %v6071_v34 }
 0xc56   :  { %3458 = vmatpush1.bf16.msra.mxu0 %v6069_v46  ;;  %v3522_v46 = vrot.slane %v7356_v27, %v7137_v10 }
 0xc57   :  { %3459 = vmatprep.subr.bf16.mxu0 %v6074_v59  ;;  %v7803_v59 = vrot.slane %v7365_v4, %v7137_v10  ;;  %v3535_v4 = vld [vmem:[#allocation22 + $0x20] sm:$0xff] }
 0xc5a   :  { %3460 = vmatpush1.bf16.msra.mxu0 %v6072_v25 }
 0xc5b   :  { %3461 = vmatprep.subr.bf16.mxu0 %v6077_v60 }
 0xc5e   :  { %3462 = vmatpush1.bf16.msra.mxu0 %v6075_v37 }
 0xc5f   :  { %3463 = vmatprep.subr.bf16.mxu0 %v6080_v51 }
 0xc62   :  { %3464 = vmatpush1.bf16.msra.mxu0 %v6078_v53 }
 0xc63   :  { %3465 = vmatprep.subr.bf16.mxu0 %v6083_v54 }
 0xc66   :  { %3466 = vmatpush1.bf16.msra.mxu0 %v6081_v7 }
 0xc67   :  { %3467 = vmatprep.subr.bf16.mxu0 %v6086_v55 }
 0xc6a   :  { %3468 = vmatpush1.bf16.msra.mxu0 %v6084_v13 }
 0xc6b   :  { %3469 = vmatprep.subr.bf16.mxu0 %v6089_v38 }
 0xc6e   :  { %3470 = vmatpush1.bf16.msra.mxu0 %v6087_v52 }
 0xc6f   :  { %3471 = vmatprep.subr.bf16.mxu0 %v6092_v5 }
 0xc72   :  { %3472 = vmatpush1.bf16.msra.mxu0 %v6090_v19 }
 0xc73   :  { %3473 = vmatprep.subr.bf16.mxu0 %v6095_v18 }
 0xc76   :  { %3474 = vmatpush1.bf16.msra.mxu0 %v6093_v28 }
 0xc77   :  { %3475 = vmatprep.subr.bf16.mxu0 %v6098_v32 }
 0xc7a   :  { %3476 = vmatpush1.bf16.msra.mxu0 %v6096_v39  ;;  %v3536_v39 = vld [vmem:[#allocation22 + $0x28] sm:$0xff] }
 0xc7b   :  { %3477 = vmatprep.subr.bf16.mxu0 %v6101_v40 }
 0xc7e   :  { %3478 = vmatpush1.bf16.msra.mxu0 %v6099_v33 }
 0xc81   :  { %5060 = vmatmul.mubr.msk.bf16.vlgmr.msra.gmra.mrb[24].mxu0 %vm7762_vm13, %v5059_v56  ;;  %v6140_v56 = vld [vmem:[#allocation16 + $0xc4] ss:$8 sps:$4 sm:$0xff]  }
 0xc82   :  { %5063 = vmatprep.mubr.msk.bf16.mxu0 %vm7776_vm2, %v5062_v45  ;;  %3883 = vmatprep.subr.bf16.mxu1 %v6140_v56  ;;  %v6146_v45 = vld [vmem:[#allocation16 + $0xe4] ss:$8 sps:$4 sm:$0xff]  }
 0xc83   :  { %3884 = vmatpush1.bf16.msra.mxu1 %v6138_v26 }
 0xc84   :  { %3885 = vmatprep.subr.bf16.mxu1 %v6143_v14 }
 0xc87   :  { %3886 = vmatpush1.bf16.msra.mxu1 %v6141_v17 }
 0xc88   :  { %3887 = vmatprep.subr.bf16.mxu1 %v6146_v45 }
 0xc89   :  { %5066 = vmatmul.mubr.msk.bf16.gmra.mrb[28].mxu0 %vm7776_vm2, %v5065_v23  ;;  %v6147_v23 = vld [vmem:[#allocation16 + $0xf0] ss:$8 sps:$4 sm:$0xff]  }
 0xc8b   :  { %3888 = vmatpush1.bf16.msra.mxu1 %v6144_v47 }
 0xc8c   :  { %3889 = vmatprep.subr.bf16.mxu1 %v6149_v62 }
 0xc8f   :  { %3890 = vmatpush1.bf16.msra.mxu1 %v6147_v23 }
 0xc90   :  { %4072 = vmatprep.subr.bf16.mxu1 %v6152_v49 }
 0xd54   :  { %v3481_v50 = vpop.f32.mrb[24].mxu0 }
 0xd55   :  { %v3523_v16 = vmul.f32 %v3518_v48, %v3481_v50  ;;  %v3483_v22 = vpop.f32.mrb[25].mxu0 }
 0xd56   :  { %v3524_v43 = vmul.f32 %v3518_v48, %v3483_v22  ;;  %v3485_v57 = vpop.f32.mrb[26].mxu0 }
 0xd57   :  { %v3539_v63 = vadd.f32 %v3531_v0, %v3523_v16  ;;  %v3525_v6 = vmul.f32 %v3518_v48, %v3485_v57  ;;  %v3487_v58 = vpop.f32.mrb[27].mxu0  ;;  %v3538_v0 = vld [vmem:[#allocation22 + $0x38] sm:$0xff] }
 0xd58   :  { %v3540_v41 = vadd.f32 %v3532_v35, %v3524_v43  ;;  %v3526_v34 = vmul.f32 %v3518_v48, %v3487_v58 }
 0xd59   :  { %vm3547_vm0 = vcmp.ge.f32.partialorder %v3539_v63, 0.0  ;;  %v3555_v25 = vmul.f32 1.4142135, %v3539_v63  ;;  %v3563_v60 = vmul.f32 0.28284273, %v3539_v63  ;;  %v3541_v37 = vadd.f32 %v3533_v15, %v3525_v6 }
 0xd5a   :  { %vm3548_vm1 = vcmp.ge.f32.partialorder %v3540_v41, 0.0  ;;  %v3556_v51 = vmul.f32 1.4142135, %v3540_v41  ;;  %v3564_v53 = vmul.f32 0.28284273, %v3540_v41  ;;  %v3542_v54 = vadd.f32 %v3534_v11, %v3526_v34 }
 0xd5b   :  { %v3571_v7 = vsel %vm3547_vm0, %v3555_v25, %v3563_v60  ;;  %vm3549_vm15 = vcmp.ge.f32.partialorder %v3541_v37, 0.0  ;;  %v3557_v55 = vmul.f32 1.4142135, %v3541_v37  ;;  %v3565_v13 = vmul.f32 0.28284273, %v3541_v37 }
 0xd5c   :  { %v7805_v38 = vmul.f32 %v3589_v61, %v3571_v7  ;;  %v3572_v52 = vsel %vm3548_vm1, %v3556_v51, %v3564_v53  ;;  %vm3550_vm3 = vcmp.ge.f32.partialorder %v3542_v54, 0.0  ;;  %v3558_v27 = vmul.f32 1.4142135, %v3542_v54  ;;  %v3491_v5 = vpop.f32.mrb[28].mxu0 }
 0xd5d   :  { %v7807_v19 = vmul.f32 %v3589_v61, %v3572_v52  ;;  %v3573_v18 = vsel %vm3549_vm15, %v3557_v55, %v3565_v13  ;;  %v3566_v28 = vmul.f32 0.28284273, %v3542_v54  ;;  %v3527_v32 = vmul.f32 %v3522_v46, %v3491_v5  ;;  %v3493_v36 = vpop.f32.mrb[29].mxu0 }
 0xd5e   :  { %v3639_v40 = vrot.slane %v7805_v38, 7  ;;  %v4125_v30 = vrot.slane %v7805_v38, 1  ;;  %v7811_v33 = vmul.f32 %v3589_v61, %v3573_v18  ;;  %v3528_v9 = vmul.f32 %v3522_v46, %v3493_v36  ;;  %v3495_v20 = vpop.f32.mrb[30].mxu0 }
 0xd5f   :  { %v3574_v21 = vsel %vm3550_vm3, %v3558_v27, %v3566_v28  ;;  %v3543_v56 = vadd.f32 %v3535_v4, %v3527_v32  ;;  %v3529_v26 = vmul.f32 %v3522_v46, %v3495_v20  ;;  %v3497_v14 = vpop.f32.mrb[31].mxu0  ;;  %v3640_v17 = vrot.slane %v7807_v19, 7 }
 0xd60   :  { %v3641_v45 = vrot.slane %v7811_v33, 7  ;;  %v4127_v47 = vrot.slane %v7811_v33, 1  ;;  %v7817_v62 = vmul.f32 %v3589_v61, %v3574_v21  ;;  %v3544_v23 = vadd.f32 %v3536_v39, %v3528_v9 }
 0xd61   :  { %vm3551_vm4 = vcmp.ge.f32.partialorder %v3543_v56, 0.0  ;;  %v3559_v49 = vmul.f32 1.4142135, %v3543_v56  ;;  %v3567_v48 = vmul.f32 0.28284273, %v3543_v56  ;;  %v3545_v50 = vadd.f32 %v3537_v24, %v3529_v26 }
 0xd62   :  { %vm3552_vm5 = vcmp.ge.f32.partialorder %v3544_v23, 0.0  ;;  %v3560_v16 = vmul.f32 1.4142135, %v3544_v23  ;;  %v3568_v22 = vmul.f32 0.28284273, %v3544_v23  ;;  %v3530_v35 = vmul.f32 %v3522_v46, %v3497_v14 }
 0xd63   :  { %v3575_v43 = vsel %vm3551_vm4, %v3559_v49, %v3567_v48  ;;  %vm3553_vm12 = vcmp.ge.f32.partialorder %v3545_v50, 0.0  ;;  %v3561_v57 = vmul.f32 1.4142135, %v3545_v50  ;;  %v3569_v15 = vmul.f32 0.28284273, %v3545_v50 }
 0xd64   :  { %v7820_v63 = vmul.f32 %v7803_v59, %v3575_v43  ;;  %v3576_v6 = vsel %vm3552_vm5, %v3560_v16, %v3568_v22  ;;  %v3546_v61 = vadd.f32 %v3538_v0, %v3530_v35  ;;  %v3642_v58 = vrot.slane %v7817_v62, 7  ;;  %v6150_v0 = vld [vmem:[#allocation16 + $0x100] ss:$8 sps:$4 sm:$0xff]   ;;  %v6155_v35 = vld [vmem:[#allocation16 + $0x114] ss:$8 sps:$4 sm:$0xff]  }
 0xd65   :  { %v7824_v11 = vmul.f32 %v7803_v59, %v3576_v6  ;;  %v3577_v41 = vsel %vm3553_vm12, %v3561_v57, %v3569_v15  ;;  %v3651_v34 = vsel %vm1418_vm9, %v3639_v40, %v3641_v45  ;;  %v3603_v46 = vpack.c.bf16 %v7817_v62, %v7807_v19  ;;  %v6153_v6 = vld [vmem:[#allocation16 + $0x110] ss:$8 sps:$4 sm:$0xff]  }
 0xd66   :  { %v4129_v25 = vrot.slane %v7820_v63, 1  ;;  %v7832_v60 = vmul.f32 %v7803_v59, %v3577_v41  ;;  %vm3554_vm14 = vcmp.ge.f32.partialorder %v3546_v61, 0.0  ;;  %v3562_v37 = vmul.f32 1.4142135, %v3546_v61  ;;  %v6247_v41 = vld [vmem:[%s8045_s0] sm:$0xff]  }
 0xd67   :  { %v3570_v51 = vmul.f32 0.28284273, %v3546_v61  ;;  %v3652_v53 = vsel %vm1418_vm9, %v3640_v17, %v3642_v58  ;;  %v3644_v54 = vrot.slane %v7824_v11, 7  ;;  %v3643_v7 = vrot.slane %v7820_v63, 7  ;;  %v6161_v61 = vld [vmem:[#allocation16 + $0x134] ss:$8 sps:$4 sm:$0xff]  }
 0xd68   :  { %v3645_v55 = vrot.slane %v7832_v60, 7  ;;  %v3602_v13 = vpack.c.bf16 %v7811_v33, %v7805_v38  ;;  %v3604_v52 = vpack.c.bf16 %v7832_v60, %v7820_v63  ;;  %v4126_v27 = vrot.slane %v7807_v19, 1  ;;  %v6207_v38 = vld [vmem:[#allocation16 + $0x230] ss:$8 sps:$4 sm:$0xff]   ;;  %v6212_v33 = vld [vmem:[#allocation16 + $0x244] ss:$8 sps:$4 sm:$0xff]  }
 0xd69   :  { %v3578_v5 = vsel %vm3554_vm14, %v3562_v37, %v3570_v51  ;;  %v3650_v4 = vsel %vm1418_vm9, %v3642_v58, %v3644_v54  ;;  %v3649_v18 = vsel %vm1418_vm9, %v3641_v45, %v3643_v7  ;;  %v4128_v28 = vrot.slane %v7817_v62, 1  ;;  %v6246_v58 = vld [vmem:[%s8045_s0 + $0x40] sm:$0xff]   ;;  %v6249_v37 = vld [vmem:[%s8045_s0 + $0x8] sm:$0xff]   ;;  %v6250_v51 = vld [vmem:[%s8045_s0 + $0x50] sm:$0xff]  }
 0xd6a   :  { %v7850_v32 = vmul.f32 %v7803_v59, %v3578_v5  ;;  %v3653_v36 = vsel %vm1418_vm9, %v3645_v55, %v3639_v40  ;;  %v3647_v39 = vsel %vm1418_vm9, %v3643_v7, %v3645_v55  ;;  %v4130_v19 = vrot.slane %v7824_v11, 1  ;;  %5340 = vmatprep.subr.bf16.mxu0 %v6246_v58  ;;  %v6252_v7 = vld [vmem:[%s8045_s0 + $0x58] sm:$0xff]  }
 0xd6b   :  { %v5103_v9 = vpack.c.bf16 %v3651_v34, %v3653_v36  ;;  %v5109_v20 = vpack.c.bf16 %v3647_v39, %v3649_v18  ;;  %v7859_v24 = vsel %vm1625_vm10, %v4126_v27, %v4128_v28  ;;  %v7863_v21 = vsel %vm1625_vm10, %v4127_v47, %v4129_v25  ;;  %v6159_v34 = vld [vmem:[#allocation16 + $0x130] ss:$8 sps:$4 sm:$0xff]   ;;  %5341 = vmatpush3.bf16.msra.mxu0 %v6247_v41  ;;  %v6170_v55 = vld [vmem:[#allocation16 + $0x164] ss:$8 sps:$4 sm:$0xff]   ;;  %v6168_v5 = vld [vmem:[#allocation16 + $0x160] ss:$8 sps:$4 sm:$0xff]  }
 0xd6c   :  { %v3646_v59 = vrot.slane %v7850_v32, 7  ;;  %v3605_v40 = vpack.c.bf16 %v7850_v32, %v7824_v11  ;;  %v7870_v56 = vsel %vm1625_vm10, %v4128_v28, %v4130_v19  ;;  %v7876_v26 = vsel %vm1625_vm10, %v4125_v30, %v4127_v47  ;;  %5342 = vmatprep.subr.bf16.mxu0 %v6248_v44  ;;  %v6171_v18 = vld [vmem:[#allocation16 + $0x170] ss:$8 sps:$4 sm:$0xff]   ;;  %v6176_v28 = vld [vmem:[#allocation16 + $0x184] ss:$8 sps:$4 sm:$0xff]  }
 0xd6d   :  { %v5176_v14 = vpack.c.bf16 %v7870_v56, %v7859_v24  ;;  %v5179_v45 = vpack.c.bf16 %v7863_v21, %v7876_v26  ;;  %v4132_v62 = vrot.slane %v7850_v32, 1  ;;  %v4131_v23 = vrot.slane %v7832_v60, 1  ;;  %v6174_v36 = vld [vmem:[#allocation16 + $0x180] ss:$8 sps:$4 sm:$0xff]   ;;  %v6179_v39 = vld [vmem:[#allocation16 + $0x194] ss:$8 sps:$4 sm:$0xff]  }
 0xd6e   :  { %v3654_v49 = vsel %vm1418_vm9, %v3646_v59, %v3640_v17  ;;  %v3648_v48 = vsel %vm1418_vm9, %v3644_v54, %v3646_v59  ;;  %v6251_v54 = vld [vmem:[%s8045_s0 + $0x10] sm:$0xff]   ;;  %v6185_v59 = vld [vmem:[#allocation16 + $0x1b4] ss:$8 sps:$4 sm:$0xff]   ;;  %v6201_v58 = vld [vmem:[#allocation16 + $0x210] ss:$8 sps:$4 sm:$0xff]  }
 0xd6f   :  { %v5100_v50 = vpack.c.bf16 %v3652_v53, %v3654_v49  ;;  %v5106_v47 = vpack.c.bf16 %v3648_v48, %v3650_v4  ;;  %v7890_v16 = vsel %vm1625_vm10, %v4130_v19, %v4132_v62  ;;  %v7894_v22 = vsel %vm1625_vm10, %v4132_v62, %v4126_v27  ;;  %v6162_v53 = vld [vmem:[#allocation16 + $0x140] ss:$8 sps:$4 sm:$0xff]   ;;  %5343 = vmatpush3.bf16.msra.mxu0 %v6249_v37  ;;  %v6173_v4 = vld [vmem:[#allocation16 + $0x174] ss:$8 sps:$4 sm:$0xff]   ;;  %v6177_v19 = vld [vmem:[#allocation16 + $0x190] ss:$8 sps:$4 sm:$0xff]  }
 0xd70   :  { %v5182_v43 = vpack.c.bf16 %v7894_v22, %v7890_v16  ;;  %v7900_v17 = vsel %vm1625_vm10, %v4129_v25, %v4131_v23  ;;  %v7906_v57 = vsel %vm1625_vm10, %v4131_v23, %v4125_v30  ;;  %v6156_v30 = vld [vmem:[#allocation16 + $0x120] ss:$8 sps:$4 sm:$0xff]   ;;  %v6164_v25 = vld [vmem:[#allocation16 + $0x144] ss:$8 sps:$4 sm:$0xff]   ;;  %5344 = vmatprep.subr.bf16.mxu0 %v6250_v51  ;;  %v6183_v62 = vld [vmem:[#allocation16 + $0x1b0] ss:$8 sps:$4 sm:$0xff]  }
 0xd71   :  { %5101 = vmatprep.mubr.msk.bf16.mxu1 %vm7718_vm8, %v5100_v50  ;;  %v5185_v15 = vpack.c.bf16 %v7906_v57, %v7900_v17  ;;  %v6253_v27 = vld [vmem:[%s8045_s0 + $0x18] sm:$0xff]   ;;  %v6191_v48 = vld [vmem:[#allocation16 + $0x1d4] ss:$8 sps:$4 sm:$0xff]   ;;  %v6268_v26 = vld [vmem:[%s6920_s27 + $0x10] sm:$0xff] }
 0xd72   :  { %5104 = vmatmul.mubr.msk.bf16.vlgmr.msra.gmra.mrb[28].mxu1 %vm7718_vm8, %v5103_v9  ;;  %v6182_v9 = vld [vmem:[#allocation16 + $0x1a4] ss:$8 sps:$4 sm:$0xff]   ;;  %v6186_v49 = vld [vmem:[#allocation16 + $0x1c0] ss:$8 sps:$4 sm:$0xff]   ;;  %v6189_v50 = vld [vmem:[#allocation16 + $0x1d0] ss:$8 sps:$4 sm:$0xff]  }
 0xd73   :  { %4073 = vmatpush1.bf16.msra.mxu1 %v6150_v0  ;;  %5107 = vmatprep.mubr.msk.bf16.mxu1 %vm7735_vm11, %v5106_v47  ;;  %v6188_v23 = vld [vmem:[#allocation16 + $0x1c4] ss:$8 sps:$4 sm:$0xff]   ;;  %v6192_v47 = vld [vmem:[#allocation16 + $0x1e0] ss:$8 sps:$4 sm:$0xff]   ;;  %v6213_v32 = vld [vmem:[#allocation16 + $0x250] ss:$8 sps:$4 sm:$0xff]  }
 0xd74   :  { %4074 = vmatprep.subr.bf16.mxu1 %v6155_v35  ;;  %5345 = vmatpush3.bf16.msra.mxu0 %v6251_v54  ;;  %v6194_v0 = vld [vmem:[#allocation16 + $0x1e4] ss:$8 sps:$4 sm:$0xff]   ;;  %v6197_v35 = vld [vmem:[#allocation16 + $0x1f4] ss:$8 sps:$4 sm:$0xff]   ;;  %v6204_v44 = vld [vmem:[#allocation16 + $0x220] ss:$8 sps:$4 sm:$0xff]  }
 0xd75   :  { %5346 = vmatprep.subr.bf16.mxu0 %v6252_v7  ;;  %v6206_v41 = vld [vmem:[#allocation16 + $0x224] ss:$8 sps:$4 sm:$0xff]   ;;  %v6210_v11 = vld [vmem:[#allocation16 + $0x240] ss:$8 sps:$4 sm:$0xff]   ;;  %v6221_v60 = vld [vmem:[#allocation16 + $0x274] ss:$8 sps:$4 sm:$0xff]  }
 0xd76   :  { %v6216_v63 = vld [vmem:[#allocation16 + $0x260] ss:$8 sps:$4 sm:$0xff]   ;;  %v6224_v24 = vld [vmem:[#allocation16 + $0x284] ss:$8 sps:$4 sm:$0xff]   ;;  %v6266_v21 = vld [vmem:[%s6920_s27] sm:$0xff] }
 0xd77   :  { %4075 = vmatpush1.bf16.msra.mxu1 %v6153_v6  ;;  %v6195_v6 = vld [vmem:[#allocation16 + $0x1f0] ss:$8 sps:$4 sm:$0xff]   ;;  %v6222_v56 = vld [vmem:[#allocation16 + $0x280] ss:$8 sps:$4 sm:$0xff]   ;;  %v6230_v37 = vld [vmem:[#allocation16 + $0x2a4] ss:$8 sps:$4 sm:$0xff]  }
 0xd78   :  { %4076 = vmatprep.subr.bf16.mxu1 %v6158_v3  ;;  %5347 = vmatpush3.bf16.msra.mxu0 %v6253_v27  ;;  %v6200_v3 = vld [vmem:[#allocation16 + $0x204] ss:$8 sps:$4 sm:$0xff]   ;;  %v6228_v51 = vld [vmem:[#allocation16 + $0x2a0] ss:$8 sps:$4 sm:$0xff]   ;;  %v6255_v16 = vld [vmem:[%s8045_s0 + $0x20] sm:$0xff]  }
 0xd79   :  { %v6236_v54 = vld [vmem:[#allocation16 + $0x2c4] ss:$8 sps:$4 sm:$0xff]   ;;  %v6234_v7 = vld [vmem:[#allocation16 + $0x2c0] ss:$8 sps:$4 sm:$0xff]  }
 0xd7a   :  { %5110 = vmatmul.mubr.msk.bf16.gmra.mrb[32].mxu1 %vm7735_vm11, %v5109_v20  ;;  %v6180_v20 = vld [vmem:[#allocation16 + $0x1a0] ss:$8 sps:$4 sm:$0xff]   ;;  %v6242_v27 = vld [vmem:[#allocation16 + $0x2e4] ss:$8 sps:$4 sm:$0xff]  }
 0xd7b   :  { %4077 = vmatpush1.bf16.msra.mxu1 %v6156_v30  ;;  %4104 = vmatprep.mubr.bf16.mxu1 %v3603_v46  ;;  %v6165_v46 = vld [vmem:[#allocation16 + $0x150] ss:$8 sps:$4 sm:$0xff]   ;;  %v6198_v30 = vld [vmem:[#allocation16 + $0x200] ss:$8 sps:$4 sm:$0xff]  }
 0xd7c   :  { %4078 = vmatprep.subr.bf16.mxu1 %v6161_v61  ;;  %v6203_v61 = vld [vmem:[#allocation16 + $0x214] ss:$8 sps:$4 sm:$0xff]   ;;  %v6259_v17 = vld [vmem:[%s8045_s0 + $0x30] sm:$0xff]   ;;  %v6260_v57 = vld [vmem:[%s8045_s0 + $0x78] sm:$0xff]  }
 0xd7d   :  { %v6257_v22 = vld [vmem:[%s8045_s0 + $0x28] sm:$0xff]  }
 0xd7f   :  { %4079 = vmatpush1.bf16.msra.mxu1 %v6159_v34  ;;  %v6209_v34 = vld [vmem:[#allocation16 + $0x234] ss:$8 sps:$4 sm:$0xff]  }
 0xd80   :  { %4080 = vmatprep.subr.bf16.mxu1 %v6164_v25  ;;  %v6225_v25 = vld [vmem:[#allocation16 + $0x290] ss:$8 sps:$4 sm:$0xff]  }
 0xd83   :  { %4081 = vmatpush1.bf16.msra.mxu1 %v6162_v53  ;;  %v6233_v53 = vld [vmem:[#allocation16 + $0x2b4] ss:$8 sps:$4 sm:$0xff]  }
 0xd84   :  { %4082 = vmatprep.subr.bf16.mxu1 %v6167_v31  ;;  %v6231_v31 = vld [vmem:[#allocation16 + $0x2b0] ss:$8 sps:$4 sm:$0xff]  }
 0xd87   :  { %4083 = vmatpush1.bf16.msra.mxu1 %v6165_v46  ;;  %v6239_v46 = vld [vmem:[#allocation16 + $0x2d4] ss:$8 sps:$4 sm:$0xff]  }
 0xd88   :  { %4084 = vmatprep.subr.bf16.mxu1 %v6170_v55  ;;  %v6237_v55 = vld [vmem:[#allocation16 + $0x2d0] ss:$8 sps:$4 sm:$0xff]  }
 0xd8b   :  { %4085 = vmatpush1.bf16.msra.mxu1 %v6168_v5  ;;  %v6240_v5 = vld [vmem:[#allocation16 + $0x2e0] ss:$8 sps:$4 sm:$0xff]  }
 0xd8c   :  { %4086 = vmatprep.subr.bf16.mxu1 %v6173_v4  ;;  %v6245_v4 = vld [vmem:[#allocation16 + $0x2f4] ss:$8 sps:$4 sm:$0xff]  }
 0xd8f   :  { %4087 = vmatpush1.bf16.msra.mxu1 %v6171_v18  ;;  %v6243_v18 = vld [vmem:[#allocation16 + $0x2f0] ss:$8 sps:$4 sm:$0xff]  }
 0xd90   :  { %4088 = vmatprep.subr.bf16.mxu1 %v6176_v28  ;;  %v4417_v28 = vrot.slane %v7375_v12, %v7134_v8 }
 0xd93   :  { %4089 = vmatpush1.bf16.msra.mxu1 %v6174_v36 }
 0xd94   :  { %4090 = vmatprep.subr.bf16.mxu1 %v6179_v39  ;;  %v4430_v39 = vld [vmem:[#allocation24] sm:$0xff] }
 0xd97   :  { %4091 = vmatpush1.bf16.msra.mxu1 %v6177_v19 }
 0xd98   :  { %4092 = vmatprep.subr.bf16.mxu1 %v6182_v9 }
 0xd9b   :  { %4093 = vmatpush1.bf16.msra.mxu1 %v6180_v20  ;;  %v4431_v20 = vld [vmem:[#allocation24 + $0x8] sm:$0xff] }
 0xd9c   :  { %4094 = vmatprep.subr.bf16.mxu1 %v6185_v59 }
 0xd9f   :  { %4095 = vmatpush1.bf16.msra.mxu1 %v6183_v62 }
 0xda0   :  { %4096 = vmatprep.subr.bf16.mxu1 %v6188_v23  ;;  %v4432_v23 = vld [vmem:[#allocation24 + $0x10] sm:$0xff] }
 0xda3   :  { %4097 = vmatpush1.bf16.msra.mxu1 %v6186_v49 }
 0xda4   :  { %4098 = vmatprep.subr.bf16.mxu1 %v6191_v48 }
 0xda7   :  { %4099 = vmatpush1.bf16.msra.mxu1 %v6189_v50 }
 0xda8   :  { %4100 = vmatprep.subr.bf16.mxu1 %v6194_v0  ;;  %v4433_v0 = vld [vmem:[#allocation24 + $0x18] sm:$0xff] }
 0xdab   :  { %4101 = vmatpush1.bf16.msra.mxu1 %v6192_v47  ;;  %v4488_v47 = vrot.slane %v7275_v29, %v7134_v8 }
 0xdac   :  { %4102 = vmatprep.subr.bf16.mxu1 %v6197_v35 }
 0xdaf   :  { %4103 = vmatpush1.bf16.msra.mxu1 %v6195_v6 }
 0xdb0   :  { %4346 = vmatprep.subr.bf16.mxu1 %v6200_v3  ;;  %v4421_v3 = vrot.slane %v7375_v12, %v7137_v10 }
 0xdb2   :  { %4105 = vmatmul.mubr.bf16.vlgmr.msra.gmra.mrb[28].mxu1 %v3602_v13  ;;  %v6215_v13 = vld [vmem:[#allocation16 + $0x254] ss:$8 sps:$4 sm:$0xff]  }
 0xdb3   :  { %4114 = vmatprep.mubr.bf16.mxu1 %v3605_v40  ;;  %4347 = vmatpush1.bf16.msra.mxu1 %v6198_v30  ;;  %v6218_v40 = vld [vmem:[#allocation16 + $0x264] ss:$8 sps:$4 sm:$0xff]  }
 0xdb4   :  { %4348 = vmatprep.subr.bf16.mxu1 %v6203_v61 }
 0xdb7   :  { %4349 = vmatpush1.bf16.msra.mxu1 %v6201_v58 }
 0xdb8   :  { %4350 = vmatprep.subr.bf16.mxu1 %v6206_v41 }
 0xdba   :  { %4115 = vmatmul.mubr.bf16.gmra.mrb[32].mxu1 %v3604_v52  ;;  %v6219_v52 = vld [vmem:[#allocation16 + $0x270] ss:$8 sps:$4 sm:$0xff]  }
 0xdbb   :  { %4351 = vmatpush1.bf16.msra.mxu1 %v6204_v44  ;;  %5177 = vmatprep.mubr.msk.bf16.mxu1 %vm7762_vm13, %v5176_v14  ;;  %v6227_v14 = vld [vmem:[#allocation16 + $0x294] ss:$8 sps:$4 sm:$0xff]  }
 0xdbc   :  { %4352 = vmatprep.subr.bf16.mxu1 %v6209_v34 }
 0xdbf   :  { %4353 = vmatpush1.bf16.msra.mxu1 %v6207_v38 }
 0xdc0   :  { %4354 = vmatprep.subr.bf16.mxu1 %v6212_v33 }
 0xdc3   :  { %4355 = vmatpush1.bf16.msra.mxu1 %v6210_v11 }
 0xdc4   :  { %4356 = vmatprep.subr.bf16.mxu1 %v6215_v13  ;;  %v4434_v13 = vld [vmem:[#allocation24 + $0x20] sm:$0xff] }
 0xdc7   :  { %4357 = vmatpush1.bf16.msra.mxu1 %v6213_v32 }
 0xdc8   :  { %4358 = vmatprep.subr.bf16.mxu1 %v6218_v40 }
 0xdcb   :  { %4359 = vmatpush1.bf16.msra.mxu1 %v6216_v63 }
 0xdcc   :  { %4360 = vmatprep.subr.bf16.mxu1 %v6221_v60 }
 0xdcf   :  { %4361 = vmatpush1.bf16.msra.mxu1 %v6219_v52 }
 0xdd0   :  { %4362 = vmatprep.subr.bf16.mxu1 %v6224_v24  ;;  %v4435_v24 = vld [vmem:[#allocation24 + $0x28] sm:$0xff] }
 0xdd3   :  { %4363 = vmatpush1.bf16.msra.mxu1 %v6222_v56 }
 0xdd4   :  { %4364 = vmatprep.subr.bf16.mxu1 %v6227_v14 }
 0xdd7   :  { %4365 = vmatpush1.bf16.msra.mxu1 %v6225_v25 }
 0xdd8   :  { %4366 = vmatprep.subr.bf16.mxu1 %v6230_v37 }
 0xddb   :  { %4367 = vmatpush1.bf16.msra.mxu1 %v6228_v51  ;;  %v4436_v51 = vld [vmem:[#allocation24 + $0x30] sm:$0xff] }
 0xddc   :  { %4368 = vmatprep.subr.bf16.mxu1 %v6233_v53 }
 0xddf   :  { %4369 = vmatpush1.bf16.msra.mxu1 %v6231_v31 }
 0xde0   :  { %4370 = vmatprep.subr.bf16.mxu1 %v6236_v54 }
 0xde3   :  { %4371 = vmatpush1.bf16.msra.mxu1 %v6234_v7 }
 0xde4   :  { %4372 = vmatprep.subr.bf16.mxu1 %v6239_v46 }
 0xde7   :  { %4373 = vmatpush1.bf16.msra.mxu1 %v6237_v55  ;;  %v4437_v55 = vld [vmem:[#allocation24 + $0x38] sm:$0xff] }
 0xde8   :  { %4374 = vmatprep.subr.bf16.mxu1 %v6242_v27 }
 0xdeb   :  { %4375 = vmatpush1.bf16.msra.mxu1 %v6240_v5 }
 0xdec   :  { %4376 = vmatprep.subr.bf16.mxu1 %v6245_v4 }
 0xdef   :  { %4377 = vmatpush1.bf16.msra.mxu1 %v6243_v18 }
 0xdf0   :  { %5763 = vmatprep.subr.bf16.mxu1 %v7623_v2 }
 0xdf2   :  { %5180 = vmatmul.mubr.msk.bf16.vlgmr.msra.gmra.mrb[28].mxu1 %vm7762_vm13, %v5179_v45  ;;  %v6254_v45 = vld [vmem:[%s8045_s0 + $0x60] sm:$0xff]  }
 0xdf3   :  { %5183 = vmatprep.mubr.msk.bf16.mxu1 %vm7776_vm2, %v5182_v43  ;;  %5765 = vmatpush3.bf16.msra.mxu1 %v7623_v2  ;;  %v6269_v2 = vld [vmem:[%s6920_s27 + $0x18] sm:$0xff]  ;;  %v6258_v43 = vld [vmem:[%s8045_s0 + $0x70] sm:$0xff]  }
 0xdf4   :  { %5348 = vmatprep.subr.bf16.mxu0 %v6254_v45 }
 0xdf5   :  { %5349 = vmatpush3.bf16.msra.mxu0 %v6255_v16 }
 0xdf6   :  { %5350 = vmatprep.subr.bf16.mxu0 %v6256_v42 }
 0xdf9   :  { %5351 = vmatpush3.bf16.msra.mxu0 %v6257_v22 }
 0xdfa   :  { %5186 = vmatmul.mubr.msk.bf16.gmra.mrb[32].mxu1 %vm7776_vm2, %v5185_v15  ;;  %5352 = vmatprep.subr.bf16.mxu0 %v6258_v43  ;;  %v6261_v15 = vld [vmem:[%s8045_s0 + $0x38] sm:$0xff]  }
 0xdfb   :  { %5667 = vmatprep.mubr.msk.f32.mxu1 %vm741_vm6, %v6266_v21  ;;  %v4492_v21 = vrot.slane %v7275_v29, %v7137_v10 }
 0xdfd   :  { %5353 = vmatpush3.bf16.msra.mxu0 %v6259_v17 }
 0xdfe   :  { %5354 = vmatprep.subr.bf16.mxu0 %v6260_v57 }
 0xe01   :  { %5355 = vmatpush3.bf16.msra.mxu0 %v6261_v15 }
 0xe02   :  { %5668 = vmatmul.mubr.msk.f32.vlgmr.msra.gmra.mrb[36].mxu1 %vm741_vm6, %v6267_v1 }
 0xe03   :  { %5670 = vmatprep.mubr.msk.f32.mxu1 %vm741_vm6, %v6268_v26 }
 0xe06   :  { %5671 = vmatmul.mubr.msk.f32.gmra.mrb[38].mxu1 %vm741_vm6, %v6269_v2 }
 0xec5   :  { %v4380_v36 = vpop.f32.mrb[28].mxu1 }
 0xec6   :  { %v4422_v19 = vmul.f32 %v4417_v28, %v4380_v36  ;;  %v4382_v9 = vpop.f32.mrb[29].mxu1 }
 0xec7   :  { %v4423_v59 = vmul.f32 %v4417_v28, %v4382_v9  ;;  %v4384_v62 = vpop.f32.mrb[30].mxu1 }
 0xec8   :  { %v4438_v49 = vadd.f32 %v4430_v39, %v4422_v19  ;;  %v4424_v48 = vmul.f32 %v4417_v28, %v4384_v62  ;;  %v4386_v50 = vpop.f32.mrb[31].mxu1 }
 0xec9   :  { %v4439_v35 = vadd.f32 %v4431_v20, %v4423_v59  ;;  %v4425_v6 = vmul.f32 %v4417_v28, %v4386_v50 }
 0xeca   :  { %vm4446_vm6 = vcmp.ge.f32.partialorder %v4438_v49, 0.0  ;;  %v4454_v30 = vmul.f32 1.4142135, %v4438_v49  ;;  %v4462_v61 = vmul.f32 0.28284273, %v4438_v49  ;;  %v4440_v58 = vadd.f32 %v4432_v23, %v4424_v48 }
 0xecb   :  { %vm4447_vm9 = vcmp.ge.f32.partialorder %v4439_v35, 0.0  ;;  %v4455_v41 = vmul.f32 1.4142135, %v4439_v35  ;;  %v4463_v44 = vmul.f32 0.28284273, %v4439_v35  ;;  %v4441_v34 = vadd.f32 %v4433_v0, %v4425_v6 }
 0xecc   :  { %v4470_v38 = vsel %vm4446_vm6, %v4454_v30, %v4462_v61  ;;  %vm4448_vm10 = vcmp.ge.f32.partialorder %v4440_v58, 0.0  ;;  %v4456_v33 = vmul.f32 1.4142135, %v4440_v58  ;;  %v4464_v11 = vmul.f32 0.28284273, %v4440_v58 }
 0xecd   :  { %v4493_v32 = vmul.f32 %v4488_v47, %v4470_v38  ;;  %vm4449_vm8 = vcmp.ge.f32.partialorder %v4441_v34, 0.0  ;;  %v4457_v8 = vmul.f32 1.4142135, %v4441_v34  ;;  %v4465_v40 = vmul.f32 0.28284273, %v4441_v34  ;;  %v4390_v63 = vpop.f32.mrb[32].mxu1 }
 0xece   :  { %v4472_v60 = vsel %vm4448_vm10, %v4456_v33, %v4464_v11  ;;  %v4426_v12 = vmul.f32 %v4421_v3, %v4390_v63  ;;  %v4392_v52 = vpop.f32.mrb[33].mxu1  ;;  %v4471_v56 = vsel %vm4447_vm9, %v4455_v41, %v4463_v44  ;;  %v5187_v35 = vld [vmem:[#allocation25] ss:$0 sm:$0xff] }
 0xecf   :  { %v4495_v14 = vmul.f32 %v4488_v47, %v4472_v60  ;;  %v4427_v25 = vmul.f32 %v4421_v3, %v4392_v52  ;;  %v4394_v37 = vpop.f32.mrb[34].mxu1  ;;  %v4473_v53 = vsel %vm4449_vm8, %v4457_v8, %v4465_v40  ;;  %v4494_v31 = vmul.f32 %v4488_v47, %v4471_v56 }
 0xed0   :  { %v4442_v54 = vadd.f32 %v4434_v13, %v4426_v12  ;;  %v4428_v7 = vmul.f32 %v4421_v3, %v4394_v37  ;;  %v4396_v46 = vpop.f32.mrb[35].mxu1  ;;  %v4496_v27 = vmul.f32 %v4488_v47, %v4473_v53 }
 0xed1   :  { %v4443_v5 = vadd.f32 %v4435_v24, %v4427_v25  ;;  %v4429_v4 = vmul.f32 %v4421_v3, %v4396_v46  ;;  %v4501_v18 = vpack.c.bf16 %v4495_v14, %v4493_v32 }
 0xed2   :  { %vm4450_vm11 = vcmp.ge.f32.partialorder %v4442_v54, 0.0  ;;  %v4458_v1 = vmul.f32 1.4142135, %v4442_v54  ;;  %v4466_v26 = vmul.f32 0.28284273, %v4442_v54  ;;  %v4444_v2 = vadd.f32 %v4436_v51, %v4428_v7 }
 0xed3   :  { %vm4451_vm13 = vcmp.ge.f32.partialorder %v4443_v5, 0.0  ;;  %v4459_v45 = vmul.f32 1.4142135, %v4443_v5  ;;  %v4467_v16 = vmul.f32 0.28284273, %v4443_v5  ;;  %v4445_v42 = vadd.f32 %v4437_v55, %v4429_v4 }
 0xed4   :  { %vm4452_vm2 = vcmp.ge.f32.partialorder %v4444_v2, 0.0  ;;  %v4460_v22 = vmul.f32 1.4142135, %v4444_v2  ;;  %v4468_v43 = vmul.f32 0.28284273, %v4444_v2  ;;  %v4502_v17 = vpack.c.bf16 %v4496_v27, %v4494_v31 }
 0xed5   :  { %vm4453_vm0 = vcmp.ge.f32.partialorder %v4445_v42, 0.0  ;;  %v4461_v57 = vmul.f32 1.4142135, %v4445_v42  ;;  %v4469_v15 = vmul.f32 0.28284273, %v4445_v42  ;;  %v4475_v28 = vsel %vm4451_vm13, %v4459_v45, %v4467_v16  ;;  %v5669_v23 = vpop.f32.mrb[36].mxu1 }
 0xed6   :  { %4672 = vmatprep.mubr.bf16.mxu0 %v4502_v17  ;;  %v4498_v36 = vmul.f32 %v4492_v21, %v4475_v28  ;;  %v4474_v10 = vsel %vm4450_vm11, %v4458_v1, %v4466_v26  ;;  %v4476_v29 = vsel %vm4452_vm2, %v4460_v22, %v4468_v43  ;;  %v4755_v49 = vpop.f32.mrb[37].mxu1 }
 0xed7   :  { %4673 = vmatmul.mubr.bf16.vlgmr.msra.gmra.mrb[32].mxu0 %v4501_v18  ;;  %v4477_v39 = vsel %vm4453_vm0, %v4461_v57, %v4469_v15  ;;  %v4497_v19 = vmul.f32 %v4492_v21, %v4474_v10  ;;  %v4499_v9 = vmul.f32 %v4492_v21, %v4476_v29 }
 0xed8   :  { %v4500_v20 = vmul.f32 %v4492_v21, %v4477_v39 }
 0xed9   :  { %v4503_v59 = vpack.c.bf16 %v4499_v9, %v4497_v19  ;;  %v5672_v48 = vpop.f32.mrb[38].mxu1 }
 0xeda   :  { %v4504_v62 = vpack.c.bf16 %v4500_v20, %v4498_v36  ;;  %v4765_v50 = vpop.f32.mrb[39].mxu1 }
 0xedc   :  { %4680 = vmatprep.mubr.bf16.mxu0 %v4504_v62 }
 0xedf   :  { %4681 = vmatmul.mubr.bf16.gmra.mrb[36].mxu0 %v4503_v59 }
 0xfaa   :  { %v5356_v0 = vpop.f32.mrb[32].mxu0 }
 0xfab   :  { %v5357_v47 = vpop.f32.mrb[33].mxu0 }
 0xfac   :  { %v5358_v6 = vadd.f32 %v5357_v47, %v5356_v0  ;;  %v5359_v3 = vpop.f32.mrb[34].mxu0 }
 0xfad   :  { %v5360_v30 = vpop.f32.mrb[35].mxu0 }
 0xfae   :  { %v5361_v61 = vadd.f32 %v5360_v30, %v5359_v3  ;;  %v4675_v58 = vadd.f32 %v5358_v6, %v5187_v35 }
 0xfb0   :  { %v4678_v41 = vadd.f32 %v5361_v61, %v5187_v35  ;;  %v4756_v44 = vadd.f32 %v4755_v49, %v4675_v58 }
 0xfb2   :  { %v4761_v34 = vadd.f32 %v5669_v23, %v4678_v41  ;;  %4774 = vst.msk [vmem:[%s6925_s30] sm:$0xff] %vm744_vm7, %v4756_v44  ;;  %v5362_v38 = vpop.f32.mrb[36].mxu0 }
 0xfb3   :  { %v5363_v33 = vpop.f32.mrb[37].mxu0 }
 0xfb4   :  { %4775 = vst.msk [vmem:[%s6925_s30 + $0x8] sm:$0xff] %vm744_vm7, %v4761_v34  ;;  %v5364_v11 = vadd.f32 %v5363_v33, %v5362_v38  ;;  %v5365_v13 = vpop.f32.mrb[38].mxu0 }
 0xfb5   :  { %v5366_v32 = vpop.f32.mrb[39].mxu0 }
 0xfb6   :  { %v5367_v8 = vadd.f32 %v5366_v32, %v5365_v13  ;;  %v4683_v40 = vadd.f32 %v5364_v11, %v5187_v35 }
 0xfb8   :  { %v4686_v63 = vadd.f32 %v5367_v8, %v5187_v35  ;;  %v4766_v60 = vadd.f32 %v4765_v50, %v4683_v40 }
 0xfba   :  { %v4771_v12 = vadd.f32 %v5672_v48, %v4686_v63  ;;  %4776 = vst.msk [vmem:[%s6925_s30 + $0x10] sm:$0xff] %vm744_vm7, %v4766_v60 }
 0xfbc   :  { %4777 = vst.msk [vmem:[%s6925_s30 + $0x18] sm:$0xff] %vm744_vm7, %v4771_v12 }
 0xfbd   :  { %4782 = vsyncpa [#allocation3], 1 }
 0xfbe   :  { %4783 = vsyncpa [#allocation5], 1 }
 0xfbf   :  { %4784 = vsyncpa [#allocation8], 1 }
 0xfc0   :  { %4785 = vsyncpa [#allocation11], 1 }
 0xfc1   :  { %4786 = vsyncpa [#allocation14], 1 }
 0xfc2   :  { %4787 = vsyncpa [#allocation17], 1 }
 0xfc3   :  { %4788 = vsyncpa [#allocation20], 1 }
 0xfc4   :  { %4789 = vsyncpa [#allocation23], 1 }
 0xfc5   :  { %4790 = vsyncpa [#allocation26], 1 }
 0xfc6   :  { %4791 = vsyncpa [#allocation29], 1 }

</bundles_post_ra>
